<compile_context>
chip_gen: v6e
topology: v6e:2x2x1
jax: 0.10.0
libtpu: 0.0.40
codegen_flags: <defaults>
</compile_context>

<pallas_src>
import functools

import jax
import jax.numpy as jnp
from jax import lax
from jax.experimental import pallas as pl
from jax.experimental.pallas import tpu as pltpu

EPS = 1e-5
LANE = 128


def _round_up(x, m):
    return (x + m - 1) // m * m


# ----------------------------------------------------------------------------
# Fused residual-block kernel
# ----------------------------------------------------------------------------
def _residual_kernel(xg_ref, w1_ref, w2_ref, w3_ref, b3_ref,
                     g1_ref, bt1_ref, g2_ref, bt2_ref, m_ref,
                     o_ref, x1_ref, y1g_ref, *, R, G, C1, Cp, Kc, Wl, M):
    """Whole residual block on flattened (row, channel) slabs.

    Row layout: each image occupies (Ho+2)*(Wo+2) consecutive rows (a 1-pixel
    zero border around the Ho x Wo output grid); G zero guard rows sit on each
    side of the slab so every conv tap is one contiguous row-shifted slice.
    A KxK conv is then a sum of row-shifted matmuls on 2-D tiles (MXU only);
    here the taps are additionally packed along K for MXU depth utilization.
    """
    m = m_ref[...]                          # (R, 1): 1.0 at interior rows
    inv_m = 1.0 / float(M)

    # ---- conv1: gather Kc*Kc shifted taps into one deep-K bf16 slab -------
    n_taps = Kc * Kc
    for t in range(n_taps):                 # static offsets (trace-time loop)
        a, b = divmod(t, Kc)
        d = (a - 1) * Wl + (b - 1)
        x1_ref[:, pl.ds(t * C1, C1)] = xg_ref[pl.ds(G + d, R), :]
    acc = jnp.dot(x1_ref[...], w1_ref[...],
                  preferred_element_type=jnp.float32)          # (R, Cp) f32

    # ---- BN1 (training-mode batch stats, f32) + ReLU -----------------------
    s1 = jnp.sum(acc * m, axis=0, keepdims=True)               # (1, Cp)
    q1 = jnp.sum(acc * acc * m, axis=0, keepdims=True)
    mean1 = s1 * inv_m
    var1 = jnp.maximum(q1 * inv_m - mean1 * mean1, 0.0)
    scale1 = g1_ref[...] * lax.rsqrt(var1 + EPS)
    shift1 = bt1_ref[...] - mean1 * scale1
    y1 = jnp.maximum(acc * scale1 + shift1, 0.0) * m           # mask == conv2 zero-pad

    # stage y1 (bf16, with zero guard rows) in VMEM for conv2's shifted reads
    y1g_ref[pl.ds(0, G), :] = jnp.zeros((G, Cp), jnp.bfloat16)
    y1g_ref[pl.ds(G + R, G), :] = jnp.zeros((G, Cp), jnp.bfloat16)
    y1g_ref[pl.ds(G, R), :] = y1.astype(jnp.bfloat16)

    # ---- conv2 (3x3, stride 1): taps packed in pairs -> K=256 per matmul ---
    def tap_off(t):
        a, b = divmod(t, 3)
        return (a - 1) * Wl + (b - 1)

    acc2 = jnp.zeros((R, Cp), jnp.float32)
    for p in range(4):                      # 4 pairs + 1 single tap
        t0 = 2 * p
        lhs = jnp.concatenate(
            [y1g_ref[pl.ds(G + tap_off(t0), R), :],
             y1g_ref[pl.ds(G + tap_off(t0 + 1), R), :]], axis=1)   # (R, 2Cp)
        acc2 += jnp.dot(lhs, w2_ref[pl.ds(t0 * Cp, 2 * Cp), :],
                        preferred_element_type=jnp.float32)
    acc2 += jnp.dot(y1g_ref[pl.ds(G + tap_off(8), R), :],
                    w2_ref[pl.ds(8 * Cp, Cp), :],
                    preferred_element_type=jnp.float32)

    # ---- BN2 ----------------------------------------------------------------
    s2 = jnp.sum(acc2 * m, axis=0, keepdims=True)
    q2 = jnp.sum(acc2 * acc2 * m, axis=0, keepdims=True)
    mean2 = s2 * inv_m
    var2 = jnp.maximum(q2 * inv_m - mean2 * mean2, 0.0)
    scale2 = g2_ref[...] * lax.rsqrt(var2 + EPS)
    shift2 = bt2_ref[...] - mean2 * scale2

    # ---- shortcut (1x1 strided conv or identity) computed LAST so its slab
    #      is not live across the conv2 loop (keeps register/VMEM pressure low)
    skip = jnp.dot(xg_ref[pl.ds(G, R), :], w3_ref[...],
                   preferred_element_type=jnp.float32) + b3_ref[...]

    o_ref[...] = jnp.maximum(acc2 * scale2 + shift2 + skip, 0.0)


def _full_spec(shape):
    return pl.BlockSpec(shape, lambda i: (0,) * len(shape))


def residual_block_pallas(xg, w1c, w2c, w3c, b3c, g1, bt1, g2, bt2, m,
                          *, R, G, C1, Cp, Kc, Wl, M):
    Rg = R + 2 * G
    K1 = Kc * Kc * C1
    kern = functools.partial(_residual_kernel, R=R, G=G, C1=C1, Cp=Cp,
                             Kc=Kc, Wl=Wl, M=M)
    return pl.pallas_call(
        kern,
        out_shape=jax.ShapeDtypeStruct((R, Cp), jnp.float32),
        grid=(1,),
        in_specs=[_full_spec((Rg, C1)),
                  _full_spec((K1, Cp)),
                  _full_spec((9 * Cp, Cp)),
                  _full_spec((C1, Cp)),
                  _full_spec((1, Cp)), _full_spec((1, Cp)), _full_spec((1, Cp)),
                  _full_spec((1, Cp)), _full_spec((1, Cp)),
                  _full_spec((R, 1))],
        out_specs=_full_spec((R, Cp)),
        scratch_shapes=[pltpu.VMEM((R, K1), jnp.bfloat16),   # conv1 tap-gather slab
                        pltpu.VMEM((Rg, Cp), jnp.bfloat16)], # guarded y1 staging
        compiler_params=pltpu.CompilerParams(
            dimension_semantics=("arbitrary",),
            vmem_limit_bytes=32 * 1024 * 1024),
    )(xg, w1c, w2c, w3c, b3c, g1, bt1, g2, bt2, m)


# ----------------------------------------------------------------------------
# Wrapper: layout prep (space-to-depth, bordered flattened slab) + weight remap
# ----------------------------------------------------------------------------
def residual_forward(x_nchw, params, *, strides, use_1x1conv):
    s = int(strides)
    N, Cin, H, W = x_nchw.shape
    Cout = params["conv1_w"].shape[0]
    if not use_1x1conv:
        assert s == 1 and Cin == Cout, "identity shortcut needs stride=1, Cin==Cout"

    Ho = (H - 1) // s + 1
    Wo = (W - 1) // s + 1
    Cp = _round_up(Cout, LANE)             # lane-dense channel padding
    C1 = s * s * Cin                       # space-to-depth channels
    Kc = 3 if s == 1 else 2                # coarse conv1 tap count per axis
    Hl, Wl = Ho + 2, Wo + 2                # per-image layout (1-pixel border)
    R = N * Hl * Wl
    G = _round_up(Wl + 1, 16)              # guard rows >= max |tap offset|
    M = N * Ho * Wo                        # BN normalization count

    # activations (bf16 from the start to halve HBM/VMEM layout traffic):
    # NHWC -> space-to-depth -> bordered, flattened, guarded slab.
    x = jnp.transpose(x_nchw, (0, 2, 3, 1)).astype(jnp.bfloat16)
    x = jnp.pad(x, ((0, 0), (0, Ho * s - H), (0, Wo * s - W), (0, 0)))
    xc = x.reshape(N, Ho, s, Wo, s, Cin).transpose(0, 1, 3, 2, 4, 5)
    xc = xc.reshape(N, Ho, Wo, C1)
    xl = jnp.pad(xc, ((0, 0), (1, 1), (1, 1), (0, 0)))          # (N, Hl, Wl, C1)
    xg = jnp.pad(xl.reshape(R, C1), ((G, G), (0, 0)))           # (Rg, C1) bf16

    # interior-row mask (valid output positions)
    li = lax.broadcasted_iota(jnp.int32, (Hl, Wl), 0)
    lj = lax.broadcasted_iota(jnp.int32, (Hl, Wl), 1)
    interior = (li >= 1) & (li <= Ho) & (lj >= 1) & (lj <= Wo)
    m = jnp.tile(interior.astype(jnp.float32)[None], (N, 1, 1)).reshape(R, 1)

    # conv1 weights: remap 3x3/stride-s onto the KcxKc coarse (phased) grid
    w1 = params["conv1_w"]                                      # (Cout, Cin, 3, 3)
    w1c = jnp.zeros((Kc, Kc, s, s, Cin, Cp), jnp.float32)
    for a in range(Kc):
        for b in range(Kc):
            for ph in range(s):
                for pw in range(s):
                    kh = s * (a - 1) + ph + 1
                    kw = s * (b - 1) + pw + 1
                    if 0 <= kh < 3 and 0 <= kw < 3:
                        w1c = w1c.at[a, b, ph, pw, :, :Cout].set(w1[:, :, kh, kw].T)
    w1c = w1c.reshape(Kc * Kc * C1, Cp).astype(jnp.bfloat16)
    # NOTE: conv1_b / conv2_b are intentionally unused: training-mode BN
    # subtracts the batch mean, so per-channel conv biases cancel exactly.

    # conv2 weights (3x3, stride 1), tap-major so tap pairs are contiguous rows
    w2 = jnp.transpose(params["conv2_w"], (2, 3, 1, 0))          # (3,3,Cin2,Cout)
    w2c = jnp.zeros((3, 3, Cp, Cp), jnp.float32).at[:, :, :Cout, :Cout].set(w2)
    w2c = w2c.reshape(9 * Cp, Cp).astype(jnp.bfloat16)

    # shortcut weights: 1x1 strided conv, or identity embedding
    if use_1x1conv:
        w3 = params["conv3_w"][:, :, 0, 0].T                     # (Cin, Cout)
        b3 = params["conv3_b"]
    else:
        w3 = jnp.eye(Cin, dtype=jnp.float32)
        b3 = jnp.zeros((Cout,), jnp.float32)
    # phase-(0,0) channels of the coarse slab are exactly x[:, :, ::s, ::s]
    w3c = jnp.zeros((C1, Cp), jnp.float32).at[:Cin, :Cout].set(w3).astype(jnp.bfloat16)
    b3c = jnp.zeros((1, Cp), jnp.float32).at[0, :Cout].set(b3)

    def _pad_vec(v):
        return jnp.zeros((1, Cp), jnp.float32).at[0, :Cout].set(v)

    out_flat = residual_block_pallas(
        xg, w1c, w2c, w3c, b3c,
        _pad_vec(params["bn1_gamma"]), _pad_vec(params["bn1_beta"]),
        _pad_vec(params["bn2_gamma"]), _pad_vec(params["bn2_beta"]), m,
        R=R, G=G, C1=C1, Cp=Cp, Kc=Kc, Wl=Wl, M=M)

    out = out_flat.reshape(N, Hl, Wl, Cp)[:, 1:1 + Ho, 1:1 + Wo, :Cout]
    return jnp.transpose(out, (0, 3, 1, 2))                      # back to NCHW


# ----------------------------------------------------------------------------
# Params + pure-JAX reference (for an in-script numeric sanity check)
# ----------------------------------------------------------------------------
def init_residual_params(key, in_channels, num_channels, use_1x1conv):
    ks = jax.random.split(key, 10)
    p = {
        "conv1_w": 0.1 * jax.random.normal(ks[0], (num_channels, in_channels, 3, 3), jnp.float32),
        "conv1_b": 0.1 * jax.random.normal(ks[1], (num_channels,), jnp.float32),
        "conv2_w": 0.1 * jax.random.normal(ks[2], (num_channels, num_channels, 3, 3), jnp.float32),
        "conv2_b": 0.1 * jax.random.normal(ks[3], (num_channels,), jnp.float32),
        "bn1_gamma": 1.0 + 0.1 * jax.random.normal(ks[4], (num_channels,), jnp.float32),
        "bn1_beta": 0.1 * jax.random.normal(ks[5], (num_channels,), jnp.float32),
        "bn2_gamma": 1.0 + 0.1 * jax.random.normal(ks[6], (num_channels,), jnp.float32),
        "bn2_beta": 0.1 * jax.random.normal(ks[7], (num_channels,), jnp.float32),
    }
    if use_1x1conv:
        p["conv3_w"] = 0.1 * jax.random.normal(ks[8], (num_channels, in_channels, 1, 1), jnp.float32)
        p["conv3_b"] = 0.1 * jax.random.normal(ks[9], (num_channels,), jnp.float32)
    return p


def residual_reference(x, params, *, strides, use_1x1conv):
    def conv(x, w, b, stride, pad):
        y = lax.conv_general_dilated(
            x, w, window_strides=(stride, stride),
            padding=((pad, pad), (pad, pad)),
            dimension_numbers=("NCHW", "OIHW", "NCHW"))
        return y + b.reshape(1, -1, 1, 1)

    def bn(y, gamma, beta):
        mean = jnp.mean(y, axis=(0, 2, 3), keepdims=True)
        var = jnp.mean((y - mean) ** 2, axis=(0, 2, 3), keepdims=True)
        yhat = (y - mean) * lax.rsqrt(var + EPS)
        return gamma.reshape(1, -1, 1, 1) * yhat + beta.reshape(1, -1, 1, 1)

    y = jax.nn.relu(bn(conv(x, params["conv1_w"], params["conv1_b"], strides, 1),
                       params["bn1_gamma"], params["bn1_beta"]))
    y = bn(conv(y, params["conv2_w"], params["conv2_b"], 1, 1),
           params["bn2_gamma"], params["bn2_beta"])
    sc = (conv(x, params["conv3_w"], params["conv3_b"], strides, 0)
          if use_1x1conv else x)
    return jax.nn.relu(y + sc)


if __name__ == "__main__":
    # Small shapes consistent with the module: batch=2, in_channels=4,
    # num_channels=8, spatial 16x16, use_1x1conv=True, stride=2.
    N, CIN, H, W = 2, 4, 16, 16
    NUM_CHANNELS, STRIDES, USE_1X1 = 8, 2, True

    key = jax.random.PRNGKey(0)
    kx, kp = jax.random.split(key)
    x = jax.random.uniform(kx, (N, CIN, H, W), dtype=jnp.float32)
    params = init_residual_params(kp, CIN, NUM_CHANNELS, USE_1X1)

    fwd = jax.jit(functools.partial(residual_forward,
                                    strides=STRIDES, use_1x1conv=USE_1X1))
    y = fwd(x, params)
    jax.block_until_ready(y)
    assert y.shape == (N, NUM_CHANNELS, H // STRIDES, W // STRIDES), y.shape

    y_ref = jax.jit(functools.partial(residual_reference,
                                      strides=STRIDES, use_1x1conv=USE_1X1))(x, params)
    # bf16 MXU operands (f32 accumulation / f32 BN stats) vs. the pure-f32
    # reference -> allow bf16-level tolerance on O(1) post-BN outputs.
    err = float(jnp.max(jnp.abs(y - y_ref)))
    assert err < 5e-2, err
    print("KERNEL_OK")
</pallas_src>

<mosaic_0001>
module attributes {stable_mosaic.version = 11 : i64} {
  func.func @_residual_kernel(%arg0: i32, %arg1: memref<232x16xbf16, #tpu.memory_space<vmem>>, %arg2: memref<64x128xbf16, #tpu.memory_space<vmem>>, %arg3: memref<1152x128xbf16, #tpu.memory_space<vmem>>, %arg4: memref<16x128xbf16, #tpu.memory_space<vmem>>, %arg5: memref<1x128xf32, #tpu.memory_space<vmem>>, %arg6: memref<1x128xf32, #tpu.memory_space<vmem>>, %arg7: memref<1x128xf32, #tpu.memory_space<vmem>>, %arg8: memref<1x128xf32, #tpu.memory_space<vmem>>, %arg9: memref<1x128xf32, #tpu.memory_space<vmem>>, %arg10: memref<200x1xf32, #tpu.memory_space<vmem>>, %arg11: memref<200x128xf32, #tpu.memory_space<vmem>>, %arg12: memref<200x64xbf16, #tpu.memory_space<vmem>>, %arg13: memref<232x128xbf16, #tpu.memory_space<vmem>>) attributes {dimension_semantics = [#tpu.dimension_semantics<arbitrary>], iteration_bounds = array<i64: 1>, scalar_prefetch = 0 : i64, scratch_operands = 2 : i64, tpu.core_type = #tpu.core_type<tc>, window_params = [{pipeline_mode = #tpu.pipeline_mode<synchronous>, transform_indices = @transform_0, window_bounds = array<i64: 232, 16>}, {pipeline_mode = #tpu.pipeline_mode<synchronous>, transform_indices = @transform_1, window_bounds = array<i64: 64, 128>}, {pipeline_mode = #tpu.pipeline_mode<synchronous>, transform_indices = @transform_2, window_bounds = array<i64: 1152, 128>}, {pipeline_mode = #tpu.pipeline_mode<synchronous>, transform_indices = @transform_3, window_bounds = array<i64: 16, 128>}, {pipeline_mode = #tpu.pipeline_mode<synchronous>, transform_indices = @transform_4, window_bounds = array<i64: 1, 128>}, {pipeline_mode = #tpu.pipeline_mode<synchronous>, transform_indices = @transform_5, window_bounds = array<i64: 1, 128>}, {pipeline_mode = #tpu.pipeline_mode<synchronous>, transform_indices = @transform_6, window_bounds = array<i64: 1, 128>}, {pipeline_mode = #tpu.pipeline_mode<synchronous>, transform_indices = @transform_7, window_bounds = array<i64: 1, 128>}, {pipeline_mode = #tpu.pipeline_mode<synchronous>, transform_indices = @transform_8, window_bounds = array<i64: 1, 128>}, {pipeline_mode = #tpu.pipeline_mode<synchronous>, transform_indices = @transform_9, window_bounds = array<i64: 200, 1>}, {pipeline_mode = #tpu.pipeline_mode<synchronous>, transform_indices = @transform_10, window_bounds = array<i64: 200, 128>}]} {
    %c0 = arith.constant 0 : index
    %c0_0 = arith.constant 0 : index
    %0 = vector.load %arg10[%c0, %c0_0] : memref<200x1xf32, #tpu.memory_space<vmem>>, vector<200x1xf32>
    %c5 = arith.constant 5 : index
    %c0_1 = arith.constant 0 : index
    %1 = vector.load %arg1[%c5, %c0_1] : memref<232x16xbf16, #tpu.memory_space<vmem>>, vector<200x16xbf16>
    %c0_2 = arith.constant 0 : index
    %c0_3 = arith.constant 0 : index
    %2 = vector.load %arg12[%c0_2, %c0_3] : memref<200x64xbf16, #tpu.memory_space<vmem>>, vector<200x16xbf16>
    tpu.vector_store %arg12[%c0_2, %c0_3], %1 {strides = array<i32>} : memref<200x64xbf16, #tpu.memory_space<vmem>>, vector<200x16xbf16>,
    %c6 = arith.constant 6 : index
    %c0_4 = arith.constant 0 : index
    %3 = vector.load %arg1[%c6, %c0_4] : memref<232x16xbf16, #tpu.memory_space<vmem>>, vector<200x16xbf16>
    %c0_5 = arith.constant 0 : index
    %c16 = arith.constant 16 : index
    %4 = vector.load %arg12[%c0_5, %c16] : memref<200x64xbf16, #tpu.memory_space<vmem>>, vector<200x16xbf16>
    tpu.vector_store %arg12[%c0_5, %c16], %3 {strides = array<i32>} : memref<200x64xbf16, #tpu.memory_space<vmem>>, vector<200x16xbf16>,
    %c15 = arith.constant 15 : index
    %c0_6 = arith.constant 0 : index
    %5 = vector.load %arg1[%c15, %c0_6] : memref<232x16xbf16, #tpu.memory_space<vmem>>, vector<200x16xbf16>
    %c0_7 = arith.constant 0 : index
    %c32 = arith.constant 32 : index
    %6 = vector.load %arg12[%c0_7, %c32] : memref<200x64xbf16, #tpu.memory_space<vmem>>, vector<200x16xbf16>
    tpu.vector_store %arg12[%c0_7, %c32], %5 {strides = array<i32>} : memref<200x64xbf16, #tpu.memory_space<vmem>>, vector<200x16xbf16>,
    %c16_8 = arith.constant 16 : index
    %c0_9 = arith.constant 0 : index
    %7 = vector.load %arg1[%c16_8, %c0_9] : memref<232x16xbf16, #tpu.memory_space<vmem>>, vector<200x16xbf16>
    %c0_10 = arith.constant 0 : index
    %c48 = arith.constant 48 : index
    %8 = vector.load %arg12[%c0_10, %c48] : memref<200x64xbf16, #tpu.memory_space<vmem>>, vector<200x16xbf16>
    tpu.vector_store %arg12[%c0_10, %c48], %7 {strides = array<i32>} : memref<200x64xbf16, #tpu.memory_space<vmem>>, vector<200x16xbf16>,
    %c0_11 = arith.constant 0 : index
    %c0_12 = arith.constant 0 : index
    %9 = vector.load %arg12[%c0_11, %c0_12] : memref<200x64xbf16, #tpu.memory_space<vmem>>, vector<200x64xbf16>
    %c0_13 = arith.constant 0 : index
    %c0_14 = arith.constant 0 : index
    %10 = vector.load %arg2[%c0_13, %c0_14] : memref<64x128xbf16, #tpu.memory_space<vmem>>, vector<64x128xbf16>
    %cst = arith.constant dense<0.000000e+00> : vector<200x128xf32>
    %11 = tpu.matmul %9, %10, %cst {dimension_numbers = #tpu.dot_dimension_numbers<[1], [0], [0], [1], [0, 0, 1, 1], [], []>} : vector<200x64xbf16>, vector<64x128xbf16>, vector<200x128xf32> -> vector<200x128xf32>
    %12 = vector.broadcast %0 : vector<200x1xf32> to vector<200x128xf32>
    %13 = arith.mulf %11, %12 : vector<200x128xf32>
    %cst_15 = arith.constant dense<0.000000e+00> : vector<128xf32>
    %14 = vector.multi_reduction <add>, %13, %cst_15 [0] : vector<200x128xf32> to vector<128xf32>
    %15 = vector.shape_cast %14 : vector<128xf32> to vector<1x128xf32>
    %16 = arith.mulf %11, %11 : vector<200x128xf32>
    %17 = vector.broadcast %0 : vector<200x1xf32> to vector<200x128xf32>
    %18 = arith.mulf %16, %17 : vector<200x128xf32>
    %cst_16 = arith.constant dense<0.000000e+00> : vector<128xf32>
    %19 = vector.multi_reduction <add>, %18, %cst_16 [0] : vector<200x128xf32> to vector<128xf32>
    %20 = vector.shape_cast %19 : vector<128xf32> to vector<1x128xf32>
    %cst_17 = arith.constant 7.812500e-03 : f32
    %21 = vector.broadcast %cst_17 : f32 to vector<1x128xf32>
    %22 = arith.mulf %15, %21 : vector<1x128xf32>
    %cst_18 = arith.constant 7.812500e-03 : f32
    %23 = vector.broadcast %cst_18 : f32 to vector<1x128xf32>
    %24 = arith.mulf %20, %23 : vector<1x128xf32>
    %25 = arith.mulf %22, %22 : vector<1x128xf32>
    %26 = arith.subf %24, %25 : vector<1x128xf32>
    %cst_19 = arith.constant 0.000000e+00 : f32
    %27 = vector.broadcast %cst_19 : f32 to vector<1x128xf32>
    %28 = arith.maximumf %26, %27 : vector<1x128xf32>
    %c0_20 = arith.constant 0 : index
    %c0_21 = arith.constant 0 : index
    %29 = vector.load %arg6[%c0_20, %c0_21] : memref<1x128xf32, #tpu.memory_space<vmem>>, vector<1x128xf32>
    %cst_22 = arith.constant 9.99999974E-6 : f32
    %30 = vector.broadcast %cst_22 : f32 to vector<1x128xf32>
    %31 = arith.addf %28, %30 : vector<1x128xf32>
    %32 = math.rsqrt %31 : vector<1x128xf32>
    %33 = arith.mulf %29, %32 : vector<1x128xf32>
    %c0_23 = arith.constant 0 : index
    %c0_24 = arith.constant 0 : index
    %34 = vector.load %arg7[%c0_23, %c0_24] : memref<1x128xf32, #tpu.memory_space<vmem>>, vector<1x128xf32>
    %35 = arith.mulf %22, %33 : vector<1x128xf32>
    %36 = arith.subf %34, %35 : vector<1x128xf32>
    %37 = vector.broadcast %33 : vector<1x128xf32> to vector<200x128xf32>
    %38 = arith.mulf %11, %37 : vector<200x128xf32>
    %39 = vector.broadcast %36 : vector<1x128xf32> to vector<200x128xf32>
    %40 = arith.addf %38, %39 : vector<200x128xf32>
    %cst_25 = arith.constant 0.000000e+00 : f32
    %41 = vector.broadcast %cst_25 : f32 to vector<200x128xf32>
    %42 = arith.maximumf %40, %41 : vector<200x128xf32>
    %43 = vector.broadcast %0 : vector<200x1xf32> to vector<200x128xf32>
    %44 = arith.mulf %42, %43 : vector<200x128xf32>
    %cst_26 = arith.constant 0.000000e+00 : bf16
    %45 = vector.broadcast %cst_26 : bf16 to vector<16x128xbf16>
    %c0_27 = arith.constant 0 : index
    %c0_28 = arith.constant 0 : index
    %46 = vector.load %arg13[%c0_27, %c0_28] : memref<232x128xbf16, #tpu.memory_space<vmem>>, vector<16x128xbf16>
    tpu.vector_store %arg13[%c0_27, %c0_28], %45 {strides = array<i32>} : memref<232x128xbf16, #tpu.memory_space<vmem>>, vector<16x128xbf16>,
    %cst_29 = arith.constant 0.000000e+00 : bf16
    %47 = vector.broadcast %cst_29 : bf16 to vector<16x128xbf16>
    %c216 = arith.constant 216 : index
    %c0_30 = arith.constant 0 : index
    %48 = vector.load %arg13[%c216, %c0_30] : memref<232x128xbf16, #tpu.memory_space<vmem>>, vector<16x128xbf16>
    tpu.vector_store %arg13[%c216, %c0_30], %47 {strides = array<i32>} : memref<232x128xbf16, #tpu.memory_space<vmem>>, vector<16x128xbf16>,
    %49 = arith.truncf %44 : vector<200x128xf32> to vector<200x128xbf16>
    %c16_31 = arith.constant 16 : index
    %c0_32 = arith.constant 0 : index
    %50 = vector.load %arg13[%c16_31, %c0_32] : memref<232x128xbf16, #tpu.memory_space<vmem>>, vector<200x128xbf16>
    tpu.vector_store %arg13[%c16_31, %c0_32], %49 {strides = array<i32>} : memref<232x128xbf16, #tpu.memory_space<vmem>>, vector<200x128xbf16>,
    %cst_33 = arith.constant 0.000000e+00 : f32
    %51 = vector.broadcast %cst_33 : f32 to vector<200x128xf32>
    %c5_34 = arith.constant 5 : index
    %c0_35 = arith.constant 0 : index
    %52 = vector.load %arg13[%c5_34, %c0_35] : memref<232x128xbf16, #tpu.memory_space<vmem>>, vector<200x128xbf16>
    %c6_36 = arith.constant 6 : index
    %c0_37 = arith.constant 0 : index
    %53 = vector.load %arg13[%c6_36, %c0_37] : memref<232x128xbf16, #tpu.memory_space<vmem>>, vector<200x128xbf16>
    %54 = tpu.concatenate %52, %53 in 1 : vector<200x128xbf16>, vector<200x128xbf16> -> vector<200x256xbf16>
    %c0_38 = arith.constant 0 : index
    %c0_39 = arith.constant 0 : index
    %55 = vector.load %arg3[%c0_38, %c0_39] : memref<1152x128xbf16, #tpu.memory_space<vmem>>, vector<256x128xbf16>
    %cst_40 = arith.constant dense<0.000000e+00> : vector<200x128xf32>
    %56 = tpu.matmul %54, %55, %cst_40 {dimension_numbers = #tpu.dot_dimension_numbers<[1], [0], [0], [1], [0, 0, 1, 1], [], []>} : vector<200x256xbf16>, vector<256x128xbf16>, vector<200x128xf32> -> vector<200x128xf32>
    %57 = arith.addf %51, %56 : vector<200x128xf32>
    %c7 = arith.constant 7 : index
    %c0_41 = arith.constant 0 : index
    %58 = vector.load %arg13[%c7, %c0_41] : memref<232x128xbf16, #tpu.memory_space<vmem>>, vector<200x128xbf16>
    %c15_42 = arith.constant 15 : index
    %c0_43 = arith.constant 0 : index
    %59 = vector.load %arg13[%c15_42, %c0_43] : memref<232x128xbf16, #tpu.memory_space<vmem>>, vector<200x128xbf16>
    %60 = tpu.concatenate %58, %59 in 1 : vector<200x128xbf16>, vector<200x128xbf16> -> vector<200x256xbf16>
    %c256 = arith.constant 256 : index
    %c0_44 = arith.constant 0 : index
    %61 = vector.load %arg3[%c256, %c0_44] : memref<1152x128xbf16, #tpu.memory_space<vmem>>, vector<256x128xbf16>
    %cst_45 = arith.constant dense<0.000000e+00> : vector<200x128xf32>
    %62 = tpu.matmul %60, %61, %cst_45 {dimension_numbers = #tpu.dot_dimension_numbers<[1], [0], [0], [1], [0, 0, 1, 1], [], []>} : vector<200x256xbf16>, vector<256x128xbf16>, vector<200x128xf32> -> vector<200x128xf32>
    %63 = arith.addf %57, %62 : vector<200x128xf32>
    %c16_46 = arith.constant 16 : index
    %c0_47 = arith.constant 0 : index
    %64 = vector.load %arg13[%c16_46, %c0_47] : memref<232x128xbf16, #tpu.memory_space<vmem>>, vector<200x128xbf16>
    %c17 = arith.constant 17 : index
    %c0_48 = arith.constant 0 : index
    %65 = vector.load %arg13[%c17, %c0_48] : memref<232x128xbf16, #tpu.memory_space<vmem>>, vector<200x128xbf16>
    %66 = tpu.concatenate %64, %65 in 1 : vector<200x128xbf16>, vector<200x128xbf16> -> vector<200x256xbf16>
    %c512 = arith.constant 512 : index
    %c0_49 = arith.constant 0 : index
    %67 = vector.load %arg3[%c512, %c0_49] : memref<1152x128xbf16, #tpu.memory_space<vmem>>, vector<256x128xbf16>
    %cst_50 = arith.constant dense<0.000000e+00> : vector<200x128xf32>
    %68 = tpu.matmul %66, %67, %cst_50 {dimension_numbers = #tpu.dot_dimension_numbers<[1], [0], [0], [1], [0, 0, 1, 1], [], []>} : vector<200x256xbf16>, vector<256x128xbf16>, vector<200x128xf32> -> vector<200x128xf32>
    %69 = arith.addf %63, %68 : vector<200x128xf32>
    %c25 = arith.constant 25 : index
    %c0_51 = arith.constant 0 : index
    %70 = vector.load %arg13[%c25, %c0_51] : memref<232x128xbf16, #tpu.memory_space<vmem>>, vector<200x128xbf16>
    %c26 = arith.constant 26 : index
    %c0_52 = arith.constant 0 : index
    %71 = vector.load %arg13[%c26, %c0_52] : memref<232x128xbf16, #tpu.memory_space<vmem>>, vector<200x128xbf16>
    %72 = tpu.concatenate %70, %71 in 1 : vector<200x128xbf16>, vector<200x128xbf16> -> vector<200x256xbf16>
    %c768 = arith.constant 768 : index
    %c0_53 = arith.constant 0 : index
    %73 = vector.load %arg3[%c768, %c0_53] : memref<1152x128xbf16, #tpu.memory_space<vmem>>, vector<256x128xbf16>
    %cst_54 = arith.constant dense<0.000000e+00> : vector<200x128xf32>
    %74 = tpu.matmul %72, %73, %cst_54 {dimension_numbers = #tpu.dot_dimension_numbers<[1], [0], [0], [1], [0, 0, 1, 1], [], []>} : vector<200x256xbf16>, vector<256x128xbf16>, vector<200x128xf32> -> vector<200x128xf32>
    %75 = arith.addf %69, %74 : vector<200x128xf32>
    %c27 = arith.constant 27 : index
    %c0_55 = arith.constant 0 : index
    %76 = vector.load %arg13[%c27, %c0_55] : memref<232x128xbf16, #tpu.memory_space<vmem>>, vector<200x128xbf16>
    %c1024 = arith.constant 1024 : index
    %c0_56 = arith.constant 0 : index
    %77 = vector.load %arg3[%c1024, %c0_56] : memref<1152x128xbf16, #tpu.memory_space<vmem>>, vector<128x128xbf16>
    %cst_57 = arith.constant dense<0.000000e+00> : vector<200x128xf32>
    %78 = tpu.matmul %76, %77, %cst_57 {dimension_numbers = #tpu.dot_dimension_numbers<[1], [0], [0], [1], [0, 0, 1, 1], [], []>} : vector<200x128xbf16>, vector<128x128xbf16>, vector<200x128xf32> -> vector<200x128xf32>
    %79 = arith.addf %75, %78 : vector<200x128xf32>
    %80 = vector.broadcast %0 : vector<200x1xf32> to vector<200x128xf32>
    %81 = arith.mulf %79, %80 : vector<200x128xf32>
    %cst_58 = arith.constant dense<0.000000e+00> : vector<128xf32>
    %82 = vector.multi_reduction <add>, %81, %cst_58 [0] : vector<200x128xf32> to vector<128xf32>
    %83 = vector.shape_cast %82 : vector<128xf32> to vector<1x128xf32>
    %84 = arith.mulf %79, %79 : vector<200x128xf32>
    %85 = vector.broadcast %0 : vector<200x1xf32> to vector<200x128xf32>
    %86 = arith.mulf %84, %85 : vector<200x128xf32>
    %cst_59 = arith.constant dense<0.000000e+00> : vector<128xf32>
    %87 = vector.multi_reduction <add>, %86, %cst_59 [0] : vector<200x128xf32> to vector<128xf32>
    %88 = vector.shape_cast %87 : vector<128xf32> to vector<1x128xf32>
    %cst_60 = arith.constant 7.812500e-03 : f32
    %89 = vector.broadcast %cst_60 : f32 to vector<1x128xf32>
    %90 = arith.mulf %83, %89 : vector<1x128xf32>
    %cst_61 = arith.constant 7.812500e-03 : f32
    %91 = vector.broadcast %cst_61 : f32 to vector<1x128xf32>
    %92 = arith.mulf %88, %91 : vector<1x128xf32>
    %93 = arith.mulf %90, %90 : vector<1x128xf32>
    %94 = arith.subf %92, %93 : vector<1x128xf32>
    %cst_62 = arith.constant 0.000000e+00 : f32
    %95 = vector.broadcast %cst_62 : f32 to vector<1x128xf32>
    %96 = arith.maximumf %94, %95 : vector<1x128xf32>
    %c0_63 = arith.constant 0 : index
    %c0_64 = arith.constant 0 : index
    %97 = vector.load %arg8[%c0_63, %c0_64] : memref<1x128xf32, #tpu.memory_space<vmem>>, vector<1x128xf32>
    %cst_65 = arith.constant 9.99999974E-6 : f32
    %98 = vector.broadcast %cst_65 : f32 to vector<1x128xf32>
    %99 = arith.addf %96, %98 : vector<1x128xf32>
    %100 = math.rsqrt %99 : vector<1x128xf32>
    %101 = arith.mulf %97, %100 : vector<1x128xf32>
    %c0_66 = arith.constant 0 : index
    %c0_67 = arith.constant 0 : index
    %102 = vector.load %arg9[%c0_66, %c0_67] : memref<1x128xf32, #tpu.memory_space<vmem>>, vector<1x128xf32>
    %103 = arith.mulf %90, %101 : vector<1x128xf32>
    %104 = arith.subf %102, %103 : vector<1x128xf32>
    %c16_68 = arith.constant 16 : index
    %c0_69 = arith.constant 0 : index
    %105 = vector.load %arg1[%c16_68, %c0_69] : memref<232x16xbf16, #tpu.memory_space<vmem>>, vector<200x16xbf16>
    %c0_70 = arith.constant 0 : index
    %c0_71 = arith.constant 0 : index
    %106 = vector.load %arg4[%c0_70, %c0_71] : memref<16x128xbf16, #tpu.memory_space<vmem>>, vector<16x128xbf16>
    %cst_72 = arith.constant dense<0.000000e+00> : vector<200x128xf32>
    %107 = tpu.matmul %105, %106, %cst_72 {dimension_numbers = #tpu.dot_dimension_numbers<[1], [0], [0], [1], [0, 0, 1, 1], [], []>} : vector<200x16xbf16>, vector<16x128xbf16>, vector<200x128xf32> -> vector<200x128xf32>
    %c0_73 = arith.constant 0 : index
    %c0_74 = arith.constant 0 : index
    %108 = vector.load %arg5[%c0_73, %c0_74] : memref<1x128xf32, #tpu.memory_space<vmem>>, vector<1x128xf32>
    %109 = vector.broadcast %108 : vector<1x128xf32> to vector<200x128xf32>
    %110 = arith.addf %107, %109 : vector<200x128xf32>
    %111 = vector.broadcast %101 : vector<1x128xf32> to vector<200x128xf32>
    %112 = arith.mulf %79, %111 : vector<200x128xf32>
    %113 = vector.broadcast %104 : vector<1x128xf32> to vector<200x128xf32>
    %114 = arith.addf %112, %113 : vector<200x128xf32>
    %115 = arith.addf %114, %110 : vector<200x128xf32>
    %cst_75 = arith.constant 0.000000e+00 : f32
    %116 = vector.broadcast %cst_75 : f32 to vector<200x128xf32>
    %117 = arith.maximumf %115, %116 : vector<200x128xf32>
    %c0_76 = arith.constant 0 : index
    %c0_77 = arith.constant 0 : index
    %118 = vector.load %arg11[%c0_76, %c0_77] : memref<200x128xf32, #tpu.memory_space<vmem>>, vector<200x128xf32>
    tpu.vector_store %arg11[%c0_76, %c0_77], %117 {strides = array<i32>} : memref<200x128xf32, #tpu.memory_space<vmem>>, vector<200x128xf32>,
    return
  }
  func.func @transform_0(%arg0: i32) -> (i32, i32) {
    %c0_i32 = arith.constant 0 : i32
    %c0_i32_0 = arith.constant 0 : i32
    %c0_i32_1 = arith.constant 0 : i32
    return %c0_i32, %c0_i32_0 : i32, i32
  }
  func.func @transform_1(%arg0: i32) -> (i32, i32) {
    %c0_i32 = arith.constant 0 : i32
    %c0_i32_0 = arith.constant 0 : i32
    %c0_i32_1 = arith.constant 0 : i32
    return %c0_i32, %c0_i32_0 : i32, i32
  }
  func.func @transform_2(%arg0: i32) -> (i32, i32) {
    %c0_i32 = arith.constant 0 : i32
    %c0_i32_0 = arith.constant 0 : i32
    %c0_i32_1 = arith.constant 0 : i32
    return %c0_i32, %c0_i32_0 : i32, i32
  }
  func.func @transform_3(%arg0: i32) -> (i32, i32) {
    %c0_i32 = arith.constant 0 : i32
    %c0_i32_0 = arith.constant 0 : i32
    %c0_i32_1 = arith.constant 0 : i32
    return %c0_i32, %c0_i32_0 : i32, i32
  }
  func.func @transform_4(%arg0: i32) -> (i32, i32) {
    %c0_i32 = arith.constant 0 : i32
    %c0_i32_0 = arith.constant 0 : i32
    %c0_i32_1 = arith.constant 0 : i32
    return %c0_i32, %c0_i32_0 : i32, i32
  }
  func.func @transform_5(%arg0: i32) -> (i32, i32) {
    %c0_i32 = arith.constant 0 : i32
    %c0_i32_0 = arith.constant 0 : i32
    %c0_i32_1 = arith.constant 0 : i32
    return %c0_i32, %c0_i32_0 : i32, i32
  }
  func.func @transform_6(%arg0: i32) -> (i32, i32) {
    %c0_i32 = arith.constant 0 : i32
    %c0_i32_0 = arith.constant 0 : i32
    %c0_i32_1 = arith.constant 0 : i32
    return %c0_i32, %c0_i32_0 : i32, i32
  }
  func.func @transform_7(%arg0: i32) -> (i32, i32) {
    %c0_i32 = arith.constant 0 : i32
    %c0_i32_0 = arith.constant 0 : i32
    %c0_i32_1 = arith.constant 0 : i32
    return %c0_i32, %c0_i32_0 : i32, i32
  }
  func.func @transform_8(%arg0: i32) -> (i32, i32) {
    %c0_i32 = arith.constant 0 : i32
    %c0_i32_0 = arith.constant 0 : i32
    %c0_i32_1 = arith.constant 0 : i32
    return %c0_i32, %c0_i32_0 : i32, i32
  }
  func.func @transform_9(%arg0: i32) -> (i32, i32) {
    %c0_i32 = arith.constant 0 : i32
    %c0_i32_0 = arith.constant 0 : i32
    %c0_i32_1 = arith.constant 0 : i32
    return %c0_i32, %c0_i32_0 : i32, i32
  }
  func.func @transform_10(%arg0: i32) -> (i32, i32) {
    %c0_i32 = arith.constant 0 : i32
    %c0_i32_0 = arith.constant 0 : i32
    %c0_i32_1 = arith.constant 0 : i32
    return %c0_i32, %c0_i32_0 : i32, i32
  }
}

</mosaic_0001>

<bundles_post_ra>
// kernel: tile.6
= control target key start
LH: loop header
LB: loop body
LE: loop exit
PB: predicated region body
PF: predicated region fallthrough
CT: control target
= control target key end

     0   :  { %s46_s0 = inlined_call_operand.vmem [shape: f32[10,10], index: 0, kind: input, shape index: {}]   ;;  %s47_s1 = inlined_call_operand.vmem [shape: f32[2,1,1,10,1,10], index: 1, kind: output, shape index: {}]  }
   0x1   :  { %v4_v0 = vld [vmem:[%s46_s0] sm:$0xff]  ;;  %v15_v1 = vld [vmem:[%s46_s0 + $0x8] sm:$0xff] }
   0x2   :  { %5 = vst [vmem:[%s47_s1] sm:$0xff] %v4_v0  ;;  %14 = vst [vmem:[%s47_s1 + $0x10] sm:$0xff] %v4_v0 }
   0x3   :  { %16 = vst [vmem:[%s47_s1 + $0x8] sm:$0xff] %v15_v1  ;;  %17 = vst [vmem:[%s47_s1 + $0x18] sm:$0xff] %v15_v1 }

// kernel: tile.0
= control target key start
LH: loop header
LB: loop body
LE: loop exit
PB: predicated region body
PF: predicated region fallthrough
CT: control target
= control target key end

     0   :  { %s20_s6 = smov 3  ;;  %vm24_vm0 = vcmask 1045506   ;;  %s27_s7 = smov 192  ;;  %vm29_vm1 = vcmask 1047558   ;;  %vm66_vm2 = vcmask 1043458   ;;  %vm45_vm3 = vcmask 1044483   ;;  %s1103_s0 = inlined_call_operand.vmem [shape: f32[2,1,1,10,1,10], index: 0, kind: input, shape index: {}]   ;;  %s1104_s1 = inlined_call_operand.vmem [shape: f32[200,1], index: 1, kind: output, shape index: {}]  }
   0x1   :  { %v21_v0 = vld [vmem:[%s1103_s0] ss:$19 sm:%s20_s6]   ;;  %v463_v1 = vld.sshfl [vmem:[%s1103_s0 + $0x1] sm:$0xff pattern:$0x36fff]   ;;  %s61_s14 = smov 3 }
   0x2   :  { %v25_v2 = vsel %vm24_vm0, %v463_v1, %v21_v0  ;;  %v464_v3 = vld [vmem:[%s1103_s0 + $0x26] ss:$-3 sm:%s27_s7]   ;;  %s64_s15 = smov 12  ;;  %vm49_vm4 = vcmask 1047557   ;;  %vm102_vm5 = vcmask 1046532   ;;  %s43_s20 = smov 24 }
   0x3   :  { %v30_v4 = vsel %vm29_vm1, %v464_v3, %v25_v2  ;;  %v474_v5 = vld [vmem:[%s1103_s0 + $0x18] ss:$-18 sm:%s61_s14]   ;;  %v475_v6 = vld [vmem:[%s1103_s0 - $0x29] ss:$22 sm:%s64_s15]   ;;  %s78_s21 = smov 3  ;;  %s600_s22 = smov 127  }
   0x4   :  { %31 = vrot.lane.b32.xlu0 %v30_v4, %s600_s22  ;;  %v67_v7 = vsel %vm66_vm2, %v475_v6, %v474_v5  ;;  %v468_v8 = vld.sshfl [vmem:[%s1103_s0 + $0x8] sm:$0xff pattern:$0xfe]   ;;  %s85_s27 = smov 192  ;;  %vm106_vm6 = vcmask 1047559   ;;  %vm123_vm7 = vcmask 1043459  }
   0x5   :  { %v469_v9 = vld [vmem:[%s1103_s0 + $0xe] ss:$-3 sm:%s43_s20]   ;;  %68 = vrot.lane.b32.xlu1 %v67_v7, %s600_s22  ;;  %v470_v11 = vld.sshfl [vmem:[%s1103_s0 + $0x9] sm:$0xff pattern:$0x9cccccc]   ;;  %s601_s15 = smov 126  }
   0x6   :  { %v46_v10 = vsel %vm45_vm3, %v469_v9, %v468_v8  ;;  %v479_v12 = vld [vmem:[%s1103_s0 + $0x3] ss:$-3 sm:%s78_s21]   ;;  %v480_v14 = vld.sshfl [vmem:[%s1103_s0 + $0x4] sm:$0xff pattern:$0x3cfff]   ;;  %s133_s18 = smov 3 }
   0x7   :  { %v50_v13 = vsel %vm49_vm4, %v470_v11, %v46_v10  ;;  %v481_v15 = vld [vmem:[%s1103_s0 - $0x71] ss:$19 sm:%s85_s27]   ;;  %v83_v16 = vsel %vm24_vm0, %v480_v14, %v479_v12  ;;  %v485_v17 = vld.sshfl [vmem:[%s1103_s0 + $0x11] sm:$0xff pattern:$0x658]   ;;  %s140_s19 = smov 192 }
   0x8   :  { %v486_v18 = vld [vmem:[%s1103_s0 + $0x14] ss:$-3 sm:$0x70]   ;;  %51 = vrot.lane.b32.xlu0 %v50_v13, %s600_s22  ;;  %v88_v19 = vsel %vm29_vm1, %v481_v15, %v83_v16  ;;  %v487_v21 = vld [vmem:[%s1103_s0 + $0xe] sm:$0x80]   ;;  %vm191_vm8 = vcmask 1046531  }
   0x9   :  { %v103_v20 = vsel %vm102_vm5, %v486_v18, %v485_v17  ;;  %v492_v22 = vld.sshfl [vmem:[%s1103_s0 + $0x9] sm:$0xff pattern:$0x9f]   ;;  %89 = vrot.lane.b32.xlu1 %v88_v19, %s601_s15  ;;  %v493_v24 = vld [vmem:[%s1103_s0 + $0x3] sm:$0x8]   ;;  %s602_s7 = smov 125  }
   0xa   :  { %v107_v23 = vsel %vm106_vm6, %v487_v21, %v103_v20  ;;  %v124_v25 = vsel %vm123_vm7, %v493_v24, %v492_v22  ;;  %v496_v26 = vld [vmem:[%s1103_s0 + $0x3] ss:$-3 sm:%s133_s18]   ;;  %v503_v29 = vld [vmem:[%s1103_s0 + $0x14] ss:$-3 sm:$0x70]   ;;  %s603_s14 = smov 124  }
   0xb   :  { %v498_v27 = vld [vmem:[%s1103_s0 - $0x71] ss:$19 sm:%s140_s19]   ;;  %v138_v28 = vsel %vm24_vm0, %v480_v14, %v496_v26  ;;  %v158_v31 = vsel %vm102_vm5, %v503_v29, %v485_v17  ;;  %v513_v32 = vld [vmem:[%s1103_s0 + $0x6] ss:$-3 sm:$0x7]   ;;  %s275_s21 = smov 3 }
   0xc   :  { %v504_v30 = vld [vmem:[%s1103_s0 + $0xe] sm:$0x80]   ;;  %108 = vrot.lane.b32.xlu0 %v107_v23, %s601_s15  ;;  %v514_v33 = vld.sshfl [vmem:[%s1103_s0 + $0x4] sm:$0xff pattern:$0x3cffff]   ;;  %v143_v34 = vsel %vm29_vm1, %v498_v27, %v138_v28  ;;  %s278_s22 = smov 12 }
   0xd   :  { %125 = vrot.lane.b32.xlu1 %v124_v25, %s601_s15  ;;  %v162_v35 = vsel %vm106_vm6, %v504_v30, %v158_v31  ;;  %v510_v36 = vld [vmem:[%s1103_s0 + $0x3] sm:$0x8]   ;;  %v192_v37 = vsel %vm191_vm8, %v514_v33, %v513_v32  ;;  %v515_v38 = vld [vmem:[%s1103_s0 - $0x6] sm:$0x80]   ;;  %vm265_vm9 = vcmask 1047556   ;;  %s604_s2 = smov 123  }
   0xe   :  { %v179_v39 = vsel %vm123_vm7, %v510_v36, %v492_v22  ;;  %v196_v40 = vsel %vm106_vm6, %v515_v38, %v192_v37  ;;  %v518_v41 = vld.sshfl [vmem:[%s1103_s0 + $0x11] sm:$0xff pattern:$0x3658]   ;;  %v519_v42 = vld [vmem:[%s1103_s0 + $0x17] ss:$-3 sm:$0xe0]  }
   0xf   :  { %v524_v43 = vld [vmem:[%s1103_s0 + $0x6] ss:$-3 sm:$0x7]   ;;  %v209_v44 = vsel %vm49_vm4, %v519_v42, %v518_v41  ;;  %v522_v45 = vld.sshfl [vmem:[%s1103_s0 + $0x9] sm:$0xff pattern:$0x9cf]  }
  0x10   :  { %144 = vrot.lane.b32.xlu0 %v143_v34, %s602_s7  ;;  %v229_v46 = vsel %vm191_vm8, %v514_v33, %v524_v43  ;;  %v526_v47 = vld [vmem:[%s1103_s0 - $0x6] sm:$0x80]   ;;  %v530_v48 = vld [vmem:[%s1103_s0 + $0x17] ss:$-3 sm:$0xe0]   ;;  %s318_s3 = smov 3 }
  0x11   :  { %163 = vrot.lane.b32.xlu1 %v162_v35, %s602_s7  ;;  %v233_v49 = vsel %vm106_vm6, %v526_v47, %v229_v46  ;;  %v246_v50 = vsel %vm49_vm4, %v530_v48, %v518_v41  ;;  %v535_v51 = vld [vmem:[%s1103_s0 + $0x9] ss:$-3 sm:$0xf]   ;;  %v536_v52 = vld.sshfl [vmem:[%s1103_s0 + $0x4] sm:$0xff pattern:$0x3cfffff]  }
  0x12   :  { %v539_v53 = vld [vmem:[%s1103_s0 + $0x19] ss:$-3 sm:%s275_s21]   ;;  %s321_s4 = smov 12  ;;  %v266_v55 = vsel %vm265_vm9, %v536_v52, %v535_v51  ;;  %v541_v57 = vld.sshfl [vmem:[%s1103_s0 + $0x2] sm:$0xff pattern:$0x36fffff]  }
  0x13   :  { %v540_v54 = vld [vmem:[%s1103_s0 - $0x25] ss:$19 sm:%s278_s22]   ;;  %s605_s11 = smov 122   ;;  %s350_s12 = smov 48  ;;  %vm352_vm10 = vcmask 1045508   ;;  %vm3_vm11 = vcmask 7168  }
  0x14   :  { %180 = vrot.lane.b32.xlu0 %v179_v39, %s602_s7  ;;  %v281_v56 = vsel %vm66_vm2, %v540_v54, %v539_v53  ;;  %v552_v58 = vld [vmem:[%s1103_s0 + $0x19] ss:$-3 sm:%s318_s3]   ;;  %v545_v61 = vld.sshfl [vmem:[%s1103_s0 + $0x12] sm:$0xff pattern:$0x365]   ;;  %s355_s19 = smov 192 }
  0x15   :  { %197 = vrot.lane.b32.xlu1 %v196_v40, %s603_s14  ;;  %v553_v59 = vld [vmem:[%s1103_s0 - $0x25] ss:$19 sm:%s321_s4]   ;;  %v285_v60 = vsel %vm265_vm9, %v541_v57, %v281_v56  ;;  %v561_v0 = vld.sshfl [vmem:[%s1103_s0 + $0x3] sm:$0xff pattern:$0x36f]   ;;  %s367_s22 = smov 3 }
  0x16   :  { %v548_v62 = vld [vmem:[%s1103_s0 + $0x9] ss:$-3 sm:$0xf]   ;;  %v324_v63 = vsel %vm66_vm2, %v553_v59, %v552_v58  ;;  %s370_s23 = smov 12  ;;  %s388_s24 = smov 3  ;;  %v459_v16 = vld [vmem:[%s1103_s0 + $0x10] sm:$0xff]  }
  0x17   :  { %v562_v1 = vld [vmem:[%s1103_s0 - $0x4c] ss:$19 sm:%s350_s12]   ;;  %v309_v2 = vsel %vm265_vm9, %v536_v52, %v548_v62  ;;  %v328_v3 = vsel %vm265_vm9, %v541_v57, %v324_v63  ;;  %s391_s27 = smov 12  ;;  %s405_s28 = smov 48  ;;  %v457_v15 = vld [vmem:[%s1103_s0 + $0x8] sm:$0x3]  }
  0x18   :  { %210 = vrot.lane.b32.xlu0 %v209_v44, %s603_s14  ;;  %v563_v4 = vld [vmem:[%s1103_s0 + $0x46] ss:$-9 sm:%s355_s19]   ;;  %v353_v5 = vsel %vm352_vm10, %v562_v1, %v561_v0  ;;  %s606_s4 = smov 121   ;;  %s422_s5 = smov 3  ;;  %460 = vst.msk [vmem:[%s1104_s1 + $0x64] ss:$10 sm:$0xff] %vm3_vm11, %v459_v16  }
  0x19   :  { %219 = vrot.lane.b32.xlu1 %v522_v45, %s603_s14  ;;  %v566_v6 = vld [vmem:[%s1103_s0 + $0x19] ss:$-3 sm:%s367_s22]   ;;  %v568_v8 = vld.sshfl [vmem:[%s1103_s0 + $0x5] sm:$0xff pattern:$0x3cfffff]   ;;  %s425_s14 = smov 12  ;;  %v358_v12 = vsel %vm29_vm1, %v563_v4, %v353_v5 }
  0x1a   :  { %v567_v7 = vld [vmem:[%s1103_s0 + $0xa] ss:$-3 sm:%s370_s23]   ;;  %s410_s21 = smov 192  ;;  %458 = vst.msk [vmem:[%s1104_s1 + $0x50] ss:$10 sm:$0x3] %vm3_vm11, %v457_v15  }
  0x1b   :  { %v572_v9 = vld [vmem:[%s1103_s0 + $0x17] ss:$-21 sm:%s388_s24]   ;;  %v373_v13 = vsel %vm66_vm2, %v567_v7, %v566_v6  ;;  %s607_s7 = smov 120   ;;  %s443_s10 = smov 3 }
  0x1c   :  { %234 = vrot.lane.b32.xlu0 %v233_v49, %s604_s2  ;;  %v573_v10 = vld [vmem:[%s1103_s0 + $0xf] ss:$3 sm:%s391_s27]   ;;  %v377_v20 = vsel %vm265_vm9, %v568_v8, %v373_v13 }
  0x1d   :  { %247 = vrot.lane.b32.xlu1 %v246_v50, %s604_s2  ;;  %v577_v11 = vld [vmem:[%s1103_s0 - $0x4c] ss:$19 sm:%s405_s28]   ;;  %v394_v21 = vsel %vm66_vm2, %v573_v10, %v572_v9 }
  0x1e   :  { %v2_v14 = vld [vmem:[%s1103_s0] sm:$0xff]   ;;  %v461_v18 = vld [vmem:[%s1103_s0 + $0x18] sm:$0x3]   ;;  %v408_v22 = vsel %vm352_vm10, %v577_v11, %v561_v0 }
  0x1f   :  { %v581_v17 = vld [vmem:[%s1103_s0 + $0x19] ss:$-3 sm:%s422_s5]   ;;  %4 = vst.msk [vmem:[%s1104_s1] ss:$10 sm:$0xff] %vm3_vm11, %v2_v14  }
  0x20   :  { %256 = vrot.lane.b32.xlu0 %v522_v45, %s604_s2  ;;  %v582_v19 = vld [vmem:[%s1103_s0 + $0xa] ss:$-3 sm:%s425_s14]   ;;  %462 = vst.msk [vmem:[%s1104_s1 + $0xb4] ss:$10 sm:$0x3] %vm3_vm11, %v461_v18  }
  0x21   :  { %267 = vrot.lane.b32.xlu1 %v266_v55, %s605_s11  ;;  %v578_v23 = vld [vmem:[%s1103_s0 + $0x46] ss:$-9 sm:%s410_s21]   ;;  %v428_v24 = vsel %vm66_vm2, %v582_v19, %v581_v17 }
  0x22   :  { %v413_v25 = vsel %vm29_vm1, %v578_v23, %v408_v22  ;;  %v432_v26 = vsel %vm265_vm9, %v568_v8, %v428_v24  ;;  %v587_v27 = vld [vmem:[%s1103_s0 + $0x17] ss:$-21 sm:%s443_s10]  }
  0x24   :  { %286 = vrot.lane.b32.xlu0 %v285_v60, %s605_s11 }
  0x25   :  { %297 = vrot.lane.b32.xlu1 %v545_v61, %s605_s11  ;;  %s446_s11 = smov 12 }
  0x26   :  { %v588_v28 = vld [vmem:[%s1103_s0 + $0xf] ss:$3 sm:%s446_s11]   ;;  %s608_s0 = smov 119  }
  0x27   :  { %v449_v29 = vsel %vm66_vm2, %v588_v28, %v587_v27 }
  0x28   :  { %310 = vrot.lane.b32.xlu0 %v309_v2, %s606_s4 }
  0x29   :  { %329 = vrot.lane.b32.xlu1 %v328_v3, %s606_s4 }
  0x2c   :  { %340 = vrot.lane.b32.xlu0 %v545_v61, %s606_s4 }
  0x2d   :  { %359 = vrot.lane.b32.xlu1 %v358_v12, %s607_s7 }
  0x30   :  { %378 = vrot.lane.b32.xlu0 %v377_v20, %s607_s7 }
  0x31   :  { %395 = vrot.lane.b32.xlu1 %v394_v21, %s607_s7 }
  0x34   :  { %414 = vrot.lane.b32.xlu0 %v413_v25, %s608_s0 }
  0x35   :  { %433 = vrot.lane.b32.xlu1 %v432_v26, %s608_s0 }
  0x38   :  { %450 = vrot.lane.b32.xlu0 %v449_v29, %s608_s0 }
  0x76   :  { %v32_v30 = vpop.permute.xlu0 %31  }
  0x77   :  { %465 = vst.msk [vmem:[%s1104_s1 + $0x1] ss:$130 sm:$0x3] %vm3_vm11, %v32_v30   ;;  %466 = vst.msk [vmem:[%s1104_s1 + $0xa1] ss:$-30 sm:$0x3c] %vm3_vm11, %v32_v30   ;;  %v69_v31 = vpop.permute.xlu1 %68  }
  0x78   :  { %467 = vst.msk [vmem:[%s1104_s1 + $0x141] ss:$-30 sm:$0xc0] %vm3_vm11, %v32_v30   ;;  %476 = vst.msk [vmem:[%s1104_s1 + $0xb5] ss:$-120 sm:$0x3] %vm3_vm11, %v69_v31  }
  0x79   :  { %477 = vst.msk [vmem:[%s1104_s1 + $0x1d] sm:$0x4] %vm3_vm11, %v69_v31   ;;  %478 = vst.msk [vmem:[%s1104_s1 + $0xbc] sm:$0x8] %vm3_vm11, %v69_v31  }
  0x7a   :  { %v52_v32 = vpop.permute.xlu0 %51  }
  0x7b   :  { %471 = vst.msk [vmem:[%s1104_s1 + $0xa1] ss:$10 sm:$0x3] %vm3_vm11, %v52_v32   ;;  %472 = vst.msk [vmem:[%s1104_s1 + $0x8d] ss:$-30 sm:$0x1c] %vm3_vm11, %v52_v32   ;;  %v90_v33 = vpop.permute.xlu1 %89  }
  0x7c   :  { %473 = vst.msk [vmem:[%s1104_s1 + $0x12d] ss:$-30 sm:$0xe0] %vm3_vm11, %v52_v32   ;;  %482 = vst.msk [vmem:[%s1104_s1 + $0x20] ss:$-30 sm:$0x3] %vm3_vm11, %v90_v33  }
  0x7d   :  { %483 = vst.msk [vmem:[%s1104_s1 + $0xc0] ss:$-30 sm:$0x7c] %vm3_vm11, %v90_v33   ;;  %484 = vst.msk [vmem:[%s1104_s1 + $0x87] sm:$0x80] %vm3_vm11, %v90_v33  }
  0x7e   :  { %v109_v34 = vpop.permute.xlu0 %108  }
  0x7f   :  { %488 = vst.msk [vmem:[%s1104_s1 + $0xc0] ss:$-30 sm:$0x3] %vm3_vm11, %v109_v34   ;;  %489 = vst.msk [vmem:[%s1104_s1 + $0x124] ss:$-60 sm:$0xc] %vm3_vm11, %v109_v34   ;;  %v126_v35 = vpop.permute.xlu1 %125  }
  0x80   :  { %490 = vst.msk [vmem:[%s1104_s1 + $0xca] ss:$-30 sm:$0x70] %vm3_vm11, %v109_v34   ;;  %491 = vst.msk [vmem:[%s1104_s1 + $0x91] sm:$0x80] %vm3_vm11, %v109_v34  }
  0x81   :  { %494 = vst.msk [vmem:[%s1104_s1 + $0xb6] ss:$-60 sm:$0x3] %vm3_vm11, %v126_v35   ;;  %495 = vst.msk [vmem:[%s1104_s1 + $0x98] ss:$-30 sm:$0xc] %vm3_vm11, %v126_v35  }
  0x82   :  { %v145_v36 = vpop.permute.xlu0 %144  }
  0x83   :  { %499 = vst.msk [vmem:[%s1104_s1 + $0x21] ss:$-30 sm:$0x3] %vm3_vm11, %v145_v36   ;;  %500 = vst.msk [vmem:[%s1104_s1 + $0xc1] ss:$-30 sm:$0x7c] %vm3_vm11, %v145_v36   ;;  %v164_v37 = vpop.permute.xlu1 %163  }
  0x84   :  { %501 = vst.msk [vmem:[%s1104_s1 + $0x88] sm:$0x80] %vm3_vm11, %v145_v36   ;;  %505 = vst.msk [vmem:[%s1104_s1 + $0xc1] ss:$-30 sm:$0x3] %vm3_vm11, %v164_v37  }
  0x85   :  { %506 = vst.msk [vmem:[%s1104_s1 + $0x125] ss:$-60 sm:$0xc] %vm3_vm11, %v164_v37   ;;  %507 = vst.msk [vmem:[%s1104_s1 + $0xcb] ss:$-30 sm:$0x70] %vm3_vm11, %v164_v37  }
  0x86   :  { %508 = vst.msk [vmem:[%s1104_s1 + $0x92] sm:$0x80] %vm3_vm11, %v164_v37   ;;  %v181_v38 = vpop.permute.xlu0 %180  }
  0x87   :  { %511 = vst.msk [vmem:[%s1104_s1 + $0xb7] ss:$-60 sm:$0x3] %vm3_vm11, %v181_v38   ;;  %512 = vst.msk [vmem:[%s1104_s1 + $0x99] ss:$-30 sm:$0xc] %vm3_vm11, %v181_v38   ;;  %v198_v39 = vpop.permute.xlu1 %197  }
  0x88   :  { %516 = vst.msk [vmem:[%s1104_s1 + $0x40] ss:$-30 sm:$0x7] %vm3_vm11, %v198_v39   ;;  %517 = vst.msk [vmem:[%s1104_s1 + $0xe0] ss:$-30 sm:$0xf8] %vm3_vm11, %v198_v39  }
  0x8a   :  { %v211_v40 = vpop.permute.xlu0 %210  }
  0x8b   :  { %520 = vst.msk [vmem:[%s1104_s1 + $0xc2] ss:$-30 sm:$0x3] %vm3_vm11, %v211_v40   ;;  %521 = vst.msk [vmem:[%s1104_s1 + $0xea] ss:$-30 sm:$0xfc] %vm3_vm11, %v211_v40   ;;  %v220_v41 = vpop.permute.xlu1 %219  }
  0x8c   :  { %523 = vst.msk [vmem:[%s1104_s1 + $0xb8] ss:$-30 sm:$0xf] %vm3_vm11, %v220_v41  }
  0x8e   :  { %v235_v42 = vpop.permute.xlu0 %234  }
  0x8f   :  { %527 = vst.msk [vmem:[%s1104_s1 + $0x41] ss:$-30 sm:$0x7] %vm3_vm11, %v235_v42   ;;  %528 = vst.msk [vmem:[%s1104_s1 + $0xe1] ss:$-30 sm:$0xf8] %vm3_vm11, %v235_v42   ;;  %v248_v43 = vpop.permute.xlu1 %247  }
  0x90   :  { %531 = vst.msk [vmem:[%s1104_s1 + $0xc3] ss:$-30 sm:$0x3] %vm3_vm11, %v248_v43   ;;  %532 = vst.msk [vmem:[%s1104_s1 + $0xeb] ss:$-30 sm:$0xfc] %vm3_vm11, %v248_v43  }
  0x92   :  { %v257_v44 = vpop.permute.xlu0 %256  }
  0x93   :  { %534 = vst.msk [vmem:[%s1104_s1 + $0xb9] ss:$-30 sm:$0xf] %vm3_vm11, %v257_v44   ;;  %v268_v45 = vpop.permute.xlu1 %267  }
  0x94   :  { %537 = vst.msk [vmem:[%s1104_s1 + $0x60] ss:$-30 sm:$0xf] %vm3_vm11, %v268_v45   ;;  %538 = vst.msk [vmem:[%s1104_s1 + $0x100] ss:$-30 sm:$0xf0] %vm3_vm11, %v268_v45  }
  0x96   :  { %v287_v46 = vpop.permute.xlu0 %286  }
  0x97   :  { %542 = vst.msk [vmem:[%s1104_s1 + $0xc4] ss:$-30 sm:$0x3] %vm3_vm11, %v287_v46   ;;  %543 = vst.msk [vmem:[%s1104_s1 - $0xf4] ss:$130 sm:$0xc] %vm3_vm11, %v287_v46   ;;  %v298_v47 = vpop.permute.xlu1 %297  }
  0x98   :  { %544 = vst.msk [vmem:[%s1104_s1 + $0xec] ss:$-30 sm:$0xf0] %vm3_vm11, %v287_v46   ;;  %546 = vst.msk [vmem:[%s1104_s1 + $0xb0] ss:$10 sm:$0x3] %vm3_vm11, %v298_v47  }
  0x99   :  { %547 = vst.msk [vmem:[%s1104_s1 + $0xd8] ss:$-30 sm:$0xc] %vm3_vm11, %v298_v47  }
  0x9a   :  { %v311_v48 = vpop.permute.xlu0 %310  }
  0x9b   :  { %550 = vst.msk [vmem:[%s1104_s1 + $0x61] ss:$-30 sm:$0xf] %vm3_vm11, %v311_v48   ;;  %551 = vst.msk [vmem:[%s1104_s1 + $0x101] ss:$-30 sm:$0xf0] %vm3_vm11, %v311_v48   ;;  %v330_v49 = vpop.permute.xlu1 %329  }
  0x9c   :  { %555 = vst.msk [vmem:[%s1104_s1 + $0xc5] ss:$-30 sm:$0x3] %vm3_vm11, %v330_v49   ;;  %556 = vst.msk [vmem:[%s1104_s1 - $0xf3] ss:$130 sm:$0xc] %vm3_vm11, %v330_v49  }
  0x9d   :  { %557 = vst.msk [vmem:[%s1104_s1 + $0xed] ss:$-30 sm:$0xf0] %vm3_vm11, %v330_v49  }
  0x9e   :  { %v341_v50 = vpop.permute.xlu0 %340  }
  0x9f   :  { %559 = vst.msk [vmem:[%s1104_s1 + $0xb1] ss:$10 sm:$0x3] %vm3_vm11, %v341_v50   ;;  %560 = vst.msk [vmem:[%s1104_s1 + $0xd9] ss:$-30 sm:$0xc] %vm3_vm11, %v341_v50   ;;  %v360_v51 = vpop.permute.xlu1 %359  }
  0xa0   :  { %564 = vst.msk [vmem:[%s1104_s1 + $0x80] ss:$-30 sm:$0x1f] %vm3_vm11, %v360_v51   ;;  %565 = vst.msk [vmem:[%s1104_s1 + $0x120] ss:$-30 sm:$0xe0] %vm3_vm11, %v360_v51  }
  0xa2   :  { %v379_v52 = vpop.permute.xlu0 %378  }
  0xa3   :  { %569 = vst.msk [vmem:[%s1104_s1 + $0xc6] ss:$-30 sm:$0x3] %vm3_vm11, %v379_v52   ;;  %570 = vst.msk [vmem:[%s1104_s1 + $0x6c] ss:$-30 sm:$0xc] %vm3_vm11, %v379_v52   ;;  %v396_v53 = vpop.permute.xlu1 %395  }
  0xa4   :  { %571 = vst.msk [vmem:[%s1104_s1 + $0x10c] ss:$-30 sm:$0xf0] %vm3_vm11, %v379_v52   ;;  %574 = vst.msk [vmem:[%s1104_s1 + $0xb2] ss:$-150 sm:$0x3] %vm3_vm11, %v396_v53  }
  0xa5   :  { %575 = vst.msk [vmem:[%s1104_s1 + $0x62] ss:$30 sm:$0xc] %vm3_vm11, %v396_v53  }
  0xa6   :  { %v415_v54 = vpop.permute.xlu0 %414  }
  0xa7   :  { %579 = vst.msk [vmem:[%s1104_s1 + $0x81] ss:$-30 sm:$0x1f] %vm3_vm11, %v415_v54   ;;  %580 = vst.msk [vmem:[%s1104_s1 + $0x121] ss:$-30 sm:$0xe0] %vm3_vm11, %v415_v54   ;;  %v434_v55 = vpop.permute.xlu1 %433  }
  0xa8   :  { %584 = vst.msk [vmem:[%s1104_s1 + $0xc7] ss:$-30 sm:$0x3] %vm3_vm11, %v434_v55   ;;  %585 = vst.msk [vmem:[%s1104_s1 + $0x6d] ss:$-30 sm:$0xc] %vm3_vm11, %v434_v55  }
  0xa9   :  { %586 = vst.msk [vmem:[%s1104_s1 + $0x10d] ss:$-30 sm:$0xf0] %vm3_vm11, %v434_v55  }
  0xaa   :  { %v451_v56 = vpop.permute.xlu0 %450  }
  0xab   :  { %589 = vst.msk [vmem:[%s1104_s1 + $0xb3] ss:$-150 sm:$0x3] %vm3_vm11, %v451_v56   ;;  %590 = vst.msk [vmem:[%s1104_s1 + $0x63] ss:$30 sm:$0xc] %vm3_vm11, %v451_v56  }

// kernel: residual_forward.1
= control target key start
LH: loop header
LB: loop body
LE: loop exit
PB: predicated region body
PF: predicated region fallthrough
CT: control target
= control target key end

     0   :  { %vm451_vm0 = vcmask 1040384   ;;  %vm452_vm1 = vcmask 1044484   ;;  %vm657_vm2 = vsmask.f32 256  ;;  %s6191_s19 = smov 48   ;;  %s6192_s28 = smov 16   ;;  %s9168_s0 = inlined_call_operand.vmem [shape: bf16[232,16], index: 0, kind: input, shape index: {}]   ;;  %s9169_s1 = inlined_call_operand.vmem [shape: bf16[64,128], index: 1, kind: input, shape index: {}]   ;;  %s9170_s9 = inlined_call_operand.vmem [shape: f32[200,1], index: 9, kind: input, shape index: {}]   ;;  %s9171_s2 = inlined_call_operand.vmem [shape: bf16[1152,128], index: 2, kind: input, shape index: {}]   ;;  %s9172_s5 = inlined_call_operand.vmem [shape: f32[1,128], index: 5, kind: input, shape index: {}]   ;;  %s9173_s6 = inlined_call_operand.vmem [shape: f32[1,128], index: 6, kind: input, shape index: {}]   ;;  %s9174_s3 = inlined_call_operand.vmem [shape: bf16[16,128], index: 3, kind: input, shape index: {}]   ;;  %s9175_s4 = inlined_call_operand.vmem [shape: f32[1,128], index: 4, kind: input, shape index: {}]   ;;  %s9176_s7 = inlined_call_operand.vmem [shape: f32[1,128], index: 7, kind: input, shape index: {}]   ;;  %s9177_s8 = inlined_call_operand.vmem [shape: f32[1,128], index: 8, kind: input, shape index: {}]   ;;  %s9178_s10 = inlined_call_operand.vmem [shape: f32[200,128], index: 10, kind: output, shape index: {}]  }
   0x1   :  { %v991_v0 = vld [vmem:[%s9168_s0 + $0xc] sm:$0xf]  ;;  %v399_v1 = vld [vmem:[%s9168_s0] sm:$0x8]  ;;  %v400_v2 = vld [vmem:[%s9168_s0 + $0x4] sm:$0xf] }
   0x2   :  { %1042 = vrot.lane.b32.xlu1 %v991_v0, %s6191_s19  ;;  %vm6262_vm3 = vmor %vm451_vm0, %vm452_vm1  ;;  %v5099_v4 = vrot.slane %v399_v1, 11  ;;  %v456_v5 = vrot.slane %v400_v2, 7  ;;  %v631_v6 = vld [vmem:[%s9168_s0 + $0x4] sm:$0x8]  ;;  %v632_v7 = vld [vmem:[%s9168_s0 + $0x8] sm:$0xf] }
   0x3   :  { %vm658_vm4 = vsmask.f32 4368  ;;  %v661_v8 = vshrl.u32 %v631_v6, 16  ;;  %v666_v9 = vshrl.u32 %v632_v7, 16  ;;  %v669_v10 = vshll.u32 %v632_v7, 16  ;;  %s6193_s17 = smov 32  }
   0x4   :  { %v457_v11 = vsel %vm6262_vm3, %v5099_v4, %v456_v5  ;;  %v401_v12 = vld [vmem:[%s9168_s0 + $0x8] sm:$0xf]  ;;  %v458_v13 = vrot.slane %v456_v5, 4  ;;  %v633_v14 = vld [vmem:[%s9168_s0 + $0xc] sm:$0xf]  ;;  %vm6282_vm5 = vmor %vm657_vm2, %vm658_vm4  ;;  %vm373_vm6 = vcmask 125952  }
   0x5   :  { %530 = vrot.lane.b32.xlu0 %v457_v11, %s6192_s28  ;;  %v5100_v15 = vrot.slane %v661_v8, 11  ;;  %v668_v16 = vrot.slane %v666_v9, 7  ;;  %v459_v17 = vrot.slane %v401_v12, 7  ;;  %v675_v18 = vshrl.u32 %v633_v14, 16  ;;  %v402_v21 = vld [vmem:[%s9168_s0 + $0xc] sm:$0xf] }
   0x6   :  { %v678_v20 = vshll.u32 %v633_v14, 16  ;;  %v403_v22 = vld [vmem:[%s9168_s0 + $0x10] sm:$0xf]  ;;  %v635_v28 = vld [vmem:[%s9168_s0 + $0x14] sm:$0xf]  ;;  %v462_v29 = vrot.slane %v402_v21, 7 }
   0x7   :  { %v671_v23 = vor.u32 %v669_v10, %v668_v16  ;;  %v460_v24 = vsel %vm6262_vm3, %v458_v13, %v459_v17  ;;  %v673_v25 = vrot.slane %v668_v16, 4  ;;  %v677_v26 = vrot.slane %v675_v18, 7  ;;  %v634_v27 = vld [vmem:[%s9168_s0 + $0x10] sm:$0xf]  ;;  %v990_v34 = vld [vmem:[%s9168_s0 + $0x8] sm:$0xf] }
   0x8   :  { %v684_v30 = vshrl.u32 %v634_v27, 16  ;;  %v693_v33 = vshrl.u32 %v635_v28, 16  ;;  %v465_v35 = vrot.slane %v403_v22, 7  ;;  %v461_v36 = vrot.slane %v459_v17, 4  ;;  %v636_v49 = vld [vmem:[%s9168_s0 + $0x18] sm:$0xf] }
   0x9   :  { %v672_v31 = vsel %vm6282_vm5, %v5100_v15, %v671_v23  ;;  %532 = vrot.lane.b32.xlu0 %v460_v24, %s6192_s28  ;;  %v680_v32 = vor.u32 %v678_v20, %v677_v26  ;;  %v696_v38 = vshll.u32 %v635_v28, 16  ;;  %v464_v40 = vrot.slane %v462_v29, 4  ;;  %v404_v50 = vld [vmem:[%s9168_s0 + $0x14] sm:$0xf]  ;;  %v637_v51 = vld [vmem:[%s9168_s0 + $0x1c] sm:$0xf] }
   0xa   :  { %889 = vrot.lane.b32.xlu1 %v672_v31, %s6193_s17  ;;  %v686_v37 = vrot.slane %v684_v30, 7  ;;  %v695_v41 = vrot.slane %v693_v33, 7  ;;  %v687_v42 = vshll.u32 %v634_v27, 16  ;;  %v463_v43 = vsel %vm6262_vm3, %v461_v36, %v462_v29  ;;  %v405_v57 = vld [vmem:[%s9168_s0 + $0x18] sm:$0xf]  ;;  %v36_v19 = vld [vmem:[%s9170_s9] sm:$0xff] }
   0xb   :  { %v681_v39 = vsel %vm6282_vm5, %v673_v25, %v680_v32  ;;  %v682_v44 = vrot.slane %v677_v26, 4  ;;  %v466_v46 = vsel %vm6262_vm3, %v464_v40, %v465_v35  ;;  %v702_v53 = vshrl.u32 %v636_v49, 16  ;;  %v992_v58 = vld [vmem:[%s9168_s0 + $0x10] sm:$0xf]  ;;  %v993_v62 = vld [vmem:[%s9168_s0 + $0x14] sm:$0xf] }
   0xc   :  { %v689_v45 = vor.u32 %v687_v42, %v686_v37  ;;  %v691_v47 = vrot.slane %v686_v37, 4  ;;  %v698_v48 = vor.u32 %v696_v38, %v695_v41  ;;  %v468_v55 = vrot.slane %v404_v50, 7  ;;  %v638_v10 = vld [vmem:[%s9168_s0 + $0x20] sm:$0xf]  ;;  %v639_v11 = vld [vmem:[%s9168_s0 + $0x24] sm:$0xf] }
   0xd   :  { %1040 = vrot.lane.b32.xlu0 %v990_v34, %s6191_s19  ;;  %v711_v56 = vshrl.u32 %v637_v51, 16  ;;  %v467_v59 = vrot.slane %v465_v35, 4  ;;  %v704_v60 = vrot.slane %v702_v53, 7  ;;  %v705_v61 = vshll.u32 %v636_v49, 16  ;;  %v406_v12 = vld [vmem:[%s9168_s0 + $0x1c] sm:$0xf] }
   0xe   :  { %891 = vrot.lane.b32.xlu1 %v681_v39, %s6193_s17  ;;  %v690_v52 = vsel %vm6282_vm5, %v682_v44, %v689_v45  ;;  %v699_v54 = vsel %vm6282_vm5, %v691_v47, %v698_v48  ;;  %v470_v63 = vrot.slane %v468_v55, 4  ;;  %v471_v0 = vrot.slane %v405_v57, 7  ;;  %v407_v18 = vld [vmem:[%s9168_s0 + $0x20] sm:$0xf]  ;;  %v640_v21 = vld [vmem:[%s9168_s0 + $0x28] sm:$0xf] }
   0xf   :  { %v6341_v1 = vrot.slane %v711_v56, 7  ;;  %v714_v2 = vshll.u32 %v637_v51, 16  ;;  %v469_v4 = vsel %vm6262_vm3, %v467_v59, %v468_v55  ;;  %v700_v5 = vrot.slane %v695_v41, 4  ;;  %v641_v22 = vld [vmem:[%s9168_s0 + $0x2c] sm:$0xf] }
  0x10   :  { %v707_v6 = vor.u32 %v705_v61, %v704_v60  ;;  %v472_v7 = vsel %vm6262_vm3, %v470_v63, %v471_v0  ;;  %v709_v8 = vrot.slane %v704_v60, 4  ;;  %v720_v14 = vshrl.u32 %v638_v10, 16  ;;  %v994_v23 = vld [vmem:[%s9168_s0 + $0x18] sm:$0xf]  ;;  %v995_v28 = vld [vmem:[%s9168_s0 + $0x1c] sm:$0xf] }
  0x11   :  { %534 = vrot.lane.b32.xlu0 %v463_v43, %s6192_s28  ;;  %v716_v9 = vor.u32 %v714_v2, %v6341_v1  ;;  %v729_v15 = vshrl.u32 %v639_v11, 16  ;;  %v474_v17 = vrot.slane %v406_v12, 7  ;;  %v473_v20 = vrot.slane %v471_v0, 4  ;;  %v408_v31 = vld [vmem:[%s9168_s0 + $0x24] sm:$0xf] }
  0x12   :  { %536 = vrot.lane.b32.xlu1 %v466_v46, %s6192_s28  ;;  %v708_v13 = vsel %vm6282_vm5, %v700_v5, %v707_v6  ;;  %v722_v24 = vrot.slane %v720_v14, 7  ;;  %v732_v26 = vshll.u32 %v639_v11, 16  ;;  %v723_v27 = vshll.u32 %v638_v10, 16  ;;  %v6390_v34 = vld [vmem:[%s9168_s0 + $0x40] sm:$0xf] }
  0x13   :  { %v717_v16 = vsel %vm6282_vm5, %v709_v8, %v716_v9  ;;  %v6379_v25 = vrot.slane %v729_v15, 7  ;;  %v476_v29 = vrot.slane %v474_v17, 4  ;;  %v477_v30 = vrot.slane %v407_v18, 7  ;;  %v6399_v37 = vld [vmem:[%s9168_s0 + $0x28] sm:$0xf]  ;;  %v6036_v15 = vld [vmem:[%s9169_s1 + $0x18] sm:$0xff]  }
  0x14   :  { %v738_v32 = vshrl.u32 %v640_v21, 16  ;;  %v747_v33 = vshrl.u32 %v641_v22, 16  ;;  %v475_v35 = vsel %vm6262_vm3, %v473_v20, %v474_v17  ;;  %v718_v36 = vrot.slane %v6341_v1, 4  ;;  %v6404_v38 = vld [vmem:[%s9168_s0 + $0x3c] sm:$0xf] }
  0x15   :  { %893 = vrot.lane.b32.xlu0 %v690_v52, %s6193_s17  ;;  %v727_v39 = vrot.slane %v722_v24, 4  ;;  %v734_v40 = vor.u32 %v732_v26, %v6379_v25  ;;  %v725_v41 = vor.u32 %v723_v27, %v722_v24  ;;  %v480_v42 = vrot.slane %v408_v31, 7  ;;  %v6411_v43 = vld [vmem:[%s9168_s0 + $0x38] sm:$0xf]  ;;  %v6416_v44 = vld [vmem:[%s9168_s0 + $0x44] sm:$0xf] }
  0x16   :  { %895 = vrot.lane.b32.xlu1 %v699_v54, %s6193_s17  ;;  %v478_v45 = vsel %vm6262_vm3, %v476_v29, %v477_v30  ;;  %v750_v46 = vshll.u32 %v641_v22, 16  ;;  %v6423_v47 = vld [vmem:[%s9168_s0 + $0x40] sm:$0xf]  ;;  %v792_v48 = vshrl.u32 %v6390_v34, 16  ;;  %v740_v49 = vrot.slane %v738_v32, 7 }
  0x17   :  { %v6426_v50 = vrot.slane %v747_v33, 7  ;;  %v741_v51 = vshll.u32 %v640_v21, 16  ;;  %v498_v52 = vrot.slane %v6404_v38, 7  ;;  %v6432_v53 = vld [vmem:[%s9168_s0 + $0x3c] sm:$0xf]  ;;  %v483_v54 = vrot.slane %v6399_v37, 7 }
  0x18   :  { %v495_v55 = vrot.slane %v6411_v43, 7  ;;  %v801_v56 = vshrl.u32 %v6416_v44, 16  ;;  %v735_v57 = vsel %vm6282_vm5, %v727_v39, %v734_v40  ;;  %v482_v59 = vrot.slane %v480_v42, 4  ;;  %v996_v1 = vld [vmem:[%s9168_s0 + $0x20] sm:$0xf] }
  0x19   :  { %1044 = vrot.lane.b32.xlu0 %v992_v58, %s6191_s19  ;;  %v726_v58 = vsel %vm6282_vm5, %v718_v36, %v725_v41  ;;  %v479_v60 = vrot.slane %v477_v30, 4  ;;  %v736_v61 = vrot.slane %v6379_v25, 4  ;;  %v6445_v63 = vrot.slane %v792_v48, 7  ;;  %v61_v12 = vld [vmem:[%s9168_s0] sm:$0xc] }
  0x1a   :  { %1046 = vrot.lane.b32.xlu1 %v993_v62, %s6191_s19  ;;  %v501_v62 = vrot.slane %v6423_v47, 7  ;;  %v783_v0 = vshrl.u32 %v6432_v53, 16  ;;  %v745_v2 = vrot.slane %v740_v49, 4  ;;  %v743_v5 = vor.u32 %v741_v51, %v740_v49  ;;  %v62_v14 = vld [vmem:[%s9168_s0 + $0x4] sm:$0xf] }
  0x1b   :  { %v6454_v6 = vrot.slane %v498_v52, 4  ;;  %v497_v8 = vrot.slane %v495_v55, 4  ;;  %v6462_v9 = vrot.slane %v801_v56, 7  ;;  %v804_v10 = vshll.u32 %v6416_v44, 16  ;;  %v6489_v21 = vld [vmem:[%s9168_s0 + $0x30] sm:$0xf] }
  0x1c   :  { %v795_v11 = vshll.u32 %v6390_v34, 16  ;;  %v481_v17 = vsel %vm6262_vm3, %v479_v60, %v480_v42  ;;  %v799_v18 = vrot.slane %v6445_v63, 4  ;;  %v6484_v20 = vrot.slane %v783_v0, 7  ;;  %v6500_v24 = vld [vmem:[%s9168_s0 + $0x30] sm:$0xf] }
  0x1d   :  { %538 = vrot.lane.b32.xlu0 %v469_v4, %s6192_s28  ;;  %v752_v4 = vor.u32 %v750_v46, %v6426_v50  ;;  %v6505_v25 = vld [vmem:[%s9168_s0 + $0x34] sm:$0xf]  ;;  %v91_v26 = vshrl.u32 %v61_v12, 16  ;;  %v94_v27 = vshll.u32 %v61_v12, 16  ;;  %vm87_vm7 = vsmask.f32 1280 }
  0x1e   :  { %540 = vrot.lane.b32.xlu1 %v472_v7, %s6192_s28  ;;  %v997_v7 = vld [vmem:[%s9168_s0 + $0x24] sm:$0xf]  ;;  %vm88_vm8 = vsmask.f32 5392  ;;  %v100_v30 = vshrl.u32 %v62_v14, 16  ;;  %v103_v33 = vshll.u32 %v62_v14, 16  ;;  %v806_v34 = vor.u32 %v804_v10, %v6462_v9 }
  0x1f   :  { %v6493_v22 = vsel %vm6282_vm5, %v745_v2, %v752_v4  ;;  %v93_v31 = vrot.slane %v91_v26, 6  ;;  %v96_v32 = vrot.slane %v94_v27, 7  ;;  %v485_v36 = vrot.slane %v483_v54, 4  ;;  %vm6527_vm9 = vmor %vm87_vm7, %vm88_vm8  ;;  %v6536_v56 = vld [vmem:[%s9168_s0 + $0x44] sm:$0xf] }
  0x20   :  { %v102_v37 = vrot.slane %v100_v30, 6  ;;  %v9179_v39 = vmov 0.0   ;;  %v105_v41 = vrot.slane %v103_v33, 7  ;;  %v790_v46 = vrot.slane %v6484_v20, 4  ;;  %v6556_v4 = vld [vmem:[%s9168_s0 + $0x48] sm:$0xf] }
  0x21   :  { %897 = vrot.lane.b32.xlu0 %v708_v13, %s6193_s17  ;;  %v410_v13 = vld [vmem:[%s9168_s0 + $0x2c] sm:$0xf]  ;;  %5838 = vmatprep.subr.bf16.mxu0 %v9179_v39  ;;  %v97_v40 = vor.u32 %v96_v32, %v93_v31  ;;  %v756_v49 = vshrl.u32 %v6500_v24, 16  ;;  %v765_v51 = vshrl.u32 %v6505_v25, 16  ;;  %v499_v0 = vsel %vm6262_vm3, %v497_v8, %v498_v52  ;;  %v6581_v14 = vld [vmem:[%s9168_s0 + $0x48] sm:$0xf] }
  0x22   :  { %899 = vrot.lane.b32.xlu1 %v717_v16, %s6193_s17  ;;  %v484_v16 = vsel %vm6262_vm3, %v482_v59, %v483_v54  ;;  %v486_v29 = vrot.slane %v410_v13, 7  ;;  %6020 = vmatprep.subr.bf16.mxu1 %v9179_v39  ;;  %v797_v2 = vor.u32 %v795_v11, %v6445_v63  ;;  %v65_v63 = vld [vmem:[%s9168_s0 + $0x10] sm:$0xf]  ;;  %v6038_v8 = vld [vmem:[%s9169_s1 + $0x8] sm:$0xff]   ;;  %v768_v12 = vshll.u32 %v6505_v25, 16  ;;  %v6039_v31 = vld [vmem:[%s9169_s1] sm:$0xff]  }
  0x23   :  { %5839 = vmatpush3.bf16.msra.mxu0 %v6036_v15  ;;  %6024 = vmatpush3.bf16.msra.mxu1 %v6036_v15  ;;  %v758_v10 = vrot.slane %v756_v49, 7  ;;  %v6574_v11 = vrot.slane %v765_v51, 7  ;;  %v759_v13 = vshll.u32 %v6500_v24, 16  ;;  %v6586_v15 = vld [vmem:[%s9168_s0 + $0x4c] sm:$0xf]  ;;  %v503_v24 = vrot.slane %v501_v62, 4 }
  0x24   :  { %v6521_v48 = vrot.slane %v486_v29, 4  ;;  %5840 = vmatprep.subr.bf16.mxu0 %v9179_v39  ;;  %6021 = vmatprep.subr.bf16.mxu1 %v9179_v39  ;;  %v6563_v38 = vsel %vm6262_vm3, %v485_v36, %v486_v29  ;;  %v810_v25 = vshrl.u32 %v6556_v4, 16  ;;  %v130_v26 = vshrl.u32 %v65_v63, 16  ;;  %v998_v36 = vld [vmem:[%s9168_s0 + $0x28] sm:$0xf] }
  0x25   :  { %1048 = vrot.lane.b32.xlu0 %v994_v23, %s6191_s19  ;;  %v744_v23 = vsel %vm6282_vm5, %v736_v61, %v743_v5  ;;  %v502_v61 = vsel %vm6262_vm3, %v6454_v6, %v501_v62  ;;  %v64_v5 = vld [vmem:[%s9168_s0 + $0xc] sm:$0xf]  ;;  %v133_v27 = vshll.u32 %v65_v63, 16  ;;  %v763_v47 = vrot.slane %v758_v10, 4  ;;  %v66_v49 = vld [vmem:[%s9168_s0 + $0x14] sm:$0xf] }
  0x26   :  { %1050 = vrot.lane.b32.xlu1 %v995_v28, %s6191_s19  ;;  %v63_v28 = vld [vmem:[%s9168_s0 + $0x8] sm:$0xf]  ;;  %v770_v62 = vor.u32 %v768_v12, %v6574_v11  ;;  %v132_v32 = vrot.slane %v130_v26, 6  ;;  %v812_v51 = vrot.slane %v810_v25, 7  ;;  %vm6195_vm10 = vmmov 0  }
  0x27   :  { %v110_v42 = vshrl.u32 %v63_v28, 16  ;;  %v113_v44 = vshll.u32 %v63_v28, 16  ;;  %v135_v33 = vrot.slane %v133_v27, 7  ;;  %5846 = vmatprep.mubr.msk.bf16.mxu0 %vm6195_vm10, %v9179_v39  ;;  %5874 = vmatprep.mubr.msk.bf16.mxu1 %vm6195_vm10, %v9179_v39  ;;  %v1004_v25 = vld [vmem:[%s9168_s0 + $0x40] sm:$0xf]  ;;  %vm605_vm11 = vcmask 257152  }
  0x28   :  { %vm964_vm12 = vcmask 388352   ;;  %vm1115_vm13 = vcmask 519552   ;;  %vm1261_vm14 = vcmask 523264   ;;  %v1014_v3 = vld [vmem:[%s9168_s0 + $0x68] sm:$0xf] }
  0x29   :  { %542 = vrot.lane.b32.xlu0 %v475_v35, %s6192_s28  ;;  %v489_v35 = vrot.slane %v6489_v21, 7  ;;  %v112_v59 = vrot.slane %v110_v42, 6  ;;  %v115_v60 = vrot.slane %v113_v44, 7  ;;  %vm2237_vm15 = vsmask.f32 4352 }
  0x2a   :  { %544 = vrot.lane.b32.xlu1 %v478_v45, %s6192_s28  ;;  %v6037_v45 = vld [vmem:[%s9169_s1 + $0x10] sm:$0xff]   ;;  %vm2046_vm0 = vsmask.f32 7424  ;;  %vm2668_vm1 = vsmask.f32 5376 }
  0x2b   :  { %5841 = vmatpush3.bf16.msra.mxu0 %v6037_v45  ;;  %6025 = vmatpush3.bf16.msra.mxu1 %v6037_v45  ;;  %v6626_v44 = vsel %vm6262_vm3, %v6521_v48, %v489_v35  ;;  %v822_v45 = vshll.u32 %v6586_v15, 16  ;;  %vm4253_vm2 = vsmask.f32 6400 }
  0x2c   :  { %5842 = vmatprep.subr.bf16.mxu0 %v9179_v39  ;;  %6022 = vmatprep.subr.bf16.mxu1 %v9179_v39 }
  0x2d   :  { %901 = vrot.lane.b32.xlu0 %v726_v58, %s6193_s17  ;;  %v106_v58 = vor.u32 %v105_v41, %v102_v37  ;;  %v798_v37 = vsel %vm6282_vm5, %v790_v46, %v797_v2  ;;  %v507_v41 = vrot.slane %v6581_v14, 7  ;;  %v6632_v46 = vld [vmem:[%s9168_s0 + $0x34] sm:$0xf]  ;;  %v6658_v2 = vld [vmem:[%s9168_s0 + $0x38] sm:$0xf] }
  0x2e   :  { %903 = vrot.lane.b32.xlu1 %v735_v57, %s6193_s17  ;;  %v98_v57 = vrot.slane %v97_v40, 4  ;;  %v754_v40 = vrot.slane %v6426_v50, 4  ;;  %v136_v50 = vor.u32 %v135_v33, %v132_v32  ;;  %v492_v63 = vrot.slane %v6632_v46, 7  ;;  %v82_v14 = vld [vmem:[%s9168_s0 + $0x54] sm:$0xf] }
  0x2f   :  { %v108_v6 = vrot.slane %v106_v58, 4  ;;  %5843 = vmatpush3.bf16.msra.mxu0 %v6038_v8  ;;  %6026 = vmatpush3.bf16.msra.mxu1 %v6038_v8  ;;  %v143_v8 = vshll.u32 %v66_v49, 16 }
  0x30   :  { %v107_v52 = vsel %vm6527_vm9, %v98_v57, %v106_v58  ;;  %5844 = vmatprep.subr.bf16.mxu0 %v9179_v39  ;;  %6023 = vmatprep.subr.bf16.mxu1 %v9179_v39  ;;  %v67_v58 = vld [vmem:[%s9168_s0 + $0x18] sm:$0xf] }
  0x31   :  { %1052 = vrot.lane.b32.xlu0 %v996_v1, %s6191_s19  ;;  %v6550_v1 = vsel %vm6282_vm5, %v799_v18, %v806_v34  ;;  %374 = vst.msk [vmem:[#allocation2] sm:$0xf] %vm373_vm6, %v107_v52  ;;  %v120_v18 = vshrl.u32 %v64_v5, 16  ;;  %v999_v34 = vld [vmem:[%s9168_s0 + $0x2c] sm:$0xf]  ;;  %v813_v52 = vshll.u32 %v6556_v4, 16 }
  0x32   :  { %1054 = vrot.lane.b32.xlu1 %v997_v7, %s6191_s19  ;;  %v116_v7 = vor.u32 %v115_v60, %v112_v59  ;;  %v6649_v59 = vsel %vm6282_vm5, %v763_v47, %v770_v62  ;;  %v761_v60 = vor.u32 %v759_v13, %v758_v10  ;;  %v150_v10 = vshrl.u32 %v67_v58, 16 }
  0x33   :  { %v122_v28 = vrot.slane %v120_v18, 6  ;;  %5845 = vmatpush3.bf16.msra.mxu0 %v6039_v31  ;;  %6027 = vmatpush3.bf16.msra.mxu1 %v6039_v31  ;;  %v153_v12 = vshll.u32 %v67_v58, 16  ;;  %v817_v13 = vrot.slane %v812_v51, 4  ;;  %v786_v31 = vshll.u32 %v6432_v53, 16 }
  0x34   :  { %v118_v30 = vrot.slane %v116_v7, 4  ;;  %v762_v26 = vsel %vm6282_vm5, %v754_v40, %v761_v60  ;;  %v777_v58 = vshll.u32 %v6658_v2, 16 }
  0x35   :  { %546 = vrot.lane.b32.xlu0 %v481_v17, %s6192_s28  ;;  %v117_v17 = vsel %vm6527_vm9, %v108_v6, %v116_v7  ;;  %v140_v7 = vshrl.u32 %v66_v49, 16  ;;  %v155_v18 = vrot.slane %v153_v12, 7  ;;  %v77_v12 = vld [vmem:[%s9168_s0 + $0x40] sm:$0xf] }
  0x36   :  { %548 = vrot.lane.b32.xlu1 %v484_v16, %s6192_s28  ;;  %v504_v16 = vrot.slane %v6536_v56, 7  ;;  %375 = vst.msk [vmem:[#allocation2 + $0x4] sm:$0xf] %vm373_vm6, %v117_v17  ;;  %v152_v17 = vrot.slane %v150_v10, 6 }
  0x37   :  { %v142_v4 = vrot.slane %v140_v7, 6 }
  0x38   :  { %v156_v62 = vor.u32 %v155_v18, %v152_v17 }
  0x39   :  { %905 = vrot.lane.b32.xlu0 %v744_v23, %s6193_s17  ;;  %v123_v23 = vshll.u32 %v64_v5, 16  ;;  %v808_v5 = vrot.slane %v6462_v9, 4  ;;  %v774_v9 = vshrl.u32 %v6658_v2, 16 }
  0x3a   :  { %907 = vrot.lane.b32.xlu1 %v6493_v22, %s6193_s17  ;;  %v819_v22 = vshrl.u32 %v6586_v15, 16 }
  0x3b   :  { %v125_v29 = vrot.slane %v123_v23, 7  ;;  %v138_v23 = vrot.slane %v136_v50, 4 }
  0x3c   :  { %v6637_v56 = vrot.slane %v819_v22, 7  ;;  %v815_v22 = vor.u32 %v813_v52, %v812_v51 }
  0x3d   :  { %558 = vrot.lane.b32.xlu0 %v499_v0, %s6192_s28  ;;  %v126_v42 = vor.u32 %v125_v29, %v122_v28  ;;  %v6653_v0 = vsel %vm6262_vm3, %v503_v24, %v504_v16  ;;  %v68_v24 = vld [vmem:[%s9168_s0 + $0x1c] sm:$0xf]  ;;  %v6691_v28 = vrot.slane %v489_v35, 4  ;;  %v1005_v29 = vld [vmem:[%s9168_s0 + $0x44] sm:$0xf]  ;;  %v772_v35 = vrot.slane %v6574_v11, 4 }
  0x3e   :  { %560 = vrot.lane.b32.xlu1 %v502_v61, %s6192_s28  ;;  %v506_v61 = vrot.slane %v504_v16, 4  ;;  %v824_v15 = vor.u32 %v822_v45, %v6637_v56  ;;  %v145_v16 = vrot.slane %v143_v8, 7  ;;  %v160_v32 = vshrl.u32 %v68_v24, 16  ;;  %v71_v45 = vld [vmem:[%s9168_s0 + $0x28] sm:$0xf] }
  0x3f   :  { %v128_v57 = vrot.slane %v126_v42, 4  ;;  %v127_v48 = vsel %vm6527_vm9, %v118_v30, %v126_v42  ;;  %v6701_v30 = vrot.slane %v492_v63, 4  ;;  %v163_v33 = vshll.u32 %v68_v24, 16 }
  0x40   :  { %376 = vst.msk [vmem:[#allocation2 + $0x8] sm:$0xf] %vm373_vm6, %v127_v48  ;;  %v6687_v27 = vsel %vm6262_vm3, %v506_v61, %v507_v41  ;;  %v146_v47 = vor.u32 %v145_v16, %v142_v4  ;;  %v6706_v21 = vsel %vm6282_vm5, %v817_v13, %v824_v15  ;;  %v76_v48 = vld [vmem:[%s9168_s0 + $0x3c] sm:$0xf]  ;;  %v190_v10 = vshrl.u32 %v71_v45, 16 }
  0x41   :  { %1056 = vrot.lane.b32.xlu0 %v998_v36, %s6191_s19  ;;  %v137_v6 = vsel %vm6527_vm9, %v128_v57, %v136_v50  ;;  %v6713_v36 = vrot.slane %v774_v9, 7  ;;  %v162_v50 = vrot.slane %v160_v32, 6  ;;  %v165_v49 = vrot.slane %v163_v33, 7  ;;  %v75_v16 = vld [vmem:[%s9168_s0 + $0x38] sm:$0xf] }
  0x42   :  { %1058 = vrot.lane.b32.xlu1 %v999_v34, %s6191_s19  ;;  %377 = vst.msk [vmem:[#allocation2 + $0xc] sm:$0xf] %vm373_vm6, %v137_v6  ;;  %v70_v34 = vld [vmem:[%s9168_s0 + $0x24] sm:$0xf]  ;;  %v147_v40 = vsel %vm6527_vm9, %v138_v23, %v146_v47  ;;  %v158_v57 = vrot.slane %v156_v62, 4  ;;  %v6736_v13 = vsel %vm6282_vm5, %v808_v5, %v815_v22  ;;  %v193_v9 = vshll.u32 %v71_v45, 16 }
  0x43   :  { %378 = vst.msk [vmem:[#allocation2 + $0x10] sm:$0xf] %vm373_vm6, %v147_v40  ;;  %v180_v52 = vshrl.u32 %v70_v34, 16  ;;  %v166_v6 = vor.u32 %v165_v49, %v162_v50  ;;  %v183_v8 = vshll.u32 %v70_v34, 16  ;;  %v240_v4 = vshrl.u32 %v76_v48, 16 }
  0x44   :  { %v72_v5 = vld [vmem:[%s9168_s0 + $0x2c] sm:$0xf]  ;;  %v192_v24 = vrot.slane %v190_v10, 6  ;;  %v250_v32 = vshrl.u32 %v77_v12, 16  ;;  %v230_v40 = vshrl.u32 %v75_v16, 16  ;;  %v233_v49 = vshll.u32 %v75_v16, 16 }
  0x45   :  { %917 = vrot.lane.b32.xlu0 %v798_v37, %s6193_s17  ;;  %v148_v37 = vrot.slane %v146_v47, 4  ;;  %v182_v15 = vrot.slane %v180_v52, 6  ;;  %v168_v17 = vrot.slane %v166_v6, 4  ;;  %v167_v23 = vsel %vm6527_vm9, %v158_v57, %v166_v6  ;;  %v1001_v10 = vld [vmem:[%s9168_s0 + $0x34] sm:$0xf] }
  0x46   :  { %919 = vrot.lane.b32.xlu1 %v6550_v1, %s6193_s17  ;;  %v69_v1 = vld [vmem:[%s9168_s0 + $0x20] sm:$0xf]  ;;  %380 = vst.msk [vmem:[#allocation2 + $0x18] sm:$0xf] %vm373_vm6, %v167_v23  ;;  %v242_v22 = vrot.slane %v240_v4, 6  ;;  %v252_v50 = vrot.slane %v250_v32, 6 }
  0x47   :  { %v170_v42 = vshrl.u32 %v69_v1, 16  ;;  %v173_v51 = vshll.u32 %v69_v1, 16  ;;  %v157_v60 = vsel %vm6527_vm9, %v148_v37, %v156_v62  ;;  %v243_v1 = vshll.u32 %v76_v48, 16 }
  0x48   :  { %379 = vst.msk [vmem:[#allocation2 + $0x14] sm:$0xf] %vm373_vm6, %v157_v60  ;;  %v253_v37 = vshll.u32 %v77_v12, 16  ;;  %v232_v48 = vrot.slane %v230_v40, 6  ;;  %v200_v60 = vshrl.u32 %v72_v5, 16  ;;  %v235_v6 = vrot.slane %v233_v49, 7 }
  0x49   :  { %1068 = vrot.lane.b32.xlu0 %v1004_v25, %s6191_s19  ;;  %v172_v61 = vrot.slane %v170_v42, 6  ;;  %v175_v7 = vrot.slane %v173_v51, 7  ;;  %v195_v25 = vrot.slane %v193_v9, 7  ;;  %v245_v34 = vrot.slane %v243_v1, 7  ;;  %v78_v51 = vld [vmem:[%s9168_s0 + $0x44] sm:$0xf] }
  0x4a   :  { %1070 = vrot.lane.b32.xlu1 %v1005_v29, %s6191_s19  ;;  %v255_v57 = vrot.slane %v253_v37, 7  ;;  %v202_v9 = vrot.slane %v200_v60, 6  ;;  %v6780_v16 = vor.u32 %v235_v6, %v232_v48  ;;  %v303_v11 = vshll.u32 %v82_v14, 16 }
  0x4b   :  { %v176_v18 = vor.u32 %v175_v7, %v172_v61  ;;  %v196_v33 = vor.u32 %v195_v25, %v192_v24  ;;  %v1000_v61 = vld [vmem:[%s9168_s0 + $0x30] sm:$0xf]  ;;  %v203_v7 = vshll.u32 %v72_v5, 16  ;;  %v260_v24 = vshrl.u32 %v78_v51, 16 }
  0x4c   :  { %v263_v25 = vshll.u32 %v78_v51, 16 }
  0x4d   :  { %550 = vrot.lane.b32.xlu0 %v6563_v38, %s6192_s28  ;;  %v185_v38 = vrot.slane %v183_v8, 7  ;;  %v177_v29 = vsel %vm6527_vm9, %v168_v17, %v176_v18  ;;  %v178_v62 = vrot.slane %v176_v18, 4  ;;  %v205_v17 = vrot.slane %v203_v7, 7 }
  0x4e   :  { %552 = vrot.lane.b32.xlu1 %v6626_v44, %s6192_s28  ;;  %v73_v44 = vld [vmem:[%s9168_s0 + $0x30] sm:$0xf]  ;;  %381 = vst.msk [vmem:[#allocation2 + $0x1c] sm:$0xf] %vm373_vm6, %v177_v29  ;;  %v198_v23 = vrot.slane %v196_v33, 4  ;;  %v265_v32 = vrot.slane %v263_v25, 7 }
  0x4f   :  { %v186_v47 = vor.u32 %v185_v38, %v182_v15  ;;  %v210_v8 = vshrl.u32 %v73_v44, 16  ;;  %v256_v15 = vor.u32 %v255_v57, %v252_v50  ;;  %v213_v4 = vshll.u32 %v73_v44, 16  ;;  %v80_v29 = vld [vmem:[%s9168_s0 + $0x4c] sm:$0xf]  ;;  %v1006_v57 = vld [vmem:[%s9168_s0 + $0x48] sm:$0xf] }
  0x51   :  { %909 = vrot.lane.b32.xlu0 %v762_v26, %s6193_s17  ;;  %v188_v42 = vrot.slane %v186_v47, 4  ;;  %v187_v45 = vsel %vm6527_vm9, %v178_v62, %v186_v47  ;;  %v246_v26 = vor.u32 %v245_v34, %v242_v22  ;;  %v212_v18 = vrot.slane %v210_v8, 6  ;;  %v81_v34 = vld [vmem:[%s9168_s0 + $0x50] sm:$0xf] }
  0x52   :  { %911 = vrot.lane.b32.xlu1 %v6649_v59, %s6193_s17  ;;  %382 = vst.msk [vmem:[#allocation2 + $0x20] sm:$0xf] %vm373_vm6, %v187_v45  ;;  %v79_v59 = vld [vmem:[%s9168_s0 + $0x48] sm:$0xf]  ;;  %v215_v5 = vrot.slane %v213_v4, 7  ;;  %v238_v22 = vrot.slane %v6780_v16, 4 }
  0x53   :  { %v197_v52 = vsel %vm6527_vm9, %v188_v42, %v196_v33  ;;  %v248_v12 = vrot.slane %v246_v26, 4  ;;  %v270_v1 = vshrl.u32 %v79_v59, 16  ;;  %v273_v44 = vshll.u32 %v79_v59, 16 }
  0x54   :  { %383 = vst.msk [vmem:[#allocation2 + $0x24] sm:$0xf] %vm373_vm6, %v197_v52  ;;  %v216_v47 = vor.u32 %v215_v5, %v212_v18  ;;  %v262_v62 = vrot.slane %v260_v24, 6  ;;  %v258_v33 = vrot.slane %v256_v15, 4  ;;  %v247_v37 = vsel %vm6527_vm9, %v238_v22, %v246_v26  ;;  %v1007_v52 = vld [vmem:[%s9168_s0 + $0x4c] sm:$0xf] }
  0x55   :  { %562 = vrot.lane.b32.xlu0 %v6653_v0, %s6192_s28  ;;  %v74_v0 = vld [vmem:[%s9168_s0 + $0x34] sm:$0xf]  ;;  %v257_v38 = vsel %vm6527_vm9, %v248_v12, %v256_v15  ;;  %v272_v45 = vrot.slane %v270_v1, 6  ;;  %388 = vst.msk [vmem:[#allocation2 + $0x38] sm:$0xf] %vm373_vm6, %v247_v37  ;;  %v275_v49 = vrot.slane %v273_v44, 7  ;;  %v493_v24 = vsel %vm6262_vm3, %v6691_v28, %v492_v63 }
  0x56   :  { %564 = vrot.lane.b32.xlu1 %v6687_v27, %s6192_s28  ;;  %389 = vst.msk [vmem:[#allocation2 + $0x3c] sm:$0xf] %vm373_vm6, %v257_v38  ;;  %v206_v27 = vor.u32 %v205_v17, %v202_v9  ;;  %v266_v50 = vor.u32 %v265_v32, %v262_v62  ;;  %v220_v51 = vshrl.u32 %v74_v0, 16  ;;  %v6196_v26 = vmov 0   ;;  %v418_v12 = vld [vmem:[%s9168_s0 + $0x4c] sm:$0xf] }
  0x57   :  { %6034 = vset.pattern.permute.xlu1 %v6196_v26  ;;  %1821 = vst [vmem:[#allocation3] sm:$0xf] %v6196_v26  ;;  %1822 = vst [vmem:[#allocation3 + $0x4] sm:$0xf] %v6196_v26  ;;  %6035 = vset.pattern.permute.xlu0 %v6196_v26  ;;  %v223_v60 = vshll.u32 %v74_v0, 16  ;;  %v218_v59 = vrot.slane %v216_v47, 4  ;;  %v276_v7 = vor.u32 %v275_v49, %v272_v45 }
  0x58   :  { %v208_v40 = vrot.slane %v206_v27, 4  ;;  %v207_v42 = vsel %vm6527_vm9, %v198_v23, %v206_v27  ;;  %1823 = vst [vmem:[#allocation3 + $0x6c] sm:$0xf] %v6196_v26  ;;  %1824 = vst [vmem:[#allocation3 + $0x70] sm:$0xf] %v6196_v26  ;;  %v268_v6 = vrot.slane %v266_v50, 4  ;;  %v267_v8 = vsel %vm6527_vm9, %v258_v33, %v266_v50 }
  0x59   :  { %1060 = vrot.lane.b32.xlu0 %v1000_v61, %s6191_s19  ;;  %384 = vst.msk [vmem:[#allocation2 + $0x28] sm:$0xf] %vm373_vm6, %v207_v42  ;;  %v280_v61 = vshrl.u32 %v80_v29, 16  ;;  %390 = vst.msk [vmem:[#allocation2 + $0x40] sm:$0xf] %vm373_vm6, %v267_v8  ;;  %v283_v9 = vshll.u32 %v80_v29, 16  ;;  %v779_v1 = vor.u32 %v777_v58, %v6713_v36  ;;  %v496_v63 = vsel %vm6262_vm3, %v6701_v30, %v495_v55 }
  0x5a   :  { %1062 = vrot.lane.b32.xlu1 %v1001_v10, %s6191_s19  ;;  %v217_v48 = vsel %vm6527_vm9, %v208_v40, %v216_v47  ;;  %v222_v10 = vrot.slane %v220_v51, 6  ;;  %v290_v4 = vshrl.u32 %v81_v34, 16  ;;  %v277_v17 = vsel %vm6527_vm9, %v268_v6, %v276_v7  ;;  %v6827_v0 = vld [vmem:[%s9168_s0 + $0x50] sm:$0xf]  ;;  %v651_v58 = vld [vmem:[%s9168_s0 + $0x54] sm:$0xf] }
  0x5b   :  { %385 = vst.msk [vmem:[#allocation2 + $0x2c] sm:$0xf] %vm373_vm6, %v217_v48  ;;  %v282_v15 = vrot.slane %v280_v61, 6  ;;  %v293_v18 = vshll.u32 %v81_v34, 16  ;;  %v278_v23 = vrot.slane %v276_v7, 4  ;;  %v285_v38 = vrot.slane %v283_v9, 7 }
  0x5c   :  { %391 = vst.msk [vmem:[#allocation2 + $0x44] sm:$0xf] %vm373_vm6, %v277_v17  ;;  %v292_v5 = vrot.slane %v290_v4, 6  ;;  %v510_v25 = vrot.slane %v418_v12, 7  ;;  %v650_v22 = vld [vmem:[%s9168_s0 + $0x50] sm:$0xf]  ;;  %v788_v47 = vor.u32 %v786_v31, %v6484_v20  ;;  %v780_v30 = vsel %vm6282_vm5, %v772_v35, %v779_v1 }
  0x5d   :  { %921 = vrot.lane.b32.xlu0 %v6736_v13, %s6193_s17  ;;  %v225_v13 = vrot.slane %v223_v60, 7  ;;  %v295_v27 = vrot.slane %v293_v18, 7  ;;  %v286_v29 = vor.u32 %v285_v38, %v282_v15  ;;  %v781_v28 = vrot.slane %v6713_v36, 4  ;;  %v83_v35 = vld [vmem:[%s9168_s0 + $0x58] sm:$0xf] }
  0x5e   :  { %923 = vrot.lane.b32.xlu1 %v6706_v21, %s6193_s17  ;;  %v513_v53 = vrot.slane %v6827_v0, 7  ;;  %v509_v20 = vrot.slane %v507_v41, 4  ;;  %v512_v31 = vrot.slane %v510_v25, 4  ;;  %v828_v36 = vshrl.u32 %v650_v22, 16  ;;  %v1003_v7 = vld [vmem:[%s9168_s0 + $0x3c] sm:$0xf] }
  0x5f   :  { %v226_v21 = vor.u32 %v225_v13, %v222_v10  ;;  %v296_v2 = vor.u32 %v295_v27, %v292_v5  ;;  %v288_v62 = vrot.slane %v286_v29, 4  ;;  %v287_v55 = vsel %vm6527_vm9, %v278_v23, %v286_v29  ;;  %v1002_v8 = vld [vmem:[%s9168_s0 + $0x38] sm:$0xf]  ;;  %v420_v9 = vld [vmem:[%s9168_s0 + $0x54] sm:$0xf] }
  0x60   :  { %392 = vst.msk [vmem:[#allocation2 + $0x48] sm:$0xf] %vm373_vm6, %v287_v55  ;;  %v789_v41 = vsel %vm6282_vm5, %v781_v28, %v788_v47  ;;  %v837_v32 = vshrl.u32 %v651_v58, 16  ;;  %v300_v33 = vshrl.u32 %v82_v14, 16  ;;  %v840_v34 = vshll.u32 %v651_v58, 16 }
  0x61   :  { %1072 = vrot.lane.b32.xlu0 %v1006_v57, %s6191_s19  ;;  %v228_v44 = vrot.slane %v226_v21, 4  ;;  %v227_v46 = vsel %vm6527_vm9, %v218_v59, %v226_v21  ;;  %v305_v40 = vrot.slane %v303_v11, 7  ;;  %v310_v42 = vshrl.u32 %v83_v35, 16  ;;  %v652_v4 = vld [vmem:[%s9168_s0 + $0x58] sm:$0xf] }
  0x62   :  { %1074 = vrot.lane.b32.xlu1 %v1007_v52, %s6191_s19  ;;  %386 = vst.msk [vmem:[#allocation2 + $0x30] sm:$0xf] %vm373_vm6, %v227_v46  ;;  %v302_v37 = vrot.slane %v300_v33, 6  ;;  %v313_v45 = vshll.u32 %v83_v35, 16  ;;  %v514_v50 = vsel %vm6262_vm3, %v512_v31, %v513_v53  ;;  %v511_v49 = vsel %vm6262_vm3, %v509_v20, %v510_v25  ;;  %v6925_v23 = vld [vmem:[%s9168_s0 + $0x58] sm:$0xf] }
  0x63   :  { %v237_v43 = vsel %vm6527_vm9, %v228_v44, %v6780_v16  ;;  %v297_v16 = vsel %vm6527_vm9, %v288_v62, %v296_v2  ;;  %v830_v51 = vrot.slane %v828_v36, 7  ;;  %v831_v57 = vshll.u32 %v650_v22, 16  ;;  %v84_v5 = vld [vmem:[%s9168_s0 + $0x5c] sm:$0xf]  ;;  %v85_v46 = vld [vmem:[%s9168_s0 + $0x60] sm:$0xf] }
  0x64   :  { %387 = vst.msk [vmem:[#allocation2 + $0x34] sm:$0xf] %vm373_vm6, %v237_v43  ;;  %393 = vst.msk [vmem:[#allocation2 + $0x4c] sm:$0xf] %vm373_vm6, %v297_v16  ;;  %v6891_v48 = vrot.slane %v837_v32, 7  ;;  %v306_v26 = vor.u32 %v305_v40, %v302_v37  ;;  %v312_v60 = vrot.slane %v310_v42, 6 }
  0x65   :  { %554 = vrot.lane.b32.xlu0 %v493_v24, %s6192_s28  ;;  %v315_v59 = vrot.slane %v313_v45, 7  ;;  %v298_v6 = vrot.slane %v296_v2, 4  ;;  %v826_v10 = vrot.slane %v6637_v56, 4  ;;  %v833_v12 = vor.u32 %v831_v57, %v830_v51  ;;  %v653_v56 = vld [vmem:[%s9168_s0 + $0x5c] sm:$0xf] }
  0x66   :  { %556 = vrot.lane.b32.xlu1 %v496_v63, %s6192_s28  ;;  %v308_v61 = vrot.slane %v306_v26, 4  ;;  %v835_v13 = vrot.slane %v830_v51, 4  ;;  %v842_v15 = vor.u32 %v840_v34, %v6891_v48  ;;  %v516_v21 = vrot.slane %v420_v9, 7  ;;  %v1008_v58 = vld [vmem:[%s9168_s0 + $0x50] sm:$0xf] }
  0x67   :  { %v6894_v52 = vor.u32 %v315_v59, %v312_v60  ;;  %v307_v18 = vsel %vm6527_vm9, %v298_v6, %v306_v26  ;;  %v834_v0 = vsel %vm6282_vm5, %v826_v10, %v833_v12  ;;  %v846_v38 = vshrl.u32 %v652_v4, 16  ;;  %v655_v26 = vld [vmem:[%s9168_s0 + $0x64] sm:$0xf]  ;;  %v6988_v59 = vld [vmem:[%s9168_s0 + $0x60] sm:$0xf] }
  0x68   :  { %394 = vst.msk [vmem:[#allocation2 + $0x50] sm:$0xf] %vm373_vm6, %v307_v18  ;;  %v843_v24 = vsel %vm6282_vm5, %v835_v13, %v842_v15  ;;  %v855_v25 = vshrl.u32 %v653_v56, 16  ;;  %v320_v22 = vshrl.u32 %v84_v5, 16  ;;  %v323_v27 = vshll.u32 %v84_v5, 16 }
  0x69   :  { %913 = vrot.lane.b32.xlu0 %v780_v30, %s6193_s17  ;;  %v317_v17 = vsel %vm6527_vm9, %v308_v61, %v6894_v52  ;;  %v519_v1 = vrot.slane %v6925_v23, 7  ;;  %v515_v44 = vrot.slane %v513_v53, 4  ;;  %v330_v28 = vshrl.u32 %v85_v46, 16  ;;  %v1009_v30 = vld [vmem:[%s9168_s0 + $0x54] sm:$0xf] }
  0x6a   :  { %915 = vrot.lane.b32.xlu1 %v789_v41, %s6193_s17  ;;  %395 = vst.msk [vmem:[#allocation2 + $0x54] sm:$0xf] %vm373_vm6, %v317_v17  ;;  %v322_v29 = vrot.slane %v320_v22, 6  ;;  %v325_v63 = vrot.slane %v323_v27, 7  ;;  %v333_v47 = vshll.u32 %v85_v46, 16  ;;  %v518_v43 = vrot.slane %v516_v21, 4 }
  0x6b   :  { %v848_v62 = vrot.slane %v846_v38, 7  ;;  %v858_v55 = vshll.u32 %v653_v56, 16  ;;  %v849_v53 = vshll.u32 %v652_v4, 16  ;;  %v6947_v31 = vrot.slane %v855_v25, 7  ;;  %v86_v12 = vld [vmem:[%s9168_s0 + $0x64] sm:$0x7] }
  0x6c   :  { %v326_v36 = vor.u32 %v325_v63, %v322_v29  ;;  %v332_v16 = vrot.slane %v330_v28, 6  ;;  %v335_v14 = vrot.slane %v333_v47, 7  ;;  %v318_v33 = vrot.slane %v6894_v52, 4  ;;  %v1010_v4 = vld [vmem:[%s9168_s0 + $0x58] sm:$0xf] }
  0x6d   :  { %566 = vrot.lane.b32.xlu0 %v511_v49, %s6192_s28  ;;  %v520_v11 = vsel %vm6262_vm3, %v518_v43, %v519_v1  ;;  %v517_v34 = vsel %vm6262_vm3, %v515_v44, %v516_v21  ;;  %v844_v35 = vrot.slane %v6891_v48, 4  ;;  %v851_v37 = vor.u32 %v849_v53, %v848_v62  ;;  %v654_v49 = vld [vmem:[%s9168_s0 + $0x60] sm:$0xf]  ;;  %v1011_v38 = vld [vmem:[%s9168_s0 + $0x5c] sm:$0xf] }
  0x6e   :  { %568 = vrot.lane.b32.xlu1 %v514_v50, %s6192_s28  ;;  %v328_v41 = vrot.slane %v326_v36, 4  ;;  %v6951_v32 = vor.u32 %v335_v14, %v332_v16  ;;  %v853_v42 = vrot.slane %v848_v62, 4  ;;  %v860_v45 = vor.u32 %v858_v55, %v6947_v31  ;;  %v422_v50 = vld [vmem:[%s9168_s0 + $0x5c] sm:$0xf]  ;;  %v656_v44 = vld [vmem:[%s9168_s0 + $0x68] sm:$0xf] }
  0x6f   :  { %v327_v57 = vsel %vm6527_vm9, %v318_v33, %v326_v36  ;;  %v852_v60 = vsel %vm6282_vm5, %v844_v35, %v851_v37  ;;  %v522_v61 = vrot.slane %v422_v50, 7  ;;  %v864_v52 = vshrl.u32 %v654_v49, 16 }
  0x70   :  { %v337_v51 = vsel %vm6527_vm9, %v328_v41, %v6951_v32  ;;  %396 = vst.msk [vmem:[#allocation2 + $0x58] sm:$0xf] %vm373_vm6, %v327_v57  ;;  %v525_v13 = vrot.slane %v6988_v59, 7  ;;  %v340_v15 = vshrl.u32 %v86_v12, 16  ;;  %v343_v9 = vshll.u32 %v86_v12, 16  ;;  %v38_v59 = vld [vmem:[%s9170_s9 + $0x10] sm:$0xff] }
  0x71   :  { %1064 = vrot.lane.b32.xlu0 %v1002_v8, %s6191_s19  ;;  %397 = vst.msk [vmem:[#allocation2 + $0x5c] sm:$0xf] %vm373_vm6, %v337_v51  ;;  %v873_v8 = vshrl.u32 %v655_v26, 16  ;;  %v524_v17 = vrot.slane %v522_v61, 4  ;;  %v521_v18 = vrot.slane %v519_v1, 4  ;;  %v866_v56 = vrot.slane %v864_v52, 7 }
  0x72   :  { %1066 = vrot.lane.b32.xlu1 %v1003_v7, %s6191_s19  ;;  %v861_v7 = vsel %vm6282_vm5, %v853_v42, %v860_v45  ;;  %v342_v25 = vrot.slane %v340_v15, 6  ;;  %v345_v22 = vrot.slane %v343_v9, 7  ;;  %v338_v23 = vrot.slane %v6951_v32, 4  ;;  %v1012_v41 = vld [vmem:[%s9168_s0 + $0x60] sm:$0xf]  ;;  %v42_v12 = vld [vmem:[%s9170_s9 + $0x30] sm:$0xff] }
  0x73   :  { %v875_v5 = vrot.slane %v873_v8, 7  ;;  %v526_v46 = vsel %vm6262_vm3, %v524_v17, %v525_v13  ;;  %v523_v29 = vsel %vm6262_vm3, %v521_v18, %v522_v61  ;;  %v862_v63 = vrot.slane %v6947_v31, 4  ;;  %v424_v31 = vld [vmem:[%s9168_s0 + $0x64] sm:$0x7]  ;;  %v41_v15 = vld [vmem:[%s9170_s9 + $0x28] sm:$0xff]  ;;  %v43_v18 = vld [vmem:[%s9170_s9 + $0x38] sm:$0xff] }
  0x74   :  { %v1043_v2 = vpop.permute.xlu1 %1042  ;;  %v346_v1 = vor.u32 %v345_v22, %v342_v25  ;;  %v882_v43 = vshrl.u32 %v656_v44, 16  ;;  %v885_v16 = vshll.u32 %v656_v44, 16  ;;  %v527_v32 = vrot.slane %v525_v13, 4  ;;  %v40_v52 = vld [vmem:[%s9170_s9 + $0x20] sm:$0xff] }
  0x75   :  { %925 = vrot.lane.b32.xlu0 %v834_v0, %s6193_s17  ;;  %v867_v0 = vshll.u32 %v654_v49, 16  ;;  %v528_v33 = vrot.slane %v424_v31, 7  ;;  %v880_v35 = vrot.slane %v875_v5, 4  ;;  %v48_v25 = vld [vmem:[%s9170_s9 + $0x60] sm:$0xff] }
  0x76   :  { %927 = vrot.lane.b32.xlu1 %v843_v24, %s6193_s17  ;;  %v876_v24 = vshll.u32 %v655_v26, 16  ;;  %v347_v62 = vsel %vm6527_vm9, %v338_v23, %v346_v1  ;;  %v884_v36 = vrot.slane %v882_v43, 7  ;;  %v37_v26 = vld [vmem:[%s9170_s9 + $0x8] sm:$0xff]  ;;  %v50_v23 = vld [vmem:[%s9170_s9 + $0x70] sm:$0xff] }
  0x77   :  { %v531_v20 = vpop.permute.xlu0 %530  ;;  %v869_v28 = vor.u32 %v867_v0, %v866_v56  ;;  %398 = vst.msk [vmem:[#allocation2 + $0x60] sm:$0xf] %vm373_vm6, %v347_v62  ;;  %v529_v42 = vsel %vm6262_vm3, %v527_v32, %v528_v33  ;;  %v46_v0 = vld [vmem:[%s9170_s9 + $0x50] sm:$0xff]  ;;  %v53_v62 = vld [vmem:[%s9170_s9 + $0x88] sm:$0xff]  ;;  %v60_v33 = vld [vmem:[%s9170_s9 + $0xc0] sm:$0xff]  ;;  %vm4782_vm3 = vcmask 130048  }
  0x78   :  { %606 = vst.msk [vmem:[#allocation2] sm:$0xf] %vm605_vm11, %v531_v20  ;;  %v887_v37 = vor.u32 %v885_v16, %v884_v36  ;;  %v58_v36 = vld [vmem:[%s9170_s9 + $0xb0] sm:$0xff] }
  0x79   :  { %1076 = vrot.lane.b32.xlu0 %v1008_v58, %s6191_s19  ;;  %v878_v58 = vor.u32 %v876_v24, %v875_v5  ;;  %v870_v20 = vsel %vm6282_vm5, %v862_v63, %v869_v28  ;;  %v52_v63 = vld [vmem:[%s9170_s9 + $0x80] sm:$0xff] }
  0x7a   :  { %1078 = vrot.lane.b32.xlu1 %v1009_v30, %s6191_s19  ;;  %v888_v50 = vsel %vm6282_vm5, %v880_v35, %v887_v37 }
  0x7b   :  { %v533_v40 = vpop.permute.xlu0 %532 }
  0x7c   :  { %v890_v48 = vpop.permute.xlu1 %889  ;;  %607 = vst.msk [vmem:[#allocation2 + $0x4] sm:$0xf] %vm605_vm11, %v533_v40 }
  0x7d   :  { %965 = vst.msk [vmem:[#allocation2] sm:$0xf] %vm964_vm12, %v890_v48  ;;  %570 = vrot.lane.b32.xlu0 %v517_v34, %s6192_s28  ;;  %v1013_v34 = vld [vmem:[%s9168_s0 + $0x64] sm:$0xf] }
  0x7e   :  { %572 = vrot.lane.b32.xlu1 %v520_v11, %s6192_s28 }
  0x7f   :  { %v1041_v6 = vpop.permute.xlu0 %1040 }
  0x80   :  { %v892_v10 = vpop.permute.xlu1 %891  ;;  %1116 = vst.msk [vmem:[#allocation2] sm:$0xf] %vm1115_vm13, %v1041_v6 }
  0x81   :  { %966 = vst.msk [vmem:[#allocation2 + $0x4] sm:$0xf] %vm964_vm12, %v892_v10  ;;  %929 = vrot.lane.b32.xlu0 %v852_v60, %s6193_s17 }
  0x82   :  { %1117 = vst.msk [vmem:[#allocation2 + $0x4] sm:$0xf] %vm1115_vm13, %v1043_v2  ;;  %931 = vrot.lane.b32.xlu1 %v861_v7, %s6193_s17  ;;  %v871_v2 = vrot.slane %v866_v56, 4  ;;  %v39_v7 = vld [vmem:[%s9170_s9 + $0x18] sm:$0xff] }
  0x83   :  { %v535_v21 = vpop.permute.xlu0 %534 }
  0x84   :  { %v537_v27 = vpop.permute.xlu1 %536  ;;  %608 = vst.msk [vmem:[#allocation2 + $0x8] sm:$0xf] %vm605_vm11, %v535_v21  ;;  %v879_v54 = vsel %vm6282_vm5, %v871_v2, %v878_v58  ;;  %v54_v58 = vld [vmem:[%s9170_s9 + $0x90] sm:$0xff] }
  0x85   :  { %609 = vst.msk [vmem:[#allocation2 + $0xc] sm:$0xf] %vm605_vm11, %v537_v27  ;;  %1080 = vrot.lane.b32.xlu0 %v1010_v4, %s6191_s19  ;;  %v44_v4 = vld [vmem:[%s9170_s9 + $0x40] sm:$0xff]  ;;  %v47_v27 = vld [vmem:[%s9170_s9 + $0x58] sm:$0xff] }
  0x86   :  { %1082 = vrot.lane.b32.xlu1 %v1011_v38, %s6191_s19  ;;  %v45_v38 = vld [vmem:[%s9170_s9 + $0x48] sm:$0xff] }
  0x87   :  { %v894_v47 = vpop.permute.xlu0 %893 }
  0x88   :  { %v896_v55 = vpop.permute.xlu1 %895  ;;  %967 = vst.msk [vmem:[#allocation2 + $0x8] sm:$0xf] %vm964_vm12, %v894_v47  ;;  %v51_v47 = vld [vmem:[%s9170_s9 + $0x78] sm:$0xff] }
  0x89   :  { %968 = vst.msk [vmem:[#allocation2 + $0xc] sm:$0xf] %vm964_vm12, %v896_v55  ;;  %574 = vrot.lane.b32.xlu0 %v523_v29, %s6192_s28  ;;  %v6040_v53 = vld [vmem:[#allocation2] sm:$0xff]  }
  0x8a   :  { %576 = vrot.lane.b32.xlu1 %v526_v46, %s6192_s28  ;;  %5847 = vmatmul.mubr.msk.bf16.vlgmr.msra.gmra.mxu0 %vm1261_vm14, %v6040_v53  ;;  %v49_v46 = vld [vmem:[%s9170_s9 + $0x68] sm:$0xff] }
  0x8b   :  { %v1045_v30 = vpop.permute.xlu0 %1044  ;;  %5850 = vmatprep.mubr.msk.bf16.mxu0 %vm6195_vm10, %v9179_v39 }
  0x8c   :  { %v1047_v14 = vpop.permute.xlu1 %1046  ;;  %1118 = vst.msk [vmem:[#allocation2 + $0x8] sm:$0xf] %vm1115_vm13, %v1045_v30 }
  0x8d   :  { %1119 = vst.msk [vmem:[#allocation2 + $0xc] sm:$0xf] %vm1115_vm13, %v1047_v14  ;;  %933 = vrot.lane.b32.xlu0 %v870_v20, %s6193_s17  ;;  %v56_v20 = vld [vmem:[%s9170_s9 + $0xa0] sm:$0xff]  ;;  %v57_v14 = vld [vmem:[%s9170_s9 + $0xa8] sm:$0xff] }
  0x8e   :  { %935 = vrot.lane.b32.xlu1 %v879_v54, %s6193_s17  ;;  %v55_v54 = vld [vmem:[%s9170_s9 + $0x98] sm:$0xff] }
  0x8f   :  { %v539_v11 = vpop.permute.xlu0 %538 }
  0x90   :  { %v541_v40 = vpop.permute.xlu1 %540  ;;  %610 = vst.msk [vmem:[#allocation2 + $0x10] sm:$0xf] %vm605_vm11, %v539_v11 }
  0x91   :  { %611 = vst.msk [vmem:[#allocation2 + $0x14] sm:$0xf] %vm605_vm11, %v541_v40  ;;  %1084 = vrot.lane.b32.xlu0 %v1012_v41, %s6191_s19 }
  0x92   :  { %1086 = vrot.lane.b32.xlu1 %v1013_v34, %s6191_s19  ;;  %v59_v34 = vld [vmem:[%s9170_s9 + $0xb8] sm:$0xff] }
  0x93   :  { %v898_v45 = vpop.permute.xlu0 %897 }
  0x94   :  { %v900_v49 = vpop.permute.xlu1 %899  ;;  %969 = vst.msk [vmem:[#allocation2 + $0x10] sm:$0xf] %vm964_vm12, %v898_v45  ;;  %v6041_v51 = vld [vmem:[#allocation2 + $0x8] sm:$0xff]  }
  0x95   :  { %970 = vst.msk [vmem:[#allocation2 + $0x14] sm:$0xf] %vm964_vm12, %v900_v49  ;;  %578 = vrot.lane.b32.xlu0 %v529_v42, %s6192_s28  ;;  %5851 = vmatmul.mubr.msk.bf16.gmra.mxu0 %vm1261_vm14, %v6041_v51 }
  0x96   :  { %937 = vrot.lane.b32.xlu1 %v888_v50, %s6193_s17  ;;  %5854 = vmatprep.mubr.msk.bf16.mxu0 %vm6195_vm10, %v9179_v39 }
  0x97   :  { %v1049_v57 = vpop.permute.xlu0 %1048 }
  0x98   :  { %v1051_v48 = vpop.permute.xlu1 %1050  ;;  %1120 = vst.msk [vmem:[#allocation2 + $0x10] sm:$0xf] %vm1115_vm13, %v1049_v57 }
  0x99   :  { %1121 = vst.msk [vmem:[#allocation2 + $0x14] sm:$0xf] %vm1115_vm13, %v1051_v48  ;;  %1088 = vrot.lane.b32.xlu0 %v1014_v3, %s6191_s19 }
  0x9a   :  { %1439 = vperm.xlu1 %6034, %v36_v19  }
  0x9b   :  { %v543_v60 = vpop.permute.xlu0 %542 }
  0x9c   :  { %v545_v61 = vpop.permute.xlu1 %544  ;;  %612 = vst.msk [vmem:[#allocation2 + $0x18] sm:$0xf] %vm605_vm11, %v543_v60 }
  0x9d   :  { %613 = vst.msk [vmem:[#allocation2 + $0x1c] sm:$0xf] %vm605_vm11, %v545_v61  ;;  %1444 = vperm.xlu0 %6035, %v37_v26  }
  0x9e   :  { %1449 = vperm.xlu1 %6034, %v38_v59  }
  0x9f   :  { %v902_v6 = vpop.permute.xlu0 %901 }
  0xa0   :  { %v904_v8 = vpop.permute.xlu1 %903  ;;  %971 = vst.msk [vmem:[#allocation2 + $0x18] sm:$0xf] %vm964_vm12, %v902_v6  ;;  %v6042_v10 = vld [vmem:[#allocation2 + $0x10] sm:$0xff]  }
  0xa1   :  { %972 = vst.msk [vmem:[#allocation2 + $0x1c] sm:$0xf] %vm964_vm12, %v904_v8  ;;  %1459 = vperm.xlu0 %6035, %v40_v52   ;;  %5855 = vmatmul.mubr.msk.bf16.gmra.mxu0 %vm1261_vm14, %v6042_v10 }
  0xa2   :  { %1454 = vperm.xlu1 %6034, %v39_v7   ;;  %5858 = vmatprep.mubr.msk.bf16.mxu0 %vm6195_vm10, %v9179_v39 }
  0xa3   :  { %v1053_v13 = vpop.permute.xlu0 %1052 }
  0xa4   :  { %v1055_v9 = vpop.permute.xlu1 %1054  ;;  %1122 = vst.msk [vmem:[#allocation2 + $0x18] sm:$0xf] %vm1115_vm13, %v1053_v13 }
  0xa5   :  { %1123 = vst.msk [vmem:[#allocation2 + $0x1c] sm:$0xf] %vm1115_vm13, %v1055_v9  ;;  %1469 = vperm.xlu0 %6035, %v42_v12  }
  0xa6   :  { %1464 = vperm.xlu1 %6034, %v41_v15  }
  0xa7   :  { %v547_v17 = vpop.permute.xlu0 %546 }
  0xa8   :  { %v549_v56 = vpop.permute.xlu1 %548  ;;  %614 = vst.msk [vmem:[#allocation2 + $0x20] sm:$0xf] %vm605_vm11, %v547_v17 }
  0xa9   :  { %615 = vst.msk [vmem:[#allocation2 + $0x24] sm:$0xf] %vm605_vm11, %v549_v56  ;;  %1479 = vperm.xlu0 %6035, %v44_v4  }
  0xaa   :  { %1474 = vperm.xlu1 %6034, %v43_v18  }
  0xab   :  { %v906_v21 = vpop.permute.xlu0 %905 }
  0xac   :  { %v908_v5 = vpop.permute.xlu1 %907  ;;  %973 = vst.msk [vmem:[#allocation2 + $0x20] sm:$0xf] %vm964_vm12, %v906_v21  ;;  %v6043_v24 = vld [vmem:[#allocation2 + $0x18] sm:$0xff]  }
  0xad   :  { %974 = vst.msk [vmem:[#allocation2 + $0x24] sm:$0xf] %vm964_vm12, %v908_v5  ;;  %1489 = vperm.xlu0 %6035, %v46_v0   ;;  %5859 = vmatmul.mubr.msk.bf16.gmra.mxu0 %vm1261_vm14, %v6043_v24 }
  0xae   :  { %1484 = vperm.xlu1 %6034, %v45_v38   ;;  %5862 = vmatprep.mubr.msk.bf16.mxu0 %vm6195_vm10, %v9179_v39 }
  0xaf   :  { %v559_v22 = vpop.permute.xlu0 %558 }
  0xb0   :  { %v561_v44 = vpop.permute.xlu1 %560  ;;  %620 = vst.msk [vmem:[#allocation2 + $0x38] sm:$0xf] %vm605_vm11, %v559_v22 }
  0xb1   :  { %621 = vst.msk [vmem:[#allocation2 + $0x3c] sm:$0xf] %vm605_vm11, %v561_v44  ;;  %1499 = vperm.xlu0 %6035, %v48_v25  }
  0xb2   :  { %1494 = vperm.xlu1 %6034, %v47_v27  }
  0xb3   :  { %v1057_v1 = vpop.permute.xlu0 %1056 }
  0xb4   :  { %v1059_v29 = vpop.permute.xlu1 %1058  ;;  %1124 = vst.msk [vmem:[#allocation2 + $0x20] sm:$0xf] %vm1115_vm13, %v1057_v1 }
  0xb5   :  { %1125 = vst.msk [vmem:[#allocation2 + $0x24] sm:$0xf] %vm1115_vm13, %v1059_v29  ;;  %1509 = vperm.xlu0 %6035, %v50_v23  }
  0xb6   :  { %1504 = vperm.xlu1 %6034, %v49_v46  }
  0xb7   :  { %v918_v28 = vpop.permute.xlu0 %917 }
  0xb8   :  { %v920_v2 = vpop.permute.xlu1 %919  ;;  %979 = vst.msk [vmem:[#allocation2 + $0x38] sm:$0xf] %vm964_vm12, %v918_v28 }
  0xb9   :  { %980 = vst.msk [vmem:[#allocation2 + $0x3c] sm:$0xf] %vm964_vm12, %v920_v2  ;;  %1519 = vperm.xlu0 %6035, %v52_v63  }
  0xba   :  { %1514 = vperm.xlu1 %6034, %v51_v47  }
  0xbb   :  { %v1069_v43 = vpop.permute.xlu0 %1068 }
  0xbc   :  { %v1071_v55 = vpop.permute.xlu1 %1070  ;;  %1130 = vst.msk [vmem:[#allocation2 + $0x38] sm:$0xf] %vm1115_vm13, %v1069_v43  ;;  %v6044_v53 = vld [vmem:[#allocation2 + $0x20] sm:$0xff]  }
  0xbd   :  { %1131 = vst.msk [vmem:[#allocation2 + $0x3c] sm:$0xf] %vm1115_vm13, %v1071_v55  ;;  %1529 = vperm.xlu0 %6035, %v54_v58   ;;  %5863 = vmatmul.mubr.msk.bf16.gmra.mxu0 %vm1261_vm14, %v6044_v53 }
  0xbe   :  { %1524 = vperm.xlu1 %6034, %v53_v62   ;;  %5866 = vmatprep.mubr.msk.bf16.mxu0 %vm6195_vm10, %v9179_v39 }
  0xbf   :  { %v551_v30 = vpop.permute.xlu0 %550 }
  0xc0   :  { %v553_v31 = vpop.permute.xlu1 %552  ;;  %616 = vst.msk [vmem:[#allocation2 + $0x28] sm:$0xf] %vm605_vm11, %v551_v30 }
  0xc1   :  { %617 = vst.msk [vmem:[#allocation2 + $0x2c] sm:$0xf] %vm605_vm11, %v553_v31  ;;  %1539 = vperm.xlu0 %6035, %v56_v20  }
  0xc2   :  { %1534 = vperm.xlu1 %6034, %v55_v54  }
  0xc3   :  { %v910_v16 = vpop.permute.xlu0 %909 }
  0xc4   :  { %v912_v41 = vpop.permute.xlu1 %911  ;;  %975 = vst.msk [vmem:[#allocation2 + $0x28] sm:$0xf] %vm964_vm12, %v910_v16  ;;  %v6045_v32 = vld [vmem:[#allocation2 + $0x38] sm:$0xff]  }
  0xc5   :  { %976 = vst.msk [vmem:[#allocation2 + $0x2c] sm:$0xf] %vm964_vm12, %v912_v41  ;;  %1549 = vperm.xlu0 %6035, %v58_v36   ;;  %5875 = vmatmul.mubr.msk.bf16.vlgmr.msra.gmra.mxu1 %vm1261_vm14, %v6045_v32  ;;  %v6053_v41 = vld [vmem:[%s9171_s2 + $0xf8] sm:$0xff]  }
  0xc6   :  { %1544 = vperm.xlu1 %6034, %v57_v14   ;;  %5878 = vmatprep.mubr.msk.bf16.mxu1 %vm6195_vm10, %v9179_v39 }
  0xc7   :  { %v563_v11 = vpop.permute.xlu0 %562  ;;  %5427 = vmatprep.subr.bf16.mxu1 %v6053_v41 }
  0xc8   :  { %v565_v35 = vpop.permute.xlu1 %564  ;;  %622 = vst.msk [vmem:[#allocation2 + $0x40] sm:$0xf] %vm605_vm11, %v563_v11 }
  0xc9   :  { %623 = vst.msk [vmem:[#allocation2 + $0x44] sm:$0xf] %vm605_vm11, %v565_v35  ;;  %1559 = vperm.xlu0 %6035, %v60_v33   ;;  %v6054_v33 = vld [vmem:[%s9171_s2 + $0xb8] sm:$0xff]  }
  0xca   :  { %1554 = vperm.xlu1 %6034, %v59_v34   ;;  %5428 = vmatpush3.bf16.msra.mxu1 %v6054_v33  ;;  %v6055_v34 = vld [vmem:[%s9171_s2 + $0xf0] sm:$0xff]  }
  0xcb   :  { %v1061_v37 = vpop.permute.xlu0 %1060  ;;  %5429 = vmatprep.subr.bf16.mxu1 %v6055_v34 }
  0xcc   :  { %v1063_v40 = vpop.permute.xlu1 %1062  ;;  %1126 = vst.msk [vmem:[#allocation2 + $0x28] sm:$0xf] %vm1115_vm13, %v1061_v37  ;;  %v6056_v37 = vld [vmem:[%s9171_s2 + $0xb0] sm:$0xff]  }
  0xcd   :  { %1127 = vst.msk [vmem:[#allocation2 + $0x2c] sm:$0xf] %vm1115_vm13, %v1063_v40 }
  0xce   :  { %5430 = vmatpush3.bf16.msra.mxu1 %v6056_v37  ;;  %v6084_v37 = vld [vmem:[%s9171_s2 + $0x48] sm:$0xff]  }
  0xcf   :  { %v922_v42 = vpop.permute.xlu0 %921 }
  0xd0   :  { %v924_v45 = vpop.permute.xlu1 %923  ;;  %981 = vst.msk [vmem:[#allocation2 + $0x40] sm:$0xf] %vm964_vm12, %v922_v42  ;;  %v6057_v42 = vld [vmem:[%s9171_s2 + $0xe8] sm:$0xff]  }
  0xd1   :  { %982 = vst.msk [vmem:[#allocation2 + $0x44] sm:$0xf] %vm964_vm12, %v924_v45  ;;  %v6062_v45 = vld [vmem:[%s9171_s2 + $0x78] sm:$0xff]   ;;  %5431 = vmatprep.subr.bf16.mxu1 %v6057_v42 }
  0xd2   :  { %5521 = vmatprep.subr.bf16.mxu0 %v6062_v45 }
  0xd3   :  { %v1073_v50 = vpop.permute.xlu0 %1072 }
  0xd4   :  { %v1075_v49 = vpop.permute.xlu1 %1074  ;;  %1132 = vst.msk [vmem:[#allocation2 + $0x40] sm:$0xf] %vm1115_vm13, %v1073_v50  ;;  %v6046_v51 = vld [vmem:[#allocation2 + $0x28] sm:$0xff]  }
  0xd5   :  { %1133 = vst.msk [vmem:[#allocation2 + $0x44] sm:$0xf] %vm1115_vm13, %v1075_v49  ;;  %5867 = vmatmul.mubr.msk.bf16.gmra.mxu0 %vm1261_vm14, %v6046_v51  ;;  %v6058_v49 = vld [vmem:[%s9171_s2 + $0xa8] sm:$0xff]   ;;  %v6064_v51 = vld [vmem:[%s9171_s2 + $0x38] sm:$0xff]  }
  0xd6   :  { %5870 = vmatprep.mubr.msk.bf16.mxu0 %vm6195_vm10, %v9179_v39  ;;  %5432 = vmatpush3.bf16.msra.mxu1 %v6058_v49 }
  0xd7   :  { %v555_v3 = vpop.permute.xlu0 %554  ;;  %5522 = vmatpush3.bf16.msra.mxu0 %v6064_v51 }
  0xd8   :  { %v557_v57 = vpop.permute.xlu1 %556  ;;  %618 = vst.msk [vmem:[#allocation2 + $0x30] sm:$0xf] %vm605_vm11, %v555_v3 }
  0xd9   :  { %619 = vst.msk [vmem:[#allocation2 + $0x34] sm:$0xf] %vm605_vm11, %v557_v57  ;;  %v6065_v57 = vld [vmem:[%s9171_s2 + $0x70] sm:$0xff]  }
  0xda   :  { %5523 = vmatprep.subr.bf16.mxu0 %v6065_v57  ;;  %v6087_v57 = vld [vmem:[%s9171_s2 + $0x8] sm:$0xff]  }
  0xdb   :  { %v914_v19 = vpop.permute.xlu0 %913 }
  0xdc   :  { %v916_v48 = vpop.permute.xlu1 %915  ;;  %977 = vst.msk [vmem:[#allocation2 + $0x30] sm:$0xf] %vm964_vm12, %v914_v19  ;;  %v6047_v26 = vld [vmem:[#allocation2 + $0x40] sm:$0xff]  }
  0xdd   :  { %978 = vst.msk [vmem:[#allocation2 + $0x34] sm:$0xf] %vm964_vm12, %v916_v48  ;;  %5879 = vmatmul.mubr.msk.bf16.gmra.mxu1 %vm1261_vm14, %v6047_v26  ;;  %v6059_v19 = vld [vmem:[%s9171_s2 + $0xe0] sm:$0xff]  }
  0xde   :  { %5882 = vmatprep.mubr.msk.bf16.mxu1 %vm6195_vm10, %v9179_v39  ;;  %v6060_v26 = vld [vmem:[%s9171_s2 + $0xa0] sm:$0xff]   ;;  %5433 = vmatprep.subr.bf16.mxu1 %v6059_v19 }
  0xdf   :  { %v567_v60 = vpop.permute.xlu0 %566  ;;  %5434 = vmatpush3.bf16.msra.mxu1 %v6060_v26  ;;  %v6085_v26 = vld [vmem:[%s9171_s2 + $0x178] sm:$0xff]  }
  0xe0   :  { %v569_v59 = vpop.permute.xlu1 %568  ;;  %624 = vst.msk [vmem:[#allocation2 + $0x48] sm:$0xf] %vm605_vm11, %v567_v60  ;;  %v6066_v60 = vld [vmem:[%s9171_s2 + $0x30] sm:$0xff]  }
  0xe1   :  { %625 = vst.msk [vmem:[#allocation2 + $0x4c] sm:$0xf] %vm605_vm11, %v569_v59  ;;  %v6069_v59 = vld [vmem:[%s9171_s2 + $0x68] sm:$0xff]   ;;  %5524 = vmatpush3.bf16.msra.mxu0 %v6066_v60 }
  0xe2   :  { %5525 = vmatprep.subr.bf16.mxu0 %v6069_v59 }
  0xe3   :  { %v1065_v61 = vpop.permute.xlu0 %1064 }
  0xe4   :  { %v1067_v52 = vpop.permute.xlu1 %1066  ;;  %1128 = vst.msk [vmem:[#allocation2 + $0x30] sm:$0xf] %vm1115_vm13, %v1065_v61  ;;  %v6061_v61 = vld [vmem:[%s9171_s2 + $0xd8] sm:$0xff]  }
  0xe5   :  { %1129 = vst.msk [vmem:[#allocation2 + $0x34] sm:$0xf] %vm1115_vm13, %v1067_v52  ;;  %v6063_v52 = vld [vmem:[%s9171_s2 + $0x98] sm:$0xff]   ;;  %5435 = vmatprep.subr.bf16.mxu1 %v6061_v61 }
  0xe6   :  { %5436 = vmatpush3.bf16.msra.mxu1 %v6063_v52 }
  0xe7   :  { %v926_v6 = vpop.permute.xlu0 %925 }
  0xe8   :  { %v928_v7 = vpop.permute.xlu1 %927  ;;  %983 = vst.msk [vmem:[#allocation2 + $0x48] sm:$0xf] %vm964_vm12, %v926_v6 }
  0xe9   :  { %984 = vst.msk [vmem:[#allocation2 + $0x4c] sm:$0xf] %vm964_vm12, %v928_v7  ;;  %v6067_v7 = vld [vmem:[%s9171_s2 + $0xd0] sm:$0xff]  }
  0xea   :  { %5437 = vmatprep.subr.bf16.mxu1 %v6067_v7 }
  0xeb   :  { %v1077_v8 = vpop.permute.xlu0 %1076 }
  0xec   :  { %v1079_v10 = vpop.permute.xlu1 %1078  ;;  %1134 = vst.msk [vmem:[#allocation2 + $0x48] sm:$0xf] %vm1115_vm13, %v1077_v8  ;;  %v6048_v12 = vld [vmem:[#allocation2 + $0x30] sm:$0xff]   ;;  %v6070_v8 = vld [vmem:[%s9171_s2 + $0x28] sm:$0xff]  }
  0xed   :  { %1135 = vst.msk [vmem:[#allocation2 + $0x4c] sm:$0xf] %vm1115_vm13, %v1079_v10  ;;  %5871 = vmatmul.mubr.msk.bf16.gmra.mxu0 %vm1261_vm14, %v6048_v12  ;;  %v6068_v10 = vld [vmem:[%s9171_s2 + $0x90] sm:$0xff]   ;;  %v6072_v12 = vld [vmem:[%s9171_s2 + $0x60] sm:$0xff]  }
  0xee   :  { %5526 = vmatpush3.bf16.msra.mxu0 %v6070_v8  ;;  %5438 = vmatpush3.bf16.msra.mxu1 %v6068_v10 }
  0xef   :  { %v571_v13 = vpop.permute.xlu0 %570  ;;  %5527 = vmatprep.subr.bf16.mxu0 %v6072_v12 }
  0xf0   :  { %v573_v15 = vpop.permute.xlu1 %572  ;;  %626 = vst.msk [vmem:[#allocation2 + $0x50] sm:$0xf] %vm605_vm11, %v571_v13 }
  0xf1   :  { %627 = vst.msk [vmem:[#allocation2 + $0x54] sm:$0xf] %vm605_vm11, %v573_v15  ;;  %v6071_v15 = vld [vmem:[%s9171_s2 + $0xc8] sm:$0xff]  }
  0xf2   :  { %5439 = vmatprep.subr.bf16.mxu1 %v6071_v15 }
  0xf3   :  { %v930_v9 = vpop.permute.xlu0 %929 }
  0xf4   :  { %v932_v4 = vpop.permute.xlu1 %931  ;;  %985 = vst.msk [vmem:[#allocation2 + $0x50] sm:$0xf] %vm964_vm12, %v930_v9  ;;  %v6049_v17 = vld [vmem:[#allocation2 + $0x48] sm:$0xff]  }
  0xf5   :  { %986 = vst.msk [vmem:[#allocation2 + $0x54] sm:$0xf] %vm964_vm12, %v932_v4  ;;  %5883 = vmatmul.mubr.msk.bf16.gmra.mxu1 %vm1261_vm14, %v6049_v17  ;;  %v6073_v9 = vld [vmem:[%s9171_s2 + $0x88] sm:$0xff]   ;;  %v6074_v4 = vld [vmem:[%s9171_s2 + $0x20] sm:$0xff]  }
  0xf6   :  { %5886 = vmatprep.mubr.msk.bf16.mxu1 %vm6195_vm10, %v9179_v39  ;;  %5528 = vmatpush3.bf16.msra.mxu0 %v6074_v4 }
  0xf7   :  { %v1081_v18 = vpop.permute.xlu0 %1080  ;;  %5440 = vmatpush3.bf16.msra.mxu1 %v6073_v9 }
  0xf8   :  { %v1083_v56 = vpop.permute.xlu1 %1082  ;;  %1136 = vst.msk [vmem:[#allocation2 + $0x50] sm:$0xf] %vm1115_vm13, %v1081_v18  ;;  %v6075_v18 = vld [vmem:[%s9171_s2 + $0x58] sm:$0xff]  }
  0xf9   :  { %1137 = vst.msk [vmem:[#allocation2 + $0x54] sm:$0xf] %vm1115_vm13, %v1083_v56  ;;  %v6076_v56 = vld [vmem:[%s9171_s2 + $0x18] sm:$0xff]   ;;  %5529 = vmatprep.subr.bf16.mxu0 %v6075_v18 }
  0xfa   :  { %5530 = vmatpush3.bf16.msra.mxu0 %v6076_v56  ;;  %v6092_v56 = vld [vmem:[%s9171_s2 + $0x40] sm:$0xff]  }
  0xfb   :  { %v575_v0 = vpop.permute.xlu0 %574 }
  0xfc   :  { %v577_v21 = vpop.permute.xlu1 %576  ;;  %628 = vst.msk [vmem:[#allocation2 + $0x58] sm:$0xf] %vm605_vm11, %v575_v0 }
  0xfd   :  { %629 = vst.msk [vmem:[#allocation2 + $0x5c] sm:$0xf] %vm605_vm11, %v577_v21 }
  0xff   :  { %v934_v38 = vpop.permute.xlu0 %933 }
 0x100   :  { %v936_v5 = vpop.permute.xlu1 %935  ;;  %987 = vst.msk [vmem:[#allocation2 + $0x58] sm:$0xf] %vm964_vm12, %v934_v38  ;;  %v6050_v24 = vld [vmem:[#allocation2 + $0x50] sm:$0xff]  }
 0x101   :  { %988 = vst.msk [vmem:[#allocation2 + $0x5c] sm:$0xf] %vm964_vm12, %v936_v5  ;;  %5887 = vmatmul.mubr.msk.bf16.gmra.mxu1 %vm1261_vm14, %v6050_v24  ;;  %v6077_v5 = vld [vmem:[%s9171_s2 + $0xc0] sm:$0xff]  }
 0x102   :  { %5890 = vmatprep.mubr.msk.bf16.mxu1 %vm6195_vm10, %v9179_v39  ;;  %5441 = vmatprep.subr.bf16.mxu1 %v6077_v5 }
 0x103   :  { %v1085_v25 = vpop.permute.xlu0 %1084 }
 0x104   :  { %v1087_v22 = vpop.permute.xlu1 %1086  ;;  %1138 = vst.msk [vmem:[#allocation2 + $0x58] sm:$0xf] %vm1115_vm13, %v1085_v25 }
 0x105   :  { %1139 = vst.msk [vmem:[#allocation2 + $0x5c] sm:$0xf] %vm1115_vm13, %v1087_v22 }
 0x107   :  { %v579_v27 = vpop.permute.xlu0 %578 }
 0x108   :  { %630 = vst.msk [vmem:[#allocation2 + $0x60] sm:$0xf] %vm605_vm11, %v579_v27  ;;  %v938_v44 = vpop.permute.xlu1 %937 }
 0x109   :  { %989 = vst.msk [vmem:[#allocation2 + $0x60] sm:$0xf] %vm964_vm12, %v938_v44  ;;  %v6079_v44 = vld [vmem:[%s9171_s2 + $0x50] sm:$0xff]  }
 0x10a   :  { %5531 = vmatprep.subr.bf16.mxu0 %v6079_v44 }
 0x10b   :  { %v1089_v23 = vpop.permute.xlu0 %1088 }
 0x10c   :  { %1140 = vst.msk [vmem:[#allocation2 + $0x60] sm:$0xf] %vm1115_vm13, %v1089_v23  ;;  %v6051_v1 = vld [vmem:[#allocation2 + $0x58] sm:$0xff]  }
 0x10d   :  { %5891 = vmatmul.mubr.msk.bf16.gmra.mxu1 %vm1261_vm14, %v6051_v1  ;;  %v6078_v1 = vld [vmem:[%s9171_s2 + $0x80] sm:$0xff]  }
 0x10e   :  { %5894 = vmatprep.mubr.msk.bf16.mxu1 %vm6195_vm10, %v9179_v39  ;;  %5442 = vmatpush3.bf16.msra.mxu1 %v6078_v1 }
 0x10f   :  { %5615 = vmatprep.subr.bf16.mxu1 %v6085_v26 }
 0x113   :  { %v6052_v46 = vld [vmem:[#allocation2 + $0x60] ss:$0 sps:$4 sm:$0xff]  }
 0x115   :  { %5895 = vmatmul.mubr.msk.bf16.gmra.mxu1 %vm1261_vm14, %v6052_v46  ;;  %v7300_v6 = vpop.permute.xlu1 %1439  ;;  %v6080_v46 = vld [vmem:[%s9171_s2 + $0x10] sm:$0xff]  }
 0x116   :  { %5532 = vmatpush3.bf16.msra.mxu0 %v6080_v46 }
 0x117   :  { %5533 = vmatprep.subr.bf16.mxu0 %v6084_v37 }
 0x118   :  { %v7333_v0 = vpop.permute.xlu0 %1444 }
 0x119   :  { %v7314_v13 = vpop.permute.xlu1 %1449 }
 0x11a   :  { %5534 = vmatpush3.bf16.msra.mxu0 %v6087_v57 }
 0x11b   :  { %5535 = vmatprep.subr.bf16.mxu0 %v6092_v56 }
 0x11d   :  { %v7344_v22 = vpop.permute.xlu1 %1454 }
 0x14a   :  { %v7231_v29 = vpop.f32.mrf.mxu0 }
 0x14b   :  { %v1617_v24 = vmul.f32 %v7231_v29, %v7231_v29 }
 0x14c   :  { %v5848_v63 = vpop.f32.mrf.mxu0 }
 0x14e   :  { %v7233_v28 = vpop.f32.mrf.mxu0 }
 0x14f   :  { %v1618_v21 = vmul.f32 %v7233_v28, %v7233_v28  ;;  %v1563_v23 = vmul.f32 %v7333_v0, %v7233_v28 }
 0x150   :  { %v5849_v47 = vpop.f32.mrf.mxu0 }
 0x151   :  { %v1643_v63 = vmul.f32 %v1618_v21, %v7333_v0  ;;  %v6093_v21 = vld [vmem:[%s9171_s2] sm:$0xff]  }
 0x152   :  { %5536 = vmatpush3.bf16.msra.mxu0 %v6093_v21 }
 0x155   :  { %v7235_v2 = vpop.f32.mrf.mxu0 }
 0x156   :  { %v1619_v25 = vmul.f32 %v7235_v2, %v7235_v2 }
 0x157   :  { %v5852_v58 = vpop.f32.mrf.mxu0 }
 0x158   :  { %v7362_v58 = vpop.permute.xlu0 %1459 }
 0x159   :  { %v7237_v43 = vpop.f32.mrf.mxu0 }
 0x15a   :  { %v1620_v47 = vmul.f32 %v7237_v43, %v7237_v43 }
 0x15b   :  { %v5853_v62 = vpop.f32.mrf.mxu0 }
 0x15c   :  { %v1645_v45 = vmul.f32 %v1620_v47, %v7344_v22  ;;  %v7384_v49 = vpop.permute.xlu0 %1469 }
 0x160   :  { %v7406_v4 = vpop.permute.xlu0 %1479 }
 0x161   :  { %v7239_v55 = vpop.f32.mrf.mxu0 }
 0x162   :  { %v1621_v41 = vmul.f32 %v7239_v55, %v7239_v55 }
 0x163   :  { %v5856_v53 = vpop.f32.mrf.mxu0 }
 0x164   :  { %v1562_v53 = vmul.f32 %v7300_v6, %v7231_v29  ;;  %v1646_v59 = vmul.f32 %v1621_v41, %v7362_v58 }
 0x165   :  { %v7241_v20 = vpop.f32.mrf.mxu0 }
 0x166   :  { %v1587_v34 = vadd.f32 %v1563_v23, %v1562_v53 }
 0x167   :  { %v5857_v30 = vpop.f32.mrf.mxu0 }
 0x168   :  { %v1564_v30 = vmul.f32 %v7314_v13, %v7235_v2 }
 0x16a   :  { %v1588_v19 = vadd.f32 %v1587_v34, %v1564_v30 }
 0x16d   :  { %v7243_v54 = vpop.f32.mrf.mxu0 }
 0x16e   :  { %v1623_v61 = vmul.f32 %v7243_v54, %v7243_v54  ;;  %v1568_v5 = vmul.f32 %v7384_v49, %v7243_v54 }
 0x16f   :  { %v5860_v31 = vpop.f32.mrf.mxu0 }
 0x170   :  { %v1642_v31 = vmul.f32 %v1617_v24, %v7300_v6 }
 0x171   :  { %v7245_v36 = vpop.f32.mrf.mxu0 }
 0x172   :  { %v1667_v42 = vadd.f32 %v1643_v63, %v1642_v31  ;;  %v1624_v9 = vmul.f32 %v7245_v36, %v7245_v36 }
 0x173   :  { %v5861_v16 = vpop.f32.mrf.mxu0 }
 0x174   :  { %v1644_v16 = vmul.f32 %v1619_v25, %v7314_v13  ;;  %v1648_v25 = vmul.f32 %v1623_v61, %v7384_v49 }
 0x176   :  { %v1668_v60 = vadd.f32 %v1667_v42, %v1644_v16  ;;  %v7428_v16 = vpop.permute.xlu0 %1489 }
 0x177   :  { %9241 = vst [vmem:[#allocation4_spill] sm:$0xff] %v7428_v16 }
 0x178   :  { %v1669_v12 = vadd.f32 %v1668_v60, %v1645_v45 }
 0x17a   :  { %v1670_v24 = vadd.f32 %v1669_v12, %v1646_v59 }
 0x17d   :  { %v7247_v14 = vpop.f32.mrf.mxu0 }
 0x17e   :  { %v1625_v23 = vmul.f32 %v7247_v14, %v7247_v14  ;;  %v1570_v30 = vmul.f32 %v7406_v4, %v7247_v14 }
 0x17f   :  { %v5864_v32 = vpop.f32.mrf.mxu0 }
 0x180   :  { %v7372_v32 = vpop.permute.xlu1 %1464  ;;  %v1650_v41 = vmul.f32 %v1625_v23, %v7406_v4 }
 0x181   :  { %v7255_v11 = vpop.f32.mrf.mxu0  ;;  %v1567_v10 = vmul.f32 %v7372_v32, %v7241_v20 }
 0x183   :  { %v5865_v35 = vpop.f32.mrf.mxu0 }
 0x184   :  { %v1565_v35 = vmul.f32 %v7344_v22, %v7237_v43  ;;  %v7397_v52 = vpop.permute.xlu1 %1474 }
 0x185   :  { %v7263_v40 = vpop.f32.mrf.mxu1  ;;  %v1569_v46 = vmul.f32 %v7397_v52, %v7245_v36  ;;  %v1649_v47 = vmul.f32 %v1624_v9, %v7397_v52 }
 0x186   :  { %v1589_v8 = vadd.f32 %v1588_v19, %v1565_v35 }
 0x187   :  { %v5876_v50 = vpop.f32.mrf.mxu1 }
 0x188   :  { %v1622_v50 = vmul.f32 %v7241_v20, %v7241_v20  ;;  %v7417_v44 = vpop.permute.xlu1 %1484 }
 0x189   :  { %v7277_v3 = vpop.f32.mrf.mxu1  ;;  %v1571_v37 = vmul.f32 %v7417_v44, %v7255_v11 }
 0x18a   :  { %v1647_v15 = vmul.f32 %v1622_v50, %v7372_v32 }
 0x18b   :  { %v5877_v48 = vpop.f32.mrf.mxu1 }
 0x18c   :  { %v1566_v48 = vmul.f32 %v7362_v58, %v7239_v55  ;;  %v1671_v63 = vadd.f32 %v1670_v24, %v1647_v15  ;;  %v7435_v45 = vpop.permute.xlu1 %1494 }
 0x18d   :  { %9242 = vst [vmem:[#allocation5_spill] sm:$0xff] %v7435_v45 }
 0x18e   :  { %v1672_v31 = vadd.f32 %v1671_v63, %v1648_v25 }
 0x190   :  { %v1673_v42 = vadd.f32 %v1672_v31, %v1649_v47  ;;  %v7454_v21 = vpop.permute.xlu1 %1504 }
 0x191   :  { %9244 = vst [vmem:[#allocation7_spill] sm:$0xff] %v7454_v21 }
 0x195   :  { %v7325_v17 = vpop.f32.mrf.mxu0 }
 0x196   :  { %v1627_v34 = vmul.f32 %v7325_v17, %v7325_v17  ;;  %v1572_v19 = vmul.f32 %v7428_v16, %v7325_v17 }
 0x197   :  { %v5868_v38 = vpop.f32.mrf.mxu0 }
 0x198   :  { %v1590_v38 = vadd.f32 %v1589_v8, %v1566_v48  ;;  %v1674_v48 = vadd.f32 %v1673_v42, %v1650_v41  ;;  %v1652_v26 = vmul.f32 %v1627_v34, %v7428_v16 }
 0x199   :  { %v7346_v27 = vpop.f32.mrf.mxu0 }
 0x19a   :  { %v1591_v1 = vadd.f32 %v1590_v38, %v1567_v10  ;;  %v1573_v61 = vmul.f32 %v7435_v45, %v7346_v27  ;;  %v7449_v10 = vpop.permute.xlu0 %1499 }
 0x19b   :  { %v5869_v62 = vpop.f32.mrf.mxu0  ;;  %9243 = vst [vmem:[#allocation6_spill] sm:$0xff] %v7449_v10 }
 0x19c   :  { %v1626_v62 = vmul.f32 %v7255_v11, %v7255_v11  ;;  %v1592_v53 = vadd.f32 %v1591_v1, %v1568_v5 }
 0x19d   :  { %v7374_v33 = vpop.f32.mrf.mxu1 }
 0x19e   :  { %v1593_v35 = vadd.f32 %v1592_v53, %v1569_v46  ;;  %v1651_v50 = vmul.f32 %v1626_v62, %v7417_v44  ;;  %v7464_v53 = vpop.permute.xlu0 %1509 }
 0x19f   :  { %v5880_v51 = vpop.f32.mrf.mxu1  ;;  %9245 = vst [vmem:[#allocation8_spill] sm:$0xff] %v7464_v53  ;;  %v1576_v42 = vmul.f32 %v7464_v53, %v7263_v40 }
 0x1a0   :  { %v1628_v51 = vmul.f32 %v7346_v27, %v7346_v27  ;;  %v1594_v57 = vadd.f32 %v1593_v35, %v1570_v30  ;;  %v1675_v12 = vadd.f32 %v1674_v48, %v1651_v50  ;;  %v1631_v30 = vmul.f32 %v7263_v40, %v7263_v40 }
 0x1a1   :  { %v7399_v7 = vpop.f32.mrf.mxu1 }
 0x1a2   :  { %v1595_v59 = vadd.f32 %v1594_v57, %v1571_v37  ;;  %v1653_v15 = vmul.f32 %v1628_v51, %v7435_v45  ;;  %v1676_v38 = vadd.f32 %v1675_v12, %v1652_v26  ;;  %v1656_v50 = vmul.f32 %v1631_v30, %v7464_v53  ;;  %v7473_v51 = vpop.permute.xlu1 %1514  ;;  %v7482_v12 = vpop.permute.xlu0 %1519 }
 0x1a3   :  { %v5881_v18 = vpop.f32.mrf.mxu1  ;;  %v1632_v57 = vmul.f32 %v7277_v3, %v7277_v3 }
 0x1a4   :  { %v1596_v18 = vadd.f32 %v1595_v59, %v1572_v19  ;;  %v1677_v46 = vadd.f32 %v1676_v38, %v1653_v15  ;;  %v1633_v15 = vmul.f32 %v7374_v33, %v7374_v33  ;;  %v1578_v38 = vmul.f32 %v7482_v12, %v7374_v33 }
 0x1a6   :  { %v1597_v25 = vadd.f32 %v1596_v18, %v1573_v61  ;;  %v1577_v61 = vmul.f32 %v7473_v51, %v7277_v3  ;;  %v7486_v18 = vpop.permute.xlu1 %1524 }
 0x1aa   :  { %v7499_v30 = vpop.permute.xlu1 %1534 }
 0x1ab   :  { %9247 = vst [vmem:[#allocation10_spill] sm:$0xff] %v7499_v30 }
 0x1ad   :  { %v7443_v60 = vpop.f32.mrf.mxu0 }
 0x1ae   :  { %v1629_v8 = vmul.f32 %v7443_v60, %v7443_v60  ;;  %v1574_v56 = vmul.f32 %v7449_v10, %v7443_v60 }
 0x1af   :  { %v5872_v9 = vpop.f32.mrf.mxu0 }
 0x1b0   :  { %v1654_v5 = vmul.f32 %v1629_v8, %v7449_v10  ;;  %v1598_v47 = vadd.f32 %v1597_v25, %v1574_v56  ;;  %v1657_v8 = vmul.f32 %v1632_v57, %v7473_v51  ;;  %v1634_v25 = vmul.f32 %v7399_v7, %v7399_v7 }
 0x1b1   :  { %v7457_v24 = vpop.f32.mrf.mxu0 }
 0x1b2   :  { %v1575_v23 = vmul.f32 %v7454_v21, %v7457_v24  ;;  %v1630_v1 = vmul.f32 %v7457_v24, %v7457_v24  ;;  %v1678_v31 = vadd.f32 %v1677_v46, %v1654_v5  ;;  %v1658_v5 = vmul.f32 %v1633_v15, %v7482_v12  ;;  %v7495_v46 = vpop.permute.xlu0 %1529  ;;  %v7515_v15 = vpop.permute.xlu1 %1544 }
 0x1b3   :  { %v5873_v63 = vpop.f32.mrf.mxu0  ;;  %9246 = vst [vmem:[#allocation9_spill] sm:$0xff] %v7495_v46  ;;  %9250 = vst [vmem:[#allocation13_spill] sm:$0xff] %v7515_v15 }
 0x1b4   :  { %v1655_v62 = vmul.f32 %v1630_v1, %v7454_v21  ;;  %v1599_v34 = vadd.f32 %v1598_v47, %v1575_v23 }
 0x1b5   :  { %v7468_v41 = vpop.f32.mrf.mxu1 }
 0x1b6   :  { %v1679_v35 = vadd.f32 %v1678_v31, %v1655_v62  ;;  %v1600_v48 = vadd.f32 %v1599_v34, %v1576_v42  ;;  %v1579_v62 = vmul.f32 %v7486_v18, %v7399_v7  ;;  %v1659_v31 = vmul.f32 %v1634_v25, %v7486_v18 }
 0x1b7   :  { %v5884_v37 = vpop.f32.mrf.mxu1  ;;  %v1635_v34 = vmul.f32 %v7468_v41, %v7468_v41  ;;  %v1580_v57 = vmul.f32 %v7495_v46, %v7468_v41 }
 0x1b8   :  { %v1680_v26 = vadd.f32 %v1679_v35, %v1656_v50  ;;  %v1601_v9 = vadd.f32 %v1600_v48, %v1577_v61  ;;  %v7508_v48 = vpop.permute.xlu0 %1539 }
 0x1b9   :  { %v7477_v19 = vpop.f32.mrf.mxu1  ;;  %9249 = vst [vmem:[#allocation12_spill] sm:$0xff] %v7508_v48 }
 0x1ba   :  { %v1681_v56 = vadd.f32 %v1680_v26, %v1657_v8  ;;  %v1602_v1 = vadd.f32 %v1601_v9, %v1578_v38  ;;  %v1660_v26 = vmul.f32 %v1635_v34, %v7495_v46 }
 0x1bb   :  { %v5885_v59 = vpop.f32.mrf.mxu1 }
 0x1bc   :  { %v1682_v63 = vadd.f32 %v1681_v56, %v1658_v5  ;;  %v1603_v37 = vadd.f32 %v1602_v1, %v1579_v62  ;;  %v1636_v59 = vmul.f32 %v7477_v19, %v7477_v19  ;;  %v1581_v56 = vmul.f32 %v7499_v30, %v7477_v19  ;;  %v7531_v34 = vpop.permute.xlu0 %1549 }
 0x1bd   :  { %9252 = vst [vmem:[#allocation15_spill] sm:$0xff] %v7531_v34 }
 0x1be   :  { %v1683_v42 = vadd.f32 %v1682_v63, %v1659_v31  ;;  %v1604_v8 = vadd.f32 %v1603_v37, %v1580_v57  ;;  %v1661_v25 = vmul.f32 %v1636_v59, %v7499_v30  ;;  %v7536_v59 = vpop.permute.xlu1 %1554 }
 0x1bf   :  { %9253 = vst [vmem:[#allocation16_spill] sm:$0xff] %v7536_v59 }
 0x1c0   :  { %v1684_v9 = vadd.f32 %v1683_v42, %v1660_v26 }
 0x1c1   :  { %v7493_v23 = vpop.f32.mrf.mxu1 }
 0x1c2   :  { %v1637_v61 = vmul.f32 %v7493_v23, %v7493_v23  ;;  %v1582_v38 = vmul.f32 %v7508_v48, %v7493_v23  ;;  %v1685_v37 = vadd.f32 %v1684_v9, %v1661_v25 }
 0x1c3   :  { %v5888_v47 = vpop.f32.mrf.mxu1 }
 0x1c4   :  { %v1662_v1 = vmul.f32 %v1637_v61, %v7508_v48  ;;  %v1605_v47 = vadd.f32 %v1604_v8, %v1581_v56 }
 0x1c5   :  { %v7504_v35 = vpop.f32.mrf.mxu1 }
 0x1c6   :  { %9248 = vst [vmem:[#allocation11_spill] sm:$0xff] %v7504_v35  ;;  %v1638_v5 = vmul.f32 %v7504_v35, %v7504_v35  ;;  %v1583_v62 = vmul.f32 %v7515_v15, %v7504_v35  ;;  %v1686_v61 = vadd.f32 %v1685_v37, %v1662_v1  ;;  %v1951_v35 = vld [vmem:[#allocation3] sm:$0xc] }
 0x1c7   :  { %v5889_v50 = vpop.f32.mrf.mxu1 }
 0x1c8   :  { %v1606_v50 = vadd.f32 %v1605_v47, %v1582_v38  ;;  %v1663_v57 = vmul.f32 %v1638_v5, %v7515_v15 }
 0x1ca   :  { %v1607_v56 = vadd.f32 %v1606_v50, %v1583_v62  ;;  %v1687_v25 = vadd.f32 %v1686_v61, %v1663_v57 }
 0x1cd   :  { %v7525_v63 = vpop.f32.mrf.mxu1 }
 0x1ce   :  { %9251 = vst [vmem:[#allocation14_spill] sm:$0xff] %v7525_v63  ;;  %v1639_v31 = vmul.f32 %v7525_v63, %v7525_v63  ;;  %v1584_v26 = vmul.f32 %v7531_v34, %v7525_v63 }
 0x1cf   :  { %v5892_v42 = vpop.f32.mrf.mxu1 }
 0x1d0   :  { %v1664_v39 = vmul.f32 %v1639_v31, %v7531_v34  ;;  %v1608_v5 = vadd.f32 %v1607_v56, %v1584_v26  ;;  %v7546_v42 = vpop.permute.xlu0 %1559  ;;  %v6107_v56 = vld [vmem:[%s9171_s2 + $0x1f8] sm:$0xff]  }
 0x1d1   :  { %v7538_v8 = vpop.f32.mrf.mxu1  ;;  %9255 = vst [vmem:[#allocation18_spill] sm:$0xff] %v7546_v42  ;;  %5709 = vmatprep.subr.bf16.mxu0 %v6107_v56  ;;  %v1702_v56 = vld [vmem:[%s9172_s5] sm:$0x1] }
 0x1d2   :  { %9254 = vst [vmem:[#allocation17_spill] sm:$0xff] %v7538_v8  ;;  %v1585_v48 = vmul.f32 %v7536_v59, %v7538_v8  ;;  %v1640_v9 = vmul.f32 %v7538_v8, %v7538_v8  ;;  %v1688_v1 = vadd.f32 %v1687_v25, %v1664_v39 }
 0x1d3   :  { %v5893_v38 = vpop.f32.mrf.mxu1 }
 0x1d4   :  { %v1665_v47 = vmul.f32 %v1640_v9, %v7536_v59  ;;  %v1609_v37 = vadd.f32 %v1608_v5, %v1585_v48  ;;  %v1977_v59 = vld [vmem:[#allocation3] sm:$0x8] }
 0x1d5   :  { %v1431_v15 = vpop.f32.mrf.mxu1 }
 0x1d6   :  { %v1586_v62 = vmul.f32 %v7546_v42, %v1431_v15  ;;  %v1641_v50 = vmul.f32 %v1431_v15, %v1431_v15  ;;  %v1689_v34 = vadd.f32 %v1688_v1, %v1665_v47 }
 0x1d7   :  { %v5896_v31 = vpop.f32.mrf.mxu1 }
 0x1d8   :  { %v1610_v30 = vadd.f32 %v1609_v37, %v1586_v62  ;;  %v1666_v46 = vmul.f32 %v1641_v50, %v7546_v42  ;;  %v1710_v31 = vlaneseq }
 0x1d9   :  { %v1434_v63 = vpop.f32.mrf.mxu1 }
 0x1da   :  { %v1611_v8 = vrot.slane %v1610_v30, 4  ;;  %v1690_v38 = vadd.f32 %v1689_v34, %v1666_v46 }
 0x1db   :  { %v5897_v57 = vpop.f32.mrf.mxu1 }
 0x1dc   :  { %v1612_v26 = vadd.f32 %v1611_v8, %v1610_v30  ;;  %v1691_v61 = vrot.slane %v1690_v38, 4  ;;  %v1952_v57 = vld [vmem:[#allocation3 + $0x4] sm:$0xf] }
 0x1de   :  { %v1613_v39 = vrot.slane %v1612_v26, 2  ;;  %v1692_v48 = vadd.f32 %v1691_v61, %v1690_v38  ;;  %v1711_v38 = vshrl.u32 %v1710_v31, 7  ;;  %v7553_v61 = vcombine.low %v1977_v59, %v1952_v57  ;;  %v1706_v59 = vld [vmem:[%s9173_s6] sm:$0x1] }
 0x1e0   :  { %v1614_v9 = vadd.f32 %v1613_v39, %v1612_v26  ;;  %v1693_v25 = vrot.slane %v1692_v48, 2  ;;  %v5156_v26 = vcombine.low %v1951_v35, %v1952_v57  ;;  %v7558_v39 = vsub.s32 0, %v1711_v38 }
 0x1e2   :  { %v1615_v5 = vrot.slane %v1614_v9, 1  ;;  %v1694_v47 = vadd.f32 %v1693_v25, %v1692_v48  ;;  %9256 = vst [vmem:[#allocation19_spill] sm:$0xff] %v7558_v39  ;;  %v9196_v48 = vshrl.u32 %v7553_v61, 16  ;;  %v2050_v25 = vshll.u32 %v7553_v61, 16 }
 0x1e4   :  { %v1616_v1 = vadd.f32 %v1615_v5, %v1614_v9  ;;  %v1695_v37 = vrot.slane %v1694_v47, 1  ;;  %v2670_v5 = vshrl.u32 %v5156_v26, 16 }
 0x1e6   :  { %v1696_v62 = vadd.f32 %v1695_v37, %v1694_v47  ;;  %v1697_v63 = vmul.f32 0.0078125, %v1616_v1  ;;  %v2673_v47 = vshll.u32 %v5156_v26, 16 }
 0x1e8   :  { %v1698_v50 = vmul.f32 0.0078125, %v1696_v62  ;;  %v1699_v46 = vmul.f32 %v1697_v63, %v1697_v63  ;;  %v7570_v62 = vrot.slane %v9196_v48, 3 }
 0x1ea   :  { %v1700_v34 = vsub.f32 %v1698_v50, %v1699_v46  ;;  %v7572_v50 = vrot.slane %v2050_v25, 4  ;;  %v7574_v46 = vrot.slane %v2050_v25, 1 }
 0x1ec   :  { %v1701_v30 = vmax.f32 %v1700_v34, 0.0  ;;  %v7576_v34 = vrot.slane %v2670_v5, 2 }
 0x1ee   :  { %v1703_v8 = vadd.f32 1e-05, %v1701_v30  ;;  %v7578_v30 = vrot.slane %v2673_v47, 3 }
 0x1f0   :  { %6187 = vrsqrt.f32 %v1703_v8 }
 0x1fd   :  { %v6188_v9 = vpop.eup %6187 }
 0x1fe   :  { %v1705_v1 = vmul.f32 %v6188_v9, %v1702_v56 }
 0x200   :  { %v1707_v37 = vmul.f32 %v1705_v1, %v1697_v63  ;;  %v7566_v35 = vrot.slane %v1705_v1, %v7558_v39 }
 0x202   :  { %v1708_v8 = vsub.f32 %v1706_v59, %v1707_v37  ;;  %v1739_v31 = vmul.f32 %v7566_v35, %v1431_v15  ;;  %v1715_v63 = vmul.f32 %v7566_v35, %v7231_v29  ;;  %v1716_v57 = vmul.f32 %v7566_v35, %v7233_v28 }
 0x203   :  { %v1717_v38 = vmul.f32 %v7566_v35, %v7235_v2  ;;  %v1718_v26 = vmul.f32 %v7566_v35, %v7237_v43  ;;  %v1719_v56 = vmul.f32 %v7566_v35, %v7239_v55  ;;  %v1720_v9 = vmul.f32 %v7566_v35, %v7241_v20 }
 0x204   :  { %v7594_v15 = vrot.slane %v1708_v8, %v7558_v39  ;;  %v1721_v29 = vmul.f32 %v7566_v35, %v7243_v54  ;;  %v1722_v28 = vmul.f32 %v7566_v35, %v7245_v36  ;;  %v1723_v2 = vmul.f32 %v7566_v35, %v7247_v14  ;;  %v6104_v39 = vld [vmem:[%s9171_s2 + $0x120] sm:$0xff]  }
 0x205   :  { %v1724_v43 = vmul.f32 %v7566_v35, %v7255_v11  ;;  %v1725_v55 = vmul.f32 %v7566_v35, %v7325_v17  ;;  %v1726_v20 = vmul.f32 %v7566_v35, %v7346_v27  ;;  %v1727_v25 = vmul.f32 %v7566_v35, %v7443_v60 }
 0x206   :  { %v1770_v54 = vadd.f32 %v7594_v15, %v1739_v31  ;;  %v1746_v5 = vadd.f32 %v7594_v15, %v1715_v63  ;;  %v1747_v36 = vadd.f32 %v7594_v15, %v1716_v57  ;;  %v1748_v14 = vadd.f32 %v7594_v15, %v1717_v38 }
 0x207   :  { %v1749_v47 = vadd.f32 %v7594_v15, %v1718_v26  ;;  %v1750_v11 = vadd.f32 %v7594_v15, %v1719_v56  ;;  %v1751_v17 = vadd.f32 %v7594_v15, %v1720_v9  ;;  %v1752_v1 = vadd.f32 %v7594_v15, %v1721_v29 }
 0x208   :  { %v1795_v27 = vmax.f32 %v1770_v54, 0.0  ;;  %v1771_v59 = vmax.f32 %v1746_v5, 0.0  ;;  %v1772_v37 = vmax.f32 %v1747_v36, 0.0  ;;  %v1773_v60 = vmax.f32 %v1748_v14, 0.0 }
 0x209   :  { %v1774_v8 = vmax.f32 %v1749_v47, 0.0  ;;  %v1775_v31 = vmax.f32 %v1750_v11, 0.0  ;;  %v1776_v48 = vmax.f32 %v1751_v17, 0.0  ;;  %v1753_v63 = vadd.f32 %v7594_v15, %v1722_v28 }
 0x20a   :  { %v1820_v57 = vmul.f32 %v1795_v27, %v7546_v42  ;;  %v1796_v38 = vmul.f32 %v1771_v59, %v7300_v6  ;;  %v1797_v26 = vmul.f32 %v1772_v37, %v7333_v0  ;;  %v1798_v56 = vmul.f32 %v1773_v60, %v7314_v13 }
 0x20b   :  { %v1799_v9 = vmul.f32 %v1774_v8, %v7344_v22  ;;  %v1800_v29 = vmul.f32 %v1775_v31, %v7362_v58  ;;  %v1801_v54 = vmul.f32 %v1776_v48, %v7372_v32  ;;  %v1777_v5 = vmax.f32 %v1752_v1, 0.0 }
 0x20c   :  { %v5337_v36 = vpack.c.bf16 %v1820_v57, %v1820_v57  ;;  %v5341_v14 = vpack.c.bf16 %v1797_v26, %v1796_v38  ;;  %v1778_v47 = vmax.f32 %v1753_v63, 0.0  ;;  %v1754_v28 = vadd.f32 %v7594_v15, %v1723_v2 }
 0x20d   :  { %v5346_v11 = vpack.c.bf16 %v1799_v9, %v1798_v56  ;;  %v5351_v17 = vpack.c.bf16 %v1801_v54, %v1800_v29  ;;  %v1802_v27 = vmul.f32 %v1777_v5, %v7384_v49  ;;  %v1755_v59 = vadd.f32 %v7594_v15, %v1724_v43  ;;  %v2183_v54 = vld [vmem:[#allocation3 + $0x4] sm:$0x8] }
 0x20e   :  { %1950 = vst [vmem:[#allocation3 + $0x68] sm:$0xf] %v5337_v36  ;;  %5398 = vst [vmem:[#allocation3 + $0x8] sm:$0xff] %v5341_v14   ;;  %v1803_v37 = vmul.f32 %v1778_v47, %v7397_v52  ;;  %v1779_v60 = vmax.f32 %v1754_v28, 0.0  ;;  %v1756_v8 = vadd.f32 %v7594_v15, %v1725_v55  ;;  %v1757_v48 = vadd.f32 %v7594_v15, %v1726_v20 }
 0x20f   :  { %5399 = vst [vmem:[#allocation3 + $0x10] sm:$0xff] %v5346_v11   ;;  %5400 = vst [vmem:[#allocation3 + $0x18] sm:$0xff] %v5351_v17   ;;  %v1780_v1 = vmax.f32 %v1755_v59, 0.0  ;;  %v1728_v2 = vmul.f32 %v7566_v35, %v7457_v24  ;;  %v1758_v31 = vadd.f32 %v7594_v15, %v1727_v25  ;;  %v1729_v43 = vmul.f32 %v7566_v35, %v7263_v40 }
 0x210   :  { %v5356_v63 = vpack.c.bf16 %v1803_v37, %v1802_v27  ;;  %v1804_v57 = vmul.f32 %v1779_v60, %v7406_v4  ;;  %v1781_v38 = vmax.f32 %v1756_v8, 0.0  ;;  %v1782_v26 = vmax.f32 %v1757_v48, 0.0 }
 0x211   :  { %v1805_v55 = vmul.f32 %v1780_v1, %v7417_v44  ;;  %v1759_v20 = vadd.f32 %v7594_v15, %v1728_v2  ;;  %v1783_v56 = vmax.f32 %v1758_v31, 0.0  ;;  %v1730_v9 = vmul.f32 %v7566_v35, %v7277_v3 }
 0x212   :  { %v2240_v24 = vor.u32 %v7572_v50, %v7570_v62  ;;  %5401 = vst [vmem:[#allocation3 + $0x20] sm:$0xff] %v5356_v63   ;;  %v1806_v25 = vmul.f32 %v1781_v38, %v7428_v16  ;;  %v1807_v40 = vmul.f32 %v1782_v26, %v7435_v45  ;;  %v1760_v29 = vadd.f32 %v7594_v15, %v1729_v43 }
 0x213   :  { %v5361_v5 = vpack.c.bf16 %v1805_v55, %v1804_v57  ;;  %v1784_v36 = vmax.f32 %v1759_v20, 0.0  ;;  %v1808_v14 = vmul.f32 %v1783_v56, %v7449_v10  ;;  %v7649_v47 = vadd.f32 %v7594_v15, %v1730_v9 }
 0x214   :  { %v9257_v3 = vshrl.u32 %v7553_v61, 16  ;;  %v5366_v11 = vpack.c.bf16 %v1807_v40, %v1806_v25  ;;  %v1785_v17 = vmax.f32 %v1760_v29, 0.0  ;;  %v1731_v27 = vmul.f32 %v7566_v35, %v7374_v33 }
 0x215   :  { %v1953_v59 = vld [vmem:[#allocation3 + $0x8] sm:$0xf]  ;;  %v1954_v37 = vld [vmem:[#allocation3 + $0xc] sm:$0xf]  ;;  %5402 = vst [vmem:[#allocation3 + $0x28] sm:$0xff] %v5361_v5   ;;  %v1809_v8 = vmul.f32 %v1784_v36, %v7454_v21  ;;  %v7662_v61 = vmul.f32 %v7566_v35, %v7399_v7 }
 0x216   :  { %v2053_v28 = vor.u32 %v7574_v46, %v9257_v3  ;;  %v1955_v46 = vld [vmem:[#allocation3 + $0x10] sm:$0xf]  ;;  %v7664_v1 = vcombine.low %v1953_v59, %v1954_v37  ;;  %v5171_v2 = vcombine.low %v2183_v54, %v1953_v59  ;;  %v1956_v31 = vld [vmem:[#allocation3 + $0x14] sm:$0xf]  ;;  %v1957_v33 = vld [vmem:[#allocation3 + $0x18] sm:$0xf]  ;;  %v7667_v43 = vmul.f32 %v1785_v17, %v7464_v53 }
 0x217   :  { %5403 = vst [vmem:[#allocation3 + $0x30] sm:$0xff] %v5366_v11   ;;  %v7670_v63 = vadd.f32 %v7594_v15, %v1731_v27  ;;  %v5172_v57 = vcombine.low %v1954_v37, %v1955_v46  ;;  %v7672_v38 = vld [vmem:[#allocation3 + $0x1c] sm:$0xf]  ;;  %v7674_v26 = vcombine.low %v1955_v46, %v1956_v31  ;;  %v5173_v7 = vcombine.low %v1956_v31, %v1957_v33 }
 0x218   :  { %v5371_v55 = vpack.c.bf16 %v1809_v8, %v1808_v14  ;;  %v2246_v20 = vshrl.u32 %v5171_v2, 16  ;;  %v2249_v56 = vshll.u32 %v5171_v2, 16  ;;  %v2055_v9 = vshll.u32 %v7664_v1, 16 }
 0x219   :  { %v2059_v25 = vshrl.u32 %v7664_v1, 16  ;;  %v2254_v40 = vshrl.u32 %v5172_v57, 16  ;;  %v2257_v29 = vshll.u32 %v5172_v57, 16  ;;  %v7679_v54 = vcombine.low %v1957_v33, %v7672_v38 }
 0x21a   :  { %v7682_v5 = vshll.u32 %v7674_v26, 16  ;;  %5404 = vst [vmem:[#allocation3 + $0x38] sm:$0xff] %v5371_v55   ;;  %v2248_v36 = vrot.slane %v2246_v20, 3  ;;  %v2251_v3 = vrot.slane %v2249_v56, 4  ;;  %v2242_v17 = vrot.slane %v2055_v9, 4 }
 0x21b   :  { %v2241_v11 = vrot.slane %v2059_v25, 3  ;;  %v2256_v14 = vrot.slane %v2254_v40, 3  ;;  %v2259_v27 = vrot.slane %v2257_v29, 4  ;;  %v7685_v59 = vshll.u32 %v7679_v54, 16  ;;  %v6088_v40 = vld [vmem:[%s9171_s2 + $0x138] sm:$0xff]  }
 0x21c   :  { %v2267_v37 = vshrl.u32 %v5173_v7, 16  ;;  %v2252_v8 = vor.u32 %v2251_v3, %v2248_v36  ;;  %v2270_v2 = vshll.u32 %v5173_v7, 16  ;;  %v2057_v31 = vrot.slane %v2055_v9, 1 }
 0x21d   :  { %v7687_v46 = vor.u32 %v2242_v17, %v2241_v11  ;;  %v2260_v33 = vor.u32 %v2259_v27, %v2256_v14  ;;  %v2065_v55 = vrot.slane %v7682_v5, 1  ;;  %v2677_v20 = vrot.slane %v2059_v25, 2  ;;  %v6096_v27 = vld [vmem:[%s9171_s2 + $0x170] sm:$0xff]  }
 0x21e   :  { %v2269_v57 = vrot.slane %v2267_v37, 3  ;;  %v2272_v29 = vrot.slane %v2270_v2, 4  ;;  %v2058_v36 = vsel %vm2046_vm0, %v2053_v28, %v2057_v31  ;;  %v2061_v7 = vor.u32 %v2059_v25, %v2057_v31  ;;  %v1959_v28 = vld [vmem:[#allocation3 + $0x20] sm:$0xf]  ;;  %v7708_v25 = vld [vmem:[#allocation3 + $0x24] sm:$0xf] }
 0x21f   :  { %v2244_v56 = vsel %vm2237_vm15, %v2240_v24, %v7687_v46  ;;  %v2261_v3 = vsel %vm2237_vm15, %v2252_v8, %v2260_v33  ;;  %v2682_v11 = vshrl.u32 %v2058_v36, 16  ;;  %v2685_v17 = vshll.u32 %v2058_v36, 16 }
 0x220   :  { %v2678_v14 = vrot.slane %v2055_v9, 3  ;;  %2564 = vmatprep.mubr.bf16.mxu1 %v2261_v3  ;;  %v7703_v62 = vor.u32 %v2272_v29, %v2269_v57  ;;  %v2066_v50 = vsel %vm2046_vm0, %v2061_v7, %v2065_v55  ;;  %v2067_v24 = vshrl.u32 %v7674_v26, 16  ;;  %v6097_v3 = vld [vmem:[%s9171_s2 + $0x130] sm:$0xff]  }
 0x221   :  { %v2263_v37 = vrot.slane %v7682_v5, 4  ;;  %2565 = vmatmul.mubr.bf16.vlgmr.msra.gmra.mxu1 %v2244_v56  ;;  %v2684_v8 = vrot.slane %v2682_v11, 2  ;;  %v2687_v2 = vrot.slane %v2685_v17, 3  ;;  %v2690_v9 = vshrl.u32 %v2066_v50, 16 }
 0x222   :  { %v2693_v31 = vshll.u32 %v2066_v50, 16  ;;  %5616 = vmatpush3.bf16.msra.mxu1 %v6088_v40  ;;  %v2274_v36 = vsel %vm2237_vm15, %v2260_v33, %v7703_v62  ;;  %v7712_v57 = vor.u32 %v2678_v14, %v2677_v20  ;;  %v2262_v29 = vrot.slane %v2067_v24, 3  ;;  %v6100_v40 = vld [vmem:[%s9171_s2 + $0x168] sm:$0xff]  }
 0x223   :  { %v2069_v7 = vor.u32 %v2067_v24, %v2065_v55  ;;  %2572 = vmatprep.mubr.bf16.mxu1 %v2274_v36  ;;  %v2692_v48 = vrot.slane %v2690_v9, 2  ;;  %v2073_v56 = vrot.slane %v7685_v59, 1  ;;  %5617 = vmatprep.subr.bf16.mxu1 %v6096_v27  ;;  %v7723_v33 = vadd.f32 %v7594_v15, %v7662_v61  ;;  %v6101_v14 = vld [vmem:[%s9171_s2 + $0x128] sm:$0xff]   ;;  %v6108_v27 = vld [vmem:[%s9171_s2 + $0x1b8] sm:$0xff]  }
 0x224   :  { %v2695_v60 = vrot.slane %v2693_v31, 3  ;;  %v2688_v20 = vor.u32 %v2687_v2, %v2684_v8  ;;  %v7725_v55 = vor.u32 %v2263_v37, %v2262_v29  ;;  %v7728_v11 = vcombine.low %v1959_v28, %v7708_v25  ;;  %v1961_v8 = vld [vmem:[#allocation3 + $0x28] sm:$0xf]  ;;  %v7739_v2 = vld [vmem:[#allocation3 + $0x2c] sm:$0xf] }
 0x225   :  { %v5174_v17 = vcombine.low %v7672_v38, %v1959_v28  ;;  %v2074_v61 = vsel %vm2046_vm0, %v2069_v7, %v2073_v56  ;;  %v2698_v9 = vrot.slane %v2067_v24, 2  ;;  %v2699_v37 = vrot.slane %v7682_v5, 3  ;;  %v6103_v38 = vld [vmem:[%s9171_s2 + $0x160] sm:$0xff]   ;;  %v6112_v5 = vld [vmem:[%s9171_s2 + $0x1f0] sm:$0xff]  }
 0x226   :  { %v2696_v50 = vor.u32 %v2695_v60, %v2692_v48  ;;  %v9258_v28 = vor.u32 %v7578_v30, %v7576_v34  ;;  %v2703_v36 = vshrl.u32 %v2074_v61, 16  ;;  %v2706_v60 = vshll.u32 %v2074_v61, 16  ;;  %5618 = vmatpush3.bf16.msra.mxu1 %v6097_v3 }
 0x227   :  { %v7750_v48 = vshll.u32 %v7728_v11, 16  ;;  %v2265_v29 = vsel %vm2237_vm15, %v7687_v46, %v7725_v55  ;;  %v2280_v7 = vshrl.u32 %v5174_v17, 16  ;;  %v2283_v34 = vshll.u32 %v5174_v17, 16  ;;  %5619 = vmatprep.subr.bf16.mxu1 %v6100_v40  ;;  %v6109_v40 = vld [vmem:[%s9171_s2 + $0x158] sm:$0xff]  }
 0x228   :  { %v2680_v31 = vsel %vm2668_vm1, %v9258_v28, %v7712_v57  ;;  %v2697_v24 = vsel %vm2668_vm1, %v2688_v20, %v2696_v50  ;;  %v2705_v30 = vrot.slane %v2703_v36, 2  ;;  %v2708_v61 = vrot.slane %v2706_v60, 3 }
 0x229   :  { %2995 = vmatprep.mubr.bf16.mxu0 %v2697_v24  ;;  %v2075_v28 = vshrl.u32 %v7679_v54, 16  ;;  %v2276_v3 = vrot.slane %v7685_v59, 4  ;;  %2573 = vmatmul.mubr.bf16.gmra.mxu1 %v2265_v29  ;;  %v2282_v20 = vrot.slane %v2280_v7, 3  ;;  %v2285_v42 = vrot.slane %v2283_v34, 4 }
 0x22a   :  { %2996 = vmatmul.mubr.bf16.vlgmr.msra.gmra.mxu0 %v2680_v31  ;;  %v7764_v53 = vor.u32 %v2699_v37, %v2698_v9  ;;  %v2081_v46 = vrot.slane %v7750_v48, 1  ;;  %v2709_v17 = vor.u32 %v2708_v61, %v2705_v30  ;;  %v7771_v24 = vcombine.low %v1961_v8, %v7739_v2  ;;  %5620 = vmatpush3.bf16.msra.mxu1 %v6101_v14  ;;  %v6113_v31 = vld [vmem:[%s9171_s2 + $0x1b0] sm:$0xff]  }
 0x22b   :  { %v2275_v36 = vrot.slane %v2075_v28, 3  ;;  %v2077_v60 = vor.u32 %v2075_v28, %v2073_v56  ;;  %5710 = vmatpush3.bf16.msra.mxu0 %v6108_v27  ;;  %v2286_v9 = vor.u32 %v2285_v42, %v2282_v20  ;;  %v5175_v37 = vcombine.low %v7708_v25, %v1961_v8  ;;  %5621 = vmatprep.subr.bf16.mxu1 %v6103_v38  ;;  %v1963_v27 = vld [vmem:[#allocation3 + $0x30] sm:$0xf]  ;;  %v6110_v42 = vld [vmem:[%s9171_s2 + $0x118] sm:$0xff]   ;;  %v6118_v25 = vld [vmem:[%s9171_s2 + $0x1e8] sm:$0xff]  }
 0x22c   :  { %v2711_v29 = vrot.slane %v2075_v28, 2  ;;  %v2712_v7 = vrot.slane %v7685_v59, 3  ;;  %5711 = vmatprep.subr.bf16.mxu0 %v6112_v5  ;;  %v2710_v34 = vsel %vm2668_vm1, %v2696_v50, %v2709_v17  ;;  %v7781_v14 = vshll.u32 %v7771_v24, 16  ;;  %v7791_v5 = vld [vmem:[#allocation3 + $0x34] sm:$0xf]  ;;  %v6114_v61 = vld [vmem:[%s9171_s2 + $0x150] sm:$0xff]  }
 0x22d   :  { %v2277_v56 = vor.u32 %v2276_v3, %v2275_v36  ;;  %v2082_v30 = vsel %vm2046_vm0, %v2077_v60, %v2081_v46  ;;  %3003 = vmatprep.mubr.bf16.mxu0 %v2710_v34  ;;  %v2287_v59 = vsel %vm2237_vm15, %v7703_v62, %v2286_v9  ;;  %v2293_v38 = vshrl.u32 %v5175_v37, 16  ;;  %v6119_v28 = vld [vmem:[%s9171_s2 + $0x1a8] sm:$0xff]  }
 0x22e   :  { %v2716_v50 = vshrl.u32 %v2082_v30, 16  ;;  %v2719_v8 = vshll.u32 %v2082_v30, 16  ;;  %2580 = vmatprep.mubr.bf16.mxu1 %v2287_v59  ;;  %v2701_v3 = vsel %vm2668_vm1, %v7712_v57, %v7764_v53  ;;  %v2296_v20 = vshll.u32 %v5175_v37, 16  ;;  %5622 = vmatpush3.bf16.msra.mxu1 %v6104_v39  ;;  %v6124_v57 = vld [vmem:[%s9171_s2 + $0x1e0] sm:$0xff]  }
 0x22f   :  { %v2278_v62 = vsel %vm2237_vm15, %v7725_v55, %v2277_v56  ;;  %v2083_v36 = vshrl.u32 %v7728_v11, 16  ;;  %v2295_v30 = vrot.slane %v2293_v38, 3  ;;  %v2289_v21 = vrot.slane %v7750_v48, 4  ;;  %5623 = vmatprep.subr.bf16.mxu1 %v6109_v40  ;;  %5712 = vmatpush3.bf16.msra.mxu0 %v6113_v31 }
 0x230   :  { %v2718_v60 = vrot.slane %v2716_v50, 2  ;;  %v2721_v34 = vrot.slane %v2719_v8, 3  ;;  %v2298_v10 = vrot.slane %v2296_v20, 4  ;;  %v7806_v59 = vor.u32 %v2712_v7, %v2711_v29  ;;  %5713 = vmatprep.subr.bf16.mxu0 %v6118_v25  ;;  %v6116_v25 = vld [vmem:[%s9171_s2 + $0x110] sm:$0xff]  }
 0x231   :  { %v2288_v45 = vrot.slane %v2083_v36, 3  ;;  %v2085_v16 = vor.u32 %v2083_v36, %v2081_v46  ;;  %2581 = vmatmul.mubr.bf16.gmra.mxu1 %v2278_v62  ;;  %v2089_v55 = vrot.slane %v7781_v14, 1  ;;  %v7813_v37 = vcombine.low %v1963_v27, %v7791_v5  ;;  %v7843_v62 = vld [vmem:[#allocation3 + $0x3c] sm:$0xf] }
 0x232   :  { %3004 = vmatmul.mubr.bf16.gmra.mxu0 %v2701_v3  ;;  %v2722_v39 = vor.u32 %v2721_v34, %v2718_v60  ;;  %v5176_v40 = vcombine.low %v7739_v2, %v1963_v27  ;;  %v2299_v31 = vor.u32 %v2298_v10, %v2295_v30  ;;  %v2724_v7 = vrot.slane %v2083_v36, 2  ;;  %5624 = vmatpush3.bf16.msra.mxu1 %v6110_v42  ;;  %v6125_v10 = vld [vmem:[%s9171_s2 + $0x1a0] sm:$0xff]   ;;  %v6128_v27 = vld [vmem:[%s9171_s2 + $0x1d8] sm:$0xff]   ;;  %v6121_v34 = vld [vmem:[%s9171_s2 + $0x108] sm:$0xff]  }
 0x233   :  { %v7816_v29 = vor.u32 %v2289_v21, %v2288_v45  ;;  %v2725_v46 = vrot.slane %v7750_v48, 3  ;;  %v2090_v8 = vsel %vm2046_vm0, %v2085_v16, %v2089_v55  ;;  %v7825_v38 = vshll.u32 %v7813_v37, 16  ;;  %5625 = vmatprep.subr.bf16.mxu1 %v6114_v61  ;;  %5714 = vmatpush3.bf16.msra.mxu0 %v6119_v28  ;;  %v6120_v45 = vld [vmem:[%s9171_s2 + $0x148] sm:$0xff]  }
 0x234   :  { %v2723_v50 = vsel %vm2668_vm1, %v2709_v17, %v2722_v39  ;;  %v2306_v3 = vshrl.u32 %v5176_v40, 16  ;;  %v2300_v21 = vsel %vm2237_vm15, %v2286_v9, %v2299_v31  ;;  %v2714_v16 = vsel %vm2668_vm1, %v7764_v53, %v7806_v59  ;;  %v1965_v17 = vld [vmem:[#allocation3 + $0x38] sm:$0xf]  ;;  %5715 = vmatprep.subr.bf16.mxu0 %v6124_v57 }
 0x235   :  { %3011 = vmatprep.mubr.bf16.mxu0 %v2723_v50  ;;  %v2729_v2 = vshrl.u32 %v2090_v8, 16  ;;  %v2732_v48 = vshll.u32 %v2090_v8, 16  ;;  %2588 = vmatprep.mubr.bf16.mxu1 %v2300_v21  ;;  %v2291_v42 = vsel %vm2237_vm15, %v2277_v56, %v7816_v29  ;;  %v2309_v28 = vshll.u32 %v5176_v40, 16  ;;  %v6126_v50 = vld [vmem:[%s9171_s2 + $0x140] sm:$0xff]  }
 0x236   :  { %v2308_v61 = vrot.slane %v2306_v3, 3  ;;  %v2091_v9 = vshrl.u32 %v7771_v24, 16  ;;  %v7845_v36 = vor.u32 %v2725_v46, %v2724_v7  ;;  %v2302_v60 = vrot.slane %v7781_v14, 4  ;;  %5626 = vmatpush3.bf16.msra.mxu1 %v6116_v25 }
 0x237   :  { %v2731_v20 = vrot.slane %v2729_v2, 2  ;;  %v2734_v53 = vrot.slane %v2732_v48, 3  ;;  %v2311_v30 = vrot.slane %v2309_v28, 4  ;;  %v2097_v40 = vrot.slane %v7825_v38, 1  ;;  %5627 = vmatprep.subr.bf16.mxu1 %v6120_v45  ;;  %5716 = vmatpush3.bf16.msra.mxu0 %v6125_v10  ;;  %v6132_v2 = vld [vmem:[%s9171_s2 + $0x1d0] sm:$0xff]  }
 0x238   :  { %v2301_v57 = vrot.slane %v2091_v9, 3  ;;  %v2093_v56 = vor.u32 %v2091_v9, %v2089_v55  ;;  %v7856_v46 = vcombine.low %v1965_v17, %v7843_v62  ;;  %v5177_v25 = vcombine.low %v7791_v5, %v1965_v17  ;;  %5717 = vmatprep.subr.bf16.mxu0 %v6128_v27  ;;  %v6129_v55 = vld [vmem:[%s9171_s2 + $0x198] sm:$0xff]  }
 0x239   :  { %v2735_v7 = vor.u32 %v2734_v53, %v2731_v20  ;;  %v2737_v8 = vrot.slane %v2091_v9, 2  ;;  %2589 = vmatmul.mubr.bf16.gmra.mxu1 %v2291_v42  ;;  %v2312_v3 = vor.u32 %v2311_v30, %v2308_v61  ;;  %v2738_v21 = vrot.slane %v7781_v14, 3 }
 0x23a   :  { %3012 = vmatmul.mubr.bf16.gmra.mxu0 %v2714_v16  ;;  %v7862_v45 = vor.u32 %v2302_v60, %v2301_v57  ;;  %v2098_v10 = vsel %vm2046_vm0, %v2093_v56, %v2097_v40  ;;  %v7871_v27 = vshll.u32 %v7856_v46, 16  ;;  %5628 = vmatpush3.bf16.msra.mxu1 %v6121_v34  ;;  %v6127_v16 = vld [vmem:[%s9171_s2 + $0x100] sm:$0xff]   ;;  %v2727_v14 = vsel %vm2668_vm1, %v7806_v59, %v7845_v36 }
 0x23b   :  { %v2736_v5 = vsel %vm2668_vm1, %v2722_v39, %v2735_v7  ;;  %v2742_v48 = vshrl.u32 %v2098_v10, 16  ;;  %v2745_v17 = vshll.u32 %v2098_v10, 16  ;;  %v2313_v42 = vsel %vm2237_vm15, %v2299_v31, %v2312_v3  ;;  %5629 = vmatprep.subr.bf16.mxu1 %v6126_v50  ;;  %5718 = vmatpush3.bf16.msra.mxu0 %v6129_v55  ;;  %v6133_v31 = vld [vmem:[%s9171_s2 + $0x190] sm:$0xff]  }
 0x23c   :  { %3019 = vmatprep.mubr.bf16.mxu0 %v2736_v5  ;;  %v2319_v61 = vshrl.u32 %v5177_v25, 16  ;;  %v2322_v28 = vshll.u32 %v5177_v25, 16  ;;  %2596 = vmatprep.mubr.bf16.mxu1 %v2313_v42  ;;  %v2304_v39 = vsel %vm2237_vm15, %v7816_v29, %v7862_v45  ;;  %v2099_v53 = vshrl.u32 %v7813_v37, 16  ;;  %v6134_v25 = vld [vmem:[%s9171_s2 + $0x1c8] sm:$0xff]  }
 0x23d   :  { %v2744_v9 = vrot.slane %v2742_v48, 2  ;;  %v2747_v20 = vrot.slane %v2745_v17, 3  ;;  %v2739_v59 = vor.u32 %v2738_v21, %v2737_v8  ;;  %v2315_v30 = vrot.slane %v7825_v38, 4  ;;  %5719 = vmatprep.subr.bf16.mxu0 %v6132_v2 }
 0x23e   :  { %v2321_v60 = vrot.slane %v2319_v61, 3  ;;  %v2324_v34 = vrot.slane %v2322_v28, 4  ;;  %v2314_v56 = vrot.slane %v2099_v53, 3  ;;  %v2101_v50 = vor.u32 %v2099_v53, %v2097_v40  ;;  %5630 = vmatpush3.bf16.msra.mxu1 %v6127_v16  ;;  %v6141_v28 = vld [vmem:[%s9171_s2 + $0x1c0] sm:$0xff]  }
 0x23f   :  { %v2748_v57 = vor.u32 %v2747_v20, %v2744_v9  ;;  %v2105_v29 = vrot.slane %v7871_v27, 1  ;;  %v9259_v10 = vmax.f32 %v7649_v47, 0.0  ;;  %v2750_v8 = vrot.slane %v2099_v53, 2  ;;  %5720 = vmatpush3.bf16.msra.mxu0 %v6133_v31  ;;  %v6135_v47 = vld [vmem:[%s9171_s2 + $0x188] sm:$0xff]  }
 0x240   :  { %v7892_v55 = vor.u32 %v2324_v34, %v2321_v60  ;;  %v2751_v21 = vrot.slane %v7825_v38, 3  ;;  %v9260_v2 = vmov 0.0   ;;  %v7900_v48 = vor.u32 %v2315_v30, %v2314_v56  ;;  %5721 = vmatprep.subr.bf16.mxu0 %v6134_v25 }
 0x241   :  { %v1811_v5 = vmul.f32 %v9259_v10, %v7473_v51  ;;  %5898 = vmatprep.subr.bf16.mxu1 %v9260_v2  ;;  %v2749_v40 = vsel %vm2668_vm1, %v2735_v7, %v2748_v57  ;;  %v2106_v17 = vsel %vm2046_vm0, %v2101_v50, %v2105_v29  ;;  %v7904_v16 = vshrl.u32 %v7856_v46, 16  ;;  %2597 = vmatmul.mubr.bf16.gmra.mxu1 %v2304_v39 }
 0x242   :  { %3020 = vmatmul.mubr.bf16.gmra.mxu0 %v2727_v14  ;;  %v2326_v38 = vsel %vm2237_vm15, %v2312_v3, %v7892_v55  ;;  %v2755_v42 = vshrl.u32 %v2106_v17, 16  ;;  %v2758_v61 = vshll.u32 %v2106_v17, 16  ;;  %v1733_v9 = vmul.f32 %v7566_v35, %v7468_v41 }
 0x243   :  { %v5376_v7 = vpack.c.bf16 %v1811_v5, %v7667_v43  ;;  %3027 = vmatprep.mubr.bf16.mxu0 %v2749_v40  ;;  %2604 = vmatprep.mubr.bf16.mxu1 %v2326_v38  ;;  %v1734_v14 = vmul.f32 %v7566_v35, %v7477_v19  ;;  %v7919_v3 = vor.u32 %v2751_v21, %v2750_v8  ;;  %v1787_v53 = vmax.f32 %v7670_v63, 0.0  ;;  %v6142_v19 = vld [vmem:[%s9171_s2 + $0x180] sm:$0xff]   ;;  %v9261_v8 = vld [vmem:[#allocation11_spill] sm:$0xff] }
 0x244   :  { %v2757_v39 = vrot.slane %v2755_v42, 2  ;;  %v2760_v20 = vrot.slane %v2758_v61, 3  ;;  %v2740_v43 = vsel %vm2668_vm1, %v7845_v36, %v2739_v59  ;;  %v2317_v31 = vsel %vm2237_vm15, %v7862_v45, %v7900_v48  ;;  %5722 = vmatpush3.bf16.msra.mxu0 %v6135_v47  ;;  %v9262_v47 = vld [vmem:[#allocation14_spill] sm:$0xff] }
 0x245   :  { %5405 = vst [vmem:[#allocation3 + $0x40] sm:$0xff] %v5376_v7   ;;  %v2327_v41 = vrot.slane %v7904_v16, 3  ;;  %v1788_v60 = vmax.f32 %v7723_v33, 0.0  ;;  %v2328_v63 = vrot.slane %v7871_v27, 4  ;;  %v1812_v30 = vmul.f32 %v1787_v53, %v7482_v12  ;;  %5723 = vmatprep.subr.bf16.mxu0 %v6141_v28 }
 0x246   :  { %v7932_v34 = vor.u32 %v2760_v20, %v2757_v39  ;;  %v1764_v36 = vadd.f32 %v7594_v15, %v1733_v9  ;;  %v2109_v45 = vor.u32 %v7904_v16, %v2105_v29  ;;  %v1765_v33 = vadd.f32 %v7594_v15, %v1734_v14  ;;  %v9264_v9 = vld [vmem:[#allocation10_spill] sm:$0xff]  ;;  %v9265_v20 = vld [vmem:[#allocation17_spill] sm:$0xff] }
 0x247   :  { %v1813_v56 = vmul.f32 %v1788_v60, %v7486_v18  ;;  %v1735_v50 = vmul.f32 %v7566_v35, %v7493_v23  ;;  %v2753_v25 = vsel %vm2668_vm1, %v2739_v59, %v7919_v3  ;;  %v2763_v10 = vrot.slane %v7904_v16, 2  ;;  %v9263_v16 = vld [vmem:[#allocation9_spill] sm:$0xff] }
 0x248   :  { %v1789_v5 = vmax.f32 %v1764_v36, 0.0  ;;  %v1736_v21 = vmul.f32 %v7566_v35, %v9261_v8  ;;  %v1790_v17 = vmax.f32 %v1765_v33, 0.0  ;;  %v1737_v38 = vmul.f32 %v7566_v35, %v9262_v47  ;;  %5724 = vmatpush3.bf16.msra.mxu0 %v6142_v19 }
 0x249   :  { %v5381_v40 = vpack.c.bf16 %v1813_v56, %v1812_v30  ;;  %v1766_v29 = vadd.f32 %v7594_v15, %v1735_v50  ;;  %2605 = vmatmul.mubr.bf16.gmra.mxu1 %v2317_v31  ;;  %v2762_v23 = vsel %vm2668_vm1, %v2748_v57, %v7932_v34  ;;  %v2764_v59 = vrot.slane %v7871_v27, 3  ;;  %5966 = vmatprep.subr.bf16.mxu0 %v9260_v2  ;;  %v9266_v30 = vld [vmem:[#allocation12_spill] sm:$0xff] }
 0x24a   :  { %3028 = vmatmul.mubr.bf16.gmra.mxu0 %v2740_v43  ;;  %v1814_v42 = vmul.f32 %v1789_v5, %v9263_v16  ;;  %v1767_v61 = vadd.f32 %v7594_v15, %v1736_v21  ;;  %v1815_v14 = vmul.f32 %v1790_v17, %v9264_v9  ;;  %v1738_v53 = vmul.f32 %v7566_v35, %v9265_v20 }
 0x24b   :  { %3035 = vmatprep.mubr.bf16.mxu0 %v2762_v23  ;;  %5406 = vst [vmem:[#allocation3 + $0x48] sm:$0xff] %v5381_v40   ;;  %v1791_v39 = vmax.f32 %v1766_v29, 0.0  ;;  %v1768_v43 = vadd.f32 %v7594_v15, %v1737_v38  ;;  %v7963_v31 = vor.u32 %v2328_v63, %v2327_v41  ;;  %v7969_v21 = vor.u32 %v2764_v59, %v2763_v10  ;;  %v9267_v40 = vld [vmem:[#allocation13_spill] sm:$0xff]  ;;  %v9268_v63 = vld [vmem:[#allocation15_spill] sm:$0xff] }
 0x24c   :  { %v1967_v7 = vld [vmem:[#allocation3 + $0x40] sm:$0xf]  ;;  %v1968_v28 = vld [vmem:[#allocation3 + $0x44] sm:$0xf]  ;;  %v1792_v60 = vmax.f32 %v1767_v61, 0.0  ;;  %v5386_v19 = vpack.c.bf16 %v1815_v14, %v1814_v42  ;;  %v1769_v56 = vadd.f32 %v7594_v15, %v1738_v53  ;;  %v9269_v53 = vld [vmem:[#allocation16_spill] sm:$0xff] }
 0x24d   :  { %v7960_v57 = vcombine.low %v1967_v7, %v1968_v28  ;;  %v5178_v27 = vcombine.low %v7843_v62, %v1967_v7  ;;  %v1816_v36 = vmul.f32 %v1791_v39, %v9266_v30  ;;  %v1793_v33 = vmax.f32 %v1768_v43, 0.0 }
 0x24e   :  { %5407 = vst [vmem:[#allocation3 + $0x50] sm:$0xff] %v5386_v19   ;;  %v1817_v62 = vmul.f32 %v1792_v60, %v9267_v40  ;;  %v1794_v41 = vmax.f32 %v1769_v56, 0.0  ;;  %v2330_v10 = vsel %vm2237_vm15, %v7900_v48, %v7963_v31 }
 0x24f   :  { %v2111_v50 = vshll.u32 %v7960_v57, 16  ;;  %v2332_v35 = vshrl.u32 %v5178_v27, 16  ;;  %v2335_v5 = vshll.u32 %v5178_v27, 16  ;;  %v2115_v8 = vshrl.u32 %v7960_v57, 16 }
 0x250   :  { %v1818_v17 = vmul.f32 %v1793_v33, %v9268_v63  ;;  %v5391_v7 = vpack.c.bf16 %v1817_v62, %v1816_v36  ;;  %v1819_v43 = vmul.f32 %v1794_v41, %v9269_v53  ;;  %v8184_v63 = vld [vmem:[#allocation3 + $0x38] sm:$0xff]  }
 0x251   :  { %v2334_v29 = vrot.slane %v2332_v35, 3  ;;  %v2337_v47 = vrot.slane %v2335_v5, 4  ;;  %v2113_v38 = vrot.slane %v2111_v50, 1  ;;  %v2340_v23 = vrot.slane %v2115_v8, 3 }
 0x252   :  { %v2341_v15 = vrot.slane %v2111_v50, 4  ;;  %v2776_v42 = vrot.slane %v2115_v8, 2  ;;  %v2777_v61 = vrot.slane %v2111_v50, 3  ;;  %3036 = vmatmul.mubr.bf16.gmra.mxu0 %v2753_v25  ;;  %v1969_v39 = vld [vmem:[#allocation3 + $0x48] sm:$0xf]  ;;  %5408 = vst [vmem:[#allocation3 + $0x58] sm:$0xff] %v5391_v7   ;;  %v2766_v25 = vsel %vm2668_vm1, %v7919_v3, %v7969_v21 }
 0x253   :  { %v2338_v14 = vor.u32 %v2337_v47, %v2334_v29  ;;  %v2114_v59 = vsel %vm2046_vm0, %v2109_v45, %v2113_v38  ;;  %v1970_v20 = vld [vmem:[#allocation3 + $0x4c] sm:$0xf]  ;;  %v5179_v56 = vcombine.low %v1968_v28, %v1969_v39  ;;  %v2117_v48 = vor.u32 %v2115_v8, %v2113_v38 }
 0x254   :  { %v2768_v27 = vshrl.u32 %v2114_v59, 16  ;;  %v2771_v60 = vshll.u32 %v2114_v59, 16  ;;  %v7978_v19 = vcombine.low %v1969_v39, %v1970_v20  ;;  %v5396_v33 = vpack.c.bf16 %v1819_v43, %v1818_v17 }
 0x255   :  { %v2339_v36 = vsel %vm2237_vm15, %v7892_v55, %v2338_v14  ;;  %v2345_v5 = vshrl.u32 %v5179_v56, 16  ;;  %v2348_v62 = vshll.u32 %v5179_v56, 16  ;;  %v7988_v28 = vor.u32 %v2341_v15, %v2340_v23  ;;  %v1971_v41 = vld [vmem:[#allocation3 + $0x50] sm:$0xf]  ;;  %v1972_v29 = vld [vmem:[#allocation3 + $0x54] sm:$0xf] }
 0x256   :  { %2612 = vmatprep.mubr.bf16.mxu1 %v2339_v36  ;;  %v2770_v45 = vrot.slane %v2768_v27, 2  ;;  %v2773_v50 = vrot.slane %v2771_v60, 3  ;;  %v7986_v35 = vshll.u32 %v7978_v19, 16  ;;  %v7990_v55 = vor.u32 %v2777_v61, %v2776_v42  ;;  %5409 = vst [vmem:[#allocation3 + $0x60] sm:$0xff] %v5396_v33  }
 0x257   :  { %2613 = vmatmul.mubr.bf16.gmra.mxu1 %v2330_v10  ;;  %v7993_v47 = vshrl.u32 %v7978_v19, 16  ;;  %v2347_v8 = vrot.slane %v2345_v5, 3  ;;  %v7996_v38 = vcombine.low %v1971_v41, %v1972_v29  ;;  %v2350_v7 = vrot.slane %v2348_v62, 4 }
 0x258   :  { %v2774_v3 = vor.u32 %v2773_v50, %v2770_v45  ;;  %v2121_v17 = vrot.slane %v7986_v35, 1  ;;  %v5180_v59 = vcombine.low %v1970_v20, %v1971_v41  ;;  %v2354_v23 = vrot.slane %v7986_v35, 4 }
 0x259   :  { %v2353_v10 = vrot.slane %v7993_v47, 3  ;;  %v8004_v61 = vshll.u32 %v7996_v38, 16  ;;  %v2351_v43 = vor.u32 %v2350_v7, %v2347_v8  ;;  %v1973_v20 = vld [vmem:[#allocation3 + $0x58] sm:$0xf]  ;;  %v2343_v36 = vsel %vm2237_vm15, %v7963_v31, %v7988_v28 }
 0x25a   :  { %v2775_v15 = vsel %vm2668_vm1, %v7932_v34, %v2774_v3  ;;  %v2122_v42 = vsel %vm2046_vm0, %v2117_v48, %v2121_v17  ;;  %v2125_v39 = vor.u32 %v7993_v47, %v2121_v17  ;;  %v2358_v56 = vshrl.u32 %v5180_v59, 16  ;;  %v1974_v48 = vld [vmem:[#allocation3 + $0x5c] sm:$0xf] }
 0x25b   :  { %3043 = vmatprep.mubr.bf16.mxu0 %v2775_v15  ;;  %v2781_v27 = vshrl.u32 %v2122_v42, 16  ;;  %v2784_v60 = vshll.u32 %v2122_v42, 16  ;;  %v2361_v33 = vshll.u32 %v5180_v59, 16  ;;  %v2129_v34 = vrot.slane %v8004_v61, 1 }
 0x25c   :  { %3044 = vmatmul.mubr.bf16.gmra.mxu0 %v2766_v25  ;;  %v5181_v45 = vcombine.low %v1972_v29, %v1973_v20  ;;  %v2352_v50 = vsel %vm2237_vm15, %v2338_v14, %v2351_v43  ;;  %v2360_v41 = vrot.slane %v2358_v56, 3  ;;  %v8012_v17 = vor.u32 %v2354_v23, %v2353_v10 }
 0x25d   :  { %v2783_v5 = vrot.slane %v2781_v27, 2  ;;  %v2786_v62 = vrot.slane %v2784_v60, 3  ;;  %2620 = vmatprep.mubr.bf16.mxu1 %v2352_v50  ;;  %v2363_v8 = vrot.slane %v2361_v33, 4  ;;  %v2130_v25 = vsel %vm2046_vm0, %v2125_v39, %v2129_v34  ;;  %v8021_v60 = vld [vmem:[#allocation3 + $0x60] sm:$0xf] }
 0x25e   :  { %v8015_v7 = vcombine.low %v1973_v20, %v1974_v48  ;;  %v2794_v59 = vshrl.u32 %v2130_v25, 16  ;;  %v2797_v15 = vshll.u32 %v2130_v25, 16  ;;  %v2371_v42 = vshrl.u32 %v5181_v45, 16  ;;  %v1976_v20 = vld [vmem:[#allocation3 + $0x64] sm:$0x7] }
 0x25f   :  { %2621 = vmatmul.mubr.bf16.gmra.mxu1 %v2343_v36  ;;  %v2787_v31 = vor.u32 %v2786_v62, %v2783_v5  ;;  %v2364_v53 = vor.u32 %v2363_v8, %v2360_v41  ;;  %v2374_v14 = vshll.u32 %v5181_v45, 16  ;;  %v2789_v27 = vrot.slane %v7993_v47, 2 }
 0x260   :  { %v8018_v29 = vshll.u32 %v8015_v7, 16  ;;  %v2796_v23 = vrot.slane %v2794_v59, 2  ;;  %v2799_v39 = vrot.slane %v2797_v15, 3  ;;  %v2373_v56 = vrot.slane %v2371_v42, 3 }
 0x261   :  { %v2788_v10 = vsel %vm2668_vm1, %v2774_v3, %v2787_v31  ;;  %v2365_v36 = vsel %vm2237_vm15, %v2351_v43, %v2364_v53  ;;  %v2376_v33 = vrot.slane %v2374_v14, 4  ;;  %v2790_v50 = vrot.slane %v7986_v35, 3 }
 0x262   :  { %3051 = vmatprep.mubr.bf16.mxu0 %v2788_v10  ;;  %v2131_v5 = vshrl.u32 %v7996_v38, 16  ;;  %2628 = vmatprep.mubr.bf16.mxu1 %v2365_v36  ;;  %v2779_v47 = vsel %vm2668_vm1, %v7969_v21, %v7990_v55  ;;  %v2800_v45 = vor.u32 %v2799_v39, %v2796_v23  ;;  %v2367_v3 = vrot.slane %v8004_v61, 4 }
 0x263   :  { %v2377_v62 = vor.u32 %v2376_v33, %v2373_v56  ;;  %v2137_v25 = vrot.slane %v8018_v29, 1  ;;  %v2356_v35 = vsel %vm2237_vm15, %v7988_v28, %v8012_v17  ;;  %v5182_v59 = vcombine.low %v1974_v48, %v8021_v60  ;;  %v2182_v56 = vld [vmem:[#allocation3 + $0x64] sm:$0xf]  ;;  %v8043_v48 = vld [vmem:[#allocation3 + $0x68] sm:$0xf] }
 0x264   :  { %3052 = vmatmul.mubr.bf16.gmra.mxu0 %v2779_v47  ;;  %v2366_v41 = vrot.slane %v2131_v5, 3  ;;  %v2133_v8 = vor.u32 %v2131_v5, %v2129_v34  ;;  %v2801_v43 = vsel %vm2668_vm1, %v2787_v31, %v2800_v45  ;;  %v2791_v15 = vor.u32 %v2790_v50, %v2789_v27 }
 0x265   :  { %3059 = vmatprep.mubr.bf16.mxu0 %v2801_v43  ;;  %v2378_v21 = vsel %vm2237_vm15, %v2364_v53, %v2377_v62  ;;  %v8040_v14 = vcombine.low %v8021_v60, %v1976_v20  ;;  %v2384_v23 = vshrl.u32 %v5182_v59, 16  ;;  %v2387_v39 = vshll.u32 %v5182_v59, 16 }
 0x266   :  { %v2138_v42 = vsel %vm2046_vm0, %v2133_v8, %v2137_v25  ;;  %v2368_v28 = vor.u32 %v2367_v3, %v2366_v41  ;;  %v2139_v31 = vshrl.u32 %v8015_v7, 16  ;;  %v2802_v50 = vrot.slane %v2131_v5, 2 }
 0x267   :  { %2629 = vmatmul.mubr.bf16.gmra.mxu1 %v2356_v35  ;;  %v2807_v34 = vshrl.u32 %v2138_v42, 16  ;;  %v2810_v10 = vshll.u32 %v2138_v42, 16  ;;  %v2386_v27 = vrot.slane %v2384_v23, 3  ;;  %v2389_v33 = vrot.slane %v2387_v39, 4 }
 0x268   :  { %2636 = vmatprep.mubr.bf16.mxu1 %v2378_v21  ;;  %v2803_v20 = vrot.slane %v8004_v61, 3  ;;  %v2141_v47 = vor.u32 %v2139_v31, %v2137_v25  ;;  %v2143_v8 = vshll.u32 %v8040_v14, 16  ;;  %v2792_v35 = vsel %vm2668_vm1, %v7990_v55, %v2791_v15 }
 0x269   :  { %v2809_v36 = vrot.slane %v2807_v34, 2  ;;  %v2812_v53 = vrot.slane %v2810_v10, 3  ;;  %v2390_v3 = vor.u32 %v2389_v33, %v2386_v27  ;;  %v5183_v41 = vcombine.low %v2182_v56, %v8043_v48 }
 0x26a   :  { %v2379_v59 = vrot.slane %v2139_v31, 3  ;;  %v2380_v21 = vrot.slane %v8018_v29, 4  ;;  %v2145_v42 = vrot.slane %v2143_v8, 1  ;;  %v2369_v61 = vsel %vm2237_vm15, %v8012_v17, %v2368_v28 }
 0x26b   :  { %v2813_v43 = vor.u32 %v2812_v53, %v2809_v36  ;;  %v2402_v25 = vshrl.u32 %v5183_v41, 16  ;;  %v2405_v34 = vshll.u32 %v5183_v41, 16  ;;  %v2391_v55 = vsel %vm2237_vm15, %v2377_v62, %v2390_v3  ;;  %v3635_v41 = vld [vmem:[#allocation3 + $0xc] sm:$0xe] }
 0x26c   :  { %3060 = vmatmul.mubr.bf16.gmra.mxu0 %v2792_v35  ;;  %v2804_v10 = vor.u32 %v2803_v20, %v2802_v50  ;;  %v2146_v23 = vsel %vm2046_vm0, %v2141_v47, %v2145_v42  ;;  %v8059_v39 = vcombine.low %v8021_v60, %v2182_v56  ;;  %v2381_v17 = vor.u32 %v2380_v21, %v2379_v59  ;;  %v8062_v35 = vld [vmem:[#allocation3 + $0x10] sm:$0xf]  ;;  %v8068_v59 = vld [vmem:[#allocation3 + $0x14] sm:$0xff]  }
 0x26d   :  { %v2814_v5 = vsel %vm2668_vm1, %v2800_v45, %v2813_v43  ;;  %v2820_v36 = vshrl.u32 %v2146_v23, 16  ;;  %v2823_v53 = vshll.u32 %v2146_v23, 16  ;;  %v2404_v27 = vrot.slane %v2402_v25, 3 }
 0x26e   :  { %3067 = vmatprep.mubr.bf16.mxu0 %v2814_v5  ;;  %v2407_v33 = vrot.slane %v2405_v34, 4  ;;  %v2147_v45 = vshrl.u32 %v8040_v14, 16  ;;  %v2815_v50 = vrot.slane %v2139_v31, 2  ;;  %v2816_v20 = vrot.slane %v8018_v29, 3 }
 0x26f   :  { %2637 = vmatmul.mubr.bf16.gmra.mxu1 %v2369_v61  ;;  %v2822_v5 = vrot.slane %v2820_v36, 2  ;;  %v2825_v62 = vrot.slane %v2823_v53, 3  ;;  %v2393_v60 = vshrl.u32 %v8059_v39, 16  ;;  %v2396_v56 = vshll.u32 %v8059_v39, 16 }
 0x270   :  { %2644 = vmatprep.mubr.bf16.mxu1 %v2391_v55  ;;  %v2149_v47 = vor.u32 %v2147_v45, %v2145_v42  ;;  %v2805_v61 = vsel %vm2668_vm1, %v2791_v15, %v2804_v10  ;;  %v2408_v34 = vor.u32 %v2407_v33, %v2404_v27  ;;  %v8071_v21 = vcombine.low %v3635_v41, %v8062_v35  ;;  %v6130_v33 = vld [vmem:[#allocation3 + $0x8] sm:$0xff]  }
 0x271   :  { %v2826_v25 = vor.u32 %v2825_v62, %v2822_v5  ;;  %v2382_v31 = vsel %vm2237_vm15, %v2368_v28, %v2381_v17  ;;  %v2817_v36 = vor.u32 %v2816_v20, %v2815_v50  ;;  %v2395_v42 = vrot.slane %v2393_v60, 3  ;;  %v8081_v50 = vld [vmem:[#allocation3 + $0x1c] sm:$0xff]  }
 0x272   :  { %v2833_v55 = vshrl.u32 %v2149_v47, 16  ;;  %v2836_v23 = vshll.u32 %v2149_v47, 16  ;;  %v9214_v53 = vshll.u32 %v8071_v21, 16  ;;  %v2398_v15 = vrot.slane %v2396_v56, 4 }
 0x273   :  { %v2827_v29 = vsel %vm2668_vm1, %v2813_v43, %v2826_v25  ;;  %v2409_v41 = vsel %vm2237_vm15, %v2390_v3, %v2408_v34  ;;  %v9221_v62 = vshrl.u32 %v8071_v21, 16  ;;  %v9211_v28 = vshll.u32 %v8068_v59, 16 }
 0x274   :  { %3068 = vmatmul.mubr.bf16.gmra.mxu0 %v2805_v61  ;;  %v2835_v5 = vrot.slane %v2833_v55, 2  ;;  %v2838_v27 = vrot.slane %v2836_v23, 3  ;;  %v3709_v47 = vrot.slane %v9214_v53, 1  ;;  %v2399_v60 = vor.u32 %v2398_v15, %v2395_v42  ;;  %v8124_v53 = vld [vmem:[#allocation3 + $0x34] sm:$0xff]  }
 0x275   :  { %3075 = vmatprep.mubr.bf16.mxu0 %v2827_v29  ;;  %v3207_v56 = vshll.u32 %v6130_v33, 16  ;;  %v2818_v61 = vsel %vm2668_vm1, %v2804_v10, %v2817_v36  ;;  %v2828_v55 = vrot.slane %v2147_v45, 2  ;;  %v2829_v3 = vrot.slane %v2143_v8, 3  ;;  %v6131_v29 = vld [vmem:[#allocation3 + $0x10] sm:$0xff]  }
 0x276   :  { %v2839_v43 = vor.u32 %v2838_v27, %v2835_v5  ;;  %v3710_v20 = vor.u32 %v3709_v47, %v9221_v62  ;;  %v8090_v23 = vrot.slane %v9211_v28, 1  ;;  %v9213_v42 = vshrl.u32 %v8068_v59, 16  ;;  %v3609_v27 = vld [vmem:[#allocation3 + $0xc] sm:$0xf] }
 0x277   :  { %2645 = vmatmul.mubr.bf16.gmra.mxu1 %v2382_v31  ;;  %v9212_v10 = vshll.u32 %v8081_v50, 16  ;;  %v2400_v45 = vsel %vm2237_vm15, %v2381_v17, %v2399_v60  ;;  %v2830_v14 = vor.u32 %v2829_v3, %v2828_v55  ;;  %v3209_v8 = vrot.slane %v3207_v56, 1 }
 0x278   :  { %2652 = vmatprep.mubr.bf16.mxu1 %v2409_v41  ;;  %v2840_v31 = vsel %vm2668_vm1, %v2826_v25, %v2839_v43  ;;  %v3715_v5 = vsel %vm2046_vm0, %v3710_v20, %v8090_v23  ;;  %v3718_v15 = vor.u32 %v9213_v42, %v8090_v23  ;;  %v3205_v41 = vshrl.u32 %v6130_v33, 16 }
 0x279   :  { %v3850_v25 = vshll.u32 %v3715_v5, 16  ;;  %v3212_v47 = vshll.u32 %v6131_v29, 16  ;;  %v3722_v20 = vrot.slane %v9212_v10, 1  ;;  %v5246_v56 = vcombine.low %v3609_v27, %v8062_v35  ;;  %v8116_v35 = vld [vmem:[#allocation3 + $0x2c] sm:$0xff]  }
 0x27a   :  { %v3210_v17 = vor.u32 %v3209_v8, %v3205_v41  ;;  %v9220_v33 = vshrl.u32 %v8081_v50, 16  ;;  %v3848_v10 = vshrl.u32 %v3715_v5, 16  ;;  %v9275_v30 = vshrl.u32 %v8081_v50, 16 }
 0x27b   :  { %v8107_v55 = vsel %vm2046_vm0, %v3718_v15, %v3722_v20  ;;  %v3852_v3 = vrot.slane %v3850_v25, 1  ;;  %v3842_v8 = vshll.u32 %v5246_v56, 16 }
 0x27c   :  { %3076 = vmatmul.mubr.bf16.gmra.mxu0 %v2818_v61  ;;  %v8103_v61 = vld [vmem:[#allocation3 + $0x24] sm:$0xff]   ;;  %v3855_v42 = vshll.u32 %v8107_v55, 16  ;;  %v3726_v15 = vor.u32 %v9220_v33, %v3722_v20  ;;  %v4261_v9 = vrot.slane %v9275_v30, 1 }
 0x27d   :  { %3083 = vmatprep.mubr.bf16.mxu0 %v2840_v31  ;;  %v2831_v31 = vsel %vm2668_vm1, %v2817_v36, %v2830_v14  ;;  %v9215_v28 = vshll.u32 %v8103_v61, 16  ;;  %v3853_v25 = vor.u32 %v3852_v3, %v3848_v10  ;;  %v3840_v3 = vshrl.u32 %v5246_v56, 16 }
 0x27e   :  { %v9217_v56 = vshll.u32 %v8124_v53, 16 }
 0x27f   :  { %2653 = vmatmul.mubr.bf16.gmra.mxu1 %v2400_v45  ;;  %v3214_v45 = vrot.slane %v3212_v47, 1  ;;  %v3730_v41 = vrot.slane %v9215_v28, 1  ;;  %v3857_v47 = vrot.slane %v3855_v42, 1  ;;  %v6145_v42 = vld [vmem:[#allocation3 + $0x20] sm:$0xff]  }
 0x280   :  { %2660 = vmatprep.mubr.bf16.mxu1 %v2408_v34  ;;  %v6140_v34 = vld [vmem:[#allocation3 + $0x18] sm:$0xff]  }
 0x281   :  { %v3215_v36 = vsel %vm2046_vm0, %v3210_v17, %v3214_v45  ;;  %v3220_v27 = vshll.u32 %v6140_v34, 16  ;;  %v9216_v17 = vshll.u32 %v8116_v35, 16  ;;  %v3858_v20 = vsel %vm2046_vm0, %v3853_v25, %v3857_v47  ;;  %v8143_v28 = vld [vmem:[#allocation3 + $0x3c] sm:$0xff]  }
 0x283   :  { %v3222_v10 = vrot.slane %v3220_v27, 1 }
 0x284   :  { %3084 = vmatmul.mubr.bf16.gmra.mxu0 %v2831_v31  ;;  %v3844_v31 = vrot.slane %v3842_v8, 1  ;;  %v3859_v8 = vshrl.u32 %v8107_v55, 16 }
 0x285   :  { %3091 = vmatprep.mubr.bf16.mxu0 %v2839_v43  ;;  %v3216_v43 = vshrl.u32 %v6131_v29, 16  ;;  %v6139_v29 = vld [vmem:[%s9171_s2 + $0x238] sm:$0xff]  }
 0x286   :  { %v3861_v27 = vor.u32 %v3859_v8, %v3857_v47  ;;  %v3746_v8 = vrot.slane %v9217_v56, 1 }
 0x287   :  { %2661 = vmatmul.mubr.bf16.gmra.mxu1 %v2399_v60  ;;  %v3218_v5 = vor.u32 %v3216_v43, %v3214_v45  ;;  %v8121_v60 = vsel %vm2046_vm0, %v3726_v15, %v3730_v41  ;;  %v9219_v45 = vshrl.u32 %v8103_v61, 16  ;;  %v3738_v43 = vrot.slane %v9216_v17, 1 }
 0x288   :  { %3480 = vmatprep.mubr.bf16.mxu1 %v3215_v36  ;;  %v3863_v15 = vshll.u32 %v8121_v60, 16  ;;  %v3867_v56 = vshrl.u32 %v8121_v60, 16 }
 0x289   :  { %v3223_v36 = vsel %vm2046_vm0, %v3218_v5, %v3222_v10  ;;  %v3734_v25 = vor.u32 %v9219_v45, %v3730_v41  ;;  %v6146_v5 = vld [vmem:[%s9171_s2 + $0x230] sm:$0xff]   ;;  %v9218_v41 = vshrl.u32 %v8116_v35, 16 }
 0x28b   :  { %v8153_v47 = vsel %vm2046_vm0, %v3734_v25, %v3738_v43 }
 0x28c   :  { %3092 = vmatmul.mubr.bf16.gmra.mxu0 %v2830_v14  ;;  %v3845_v14 = vor.u32 %v3844_v31, %v3840_v3  ;;  %v6148_v31 = vld [vmem:[#allocation3 + $0x28] sm:$0xff]   ;;  %v3865_v3 = vrot.slane %v3863_v15, 1 }
 0x28d   :  { %4104 = vmatprep.mubr.bf16.mxu0 %v3858_v20  ;;  %v3224_v20 = vshrl.u32 %v6140_v34, 16  ;;  %v3236_v25 = vshll.u32 %v6148_v31, 16 }
 0x28e   :  { %v3846_v34 = vsel %vm2046_vm0, %v3845_v14, %v8090_v23  ;;  %v3866_v15 = vsel %vm2046_vm0, %v3861_v27, %v3865_v3  ;;  %v9222_v23 = vshll.u32 %v8143_v28, 16  ;;  %v8168_v27 = vld [vmem:[#allocation3 + $0x44] sm:$0xff]  }
 0x28f   :  { %3481 = vmatmul.mubr.bf16.vlgmr.msra.gmra.mxu1 %v7664_v1  ;;  %v3228_v1 = vshll.u32 %v6145_v42, 16  ;;  %v3226_v17 = vor.u32 %v3224_v20, %v3222_v10  ;;  %v6150_v10 = vld [vmem:[#allocation3 + $0x30] sm:$0xff]   ;;  %v6151_v20 = vld [vmem:[%s9171_s2 + $0x228] sm:$0xff]   ;;  %v3238_v62 = vrot.slane %v3236_v25, 1 }
 0x290   :  { %5899 = vmatpush3.bf16.msra.mxu1 %v6139_v29  ;;  %3488 = vmatprep.mubr.bf16.mxu1 %v3223_v36  ;;  %v6159_v29 = vld [vmem:[%s9174_s3] sm:$0xff]   ;;  %v3742_v36 = vor.u32 %v9218_v41, %v3738_v43  ;;  %v9224_v43 = vshrl.u32 %v8124_v53, 16  ;;  %v3244_v45 = vshll.u32 %v6150_v10, 16  ;;  %v3754_v33 = vrot.slane %v9222_v23, 1  ;;  %v6160_v23 = vld [vmem:[%s9171_s2 + $0x218] sm:$0xff]  }
 0x291   :  { %5900 = vmatprep.subr.bf16.mxu1 %v9260_v2  ;;  %v3230_v14 = vrot.slane %v3228_v1, 1 }
 0x292   :  { %v8173_v41 = vsel %vm2046_vm0, %v3742_v36, %v3746_v8  ;;  %v3750_v1 = vor.u32 %v9224_v43, %v3746_v8  ;;  %v3246_v25 = vrot.slane %v3244_v45, 1  ;;  %v6165_v43 = vld [vmem:[%s9171_s2 + $0x210] sm:$0xff]  }
 0x293   :  { %v3879_v36 = vshll.u32 %v8173_v41, 16 }
 0x294   :  { %4105 = vmatmul.mubr.bf16.vlgmr.msra.gmra.mxu0 %v3846_v34  ;;  %5901 = vmatpush3.bf16.msra.mxu1 %v6146_v5  ;;  %v3871_v34 = vshll.u32 %v8153_v47, 16  ;;  %v3231_v5 = vsel %vm2046_vm0, %v3226_v17, %v3230_v14 }
 0x295   :  { %4112 = vmatprep.mubr.bf16.mxu0 %v3866_v15  ;;  %5902 = vmatprep.subr.bf16.mxu1 %v9260_v2  ;;  %v3869_v15 = vor.u32 %v3867_v56, %v3865_v3  ;;  %v9223_v56 = vshrl.u32 %v8143_v28, 16  ;;  %v9225_v3 = vshll.u32 %v8168_v27, 16 }
 0x296   :  { %5967 = vmatpush3.bf16.msra.mxu0 %v6159_v29  ;;  %v6154_v29 = vld [vmem:[%s9171_s2 + $0x220] sm:$0xff]   ;;  %v3873_v17 = vrot.slane %v3871_v34, 1 }
 0x297   :  { %3489 = vmatmul.mubr.bf16.gmra.mxu1 %v7674_v26  ;;  %v3232_v26 = vshrl.u32 %v6145_v42, 16  ;;  %v3758_v34 = vor.u32 %v9223_v56, %v3754_v33 }
 0x298   :  { %3496 = vmatprep.mubr.bf16.mxu1 %v3231_v5  ;;  %5903 = vmatpush3.bf16.msra.mxu1 %v6151_v20  ;;  %v3240_v20 = vshrl.u32 %v6148_v31, 16  ;;  %v8189_v5 = vsel %vm2046_vm0, %v3750_v1, %v3754_v33  ;;  %v3874_v42 = vsel %vm2046_vm0, %v3869_v15, %v3873_v17  ;;  %v8199_v1 = vld [vmem:[#allocation3 + $0x4c] sm:$0xff]   ;;  %v3252_v15 = vshll.u32 %v8184_v63, 16 }
 0x299   :  { %5904 = vmatprep.subr.bf16.mxu1 %v9260_v2  ;;  %v3234_v8 = vor.u32 %v3232_v26, %v3230_v14  ;;  %v3875_v14 = vshrl.u32 %v8153_v47, 16  ;;  %v3248_v26 = vshrl.u32 %v6150_v10, 16  ;;  %v3887_v45 = vshll.u32 %v8189_v5, 16 }
 0x29a   :  { %v3242_v31 = vor.u32 %v3240_v20, %v3238_v62  ;;  %v3762_v33 = vrot.slane %v9225_v3, 1  ;;  %v3883_v20 = vshrl.u32 %v8173_v41, 16 }
 0x29b   :  { %v3877_v10 = vor.u32 %v3875_v14, %v3873_v17  ;;  %v3250_v56 = vor.u32 %v3248_v26, %v3246_v25  ;;  %v8220_v17 = vrot.slane %v3252_v15, 1  ;;  %v3764_v26 = vshrl.u32 %v8168_v27, 16 }
 0x29c   :  { %4113 = vmatmul.mubr.bf16.gmra.mxu0 %v8107_v55  ;;  %5905 = vmatpush3.bf16.msra.mxu1 %v6154_v29  ;;  %v3881_v55 = vrot.slane %v3879_v36, 1  ;;  %v3239_v29 = vsel %vm2046_vm0, %v3234_v8, %v3238_v62  ;;  %v8212_v36 = vsel %vm2046_vm0, %v3758_v34, %v3762_v33  ;;  %v3889_v8 = vrot.slane %v3887_v45, 1 }
 0x29d   :  { %4120 = vmatprep.mubr.bf16.mxu0 %v3874_v42  ;;  %5906 = vmatprep.subr.bf16.mxu1 %v9260_v2  ;;  %v8208_v42 = vld [vmem:[#allocation3 + $0x40] sm:$0xff]   ;;  %v3895_v14 = vshll.u32 %v8212_v36, 16  ;;  %v8230_v3 = vsel %vm2046_vm0, %v3250_v56, %v8220_v17  ;;  %v9270_v45 = vshrl.u32 %v8071_v21, 16 }
 0x29e   :  { %v3885_v62 = vor.u32 %v3883_v20, %v3881_v55  ;;  %v8238_v20 = vor.u32 %v3764_v26, %v3762_v33  ;;  %v8254_v33 = vld [vmem:[#allocation3 + $0x5c] sm:$0xff]  }
 0x29f   :  { %3497 = vmatmul.mubr.bf16.gmra.mxu1 %v7679_v54  ;;  %v3247_v54 = vsel %vm2046_vm0, %v3242_v31, %v3246_v25  ;;  %v3891_v25 = vshrl.u32 %v8189_v5, 16  ;;  %v6168_v31 = vld [vmem:[%s9171_s2 + $0x208] sm:$0xff]   ;;  %v4254_v15 = vrot.slane %v9270_v45, 1  ;;  %v8261_v16 = vrot.slane %v3895_v14, 1 }
 0x2a0   :  { %3504 = vmatprep.mubr.bf16.mxu1 %v3239_v29  ;;  %5907 = vmatpush3.bf16.msra.mxu1 %v6160_v23  ;;  %v3882_v29 = vsel %vm2046_vm0, %v3877_v10, %v3881_v55  ;;  %v8244_v10 = vld [vmem:[#allocation3 + $0x54] sm:$0xff]   ;;  %v9273_v23 = vshrl.u32 %v8068_v59, 16  ;;  %v3890_v40 = vsel %vm2046_vm0, %v3885_v62, %v3889_v8 }
 0x2a1   :  { %5908 = vmatprep.subr.bf16.mxu1 %v9260_v2  ;;  %v8252_v45 = vor.u32 %v3891_v25, %v3889_v8  ;;  %v8266_v8 = vld [vmem:[#allocation3 + $0x64] sm:$0xff]   ;;  %v9278_v25 = vshll.u32 %v8103_v61, 16  ;;  %v9226_v62 = vshrl.u32 %v8244_v10, 16 }
 0x2a2   :  { %v4257_v34 = vrot.slane %v9273_v23, 1  ;;  %v9276_v23 = vshll.u32 %v8081_v50, 16  ;;  %v9227_v50 = vshll.u32 %v8244_v10, 16 }
 0x2a4   :  { %4121 = vmatmul.mubr.bf16.gmra.mxu0 %v8121_v60  ;;  %5909 = vmatpush3.bf16.msra.mxu1 %v6165_v43  ;;  %v9271_v60 = vshll.u32 %v8199_v1, 16  ;;  %v9272_v43 = vshll.u32 %v8071_v21, 16 }
 0x2a5   :  { %4128 = vmatprep.mubr.bf16.mxu0 %v3882_v29  ;;  %5910 = vmatprep.subr.bf16.mxu1 %v9260_v2  ;;  %v9274_v29 = vshll.u32 %v8068_v59, 16  ;;  %v6171_v59 = vld [vmem:[%s9171_s2 + $0x200] sm:$0xff]  }
 0x2a6   :  { %v8242_v55 = vrot.slane %v9271_v60, 1  ;;  %v4255_v56 = vrot.slane %v9272_v43, 2  ;;  %v4262_v43 = vrot.slane %v9276_v23, 2 }
 0x2a7   :  { %v4258_v60 = vrot.slane %v9274_v29, 2  ;;  %3505 = vmatmul.mubr.bf16.gmra.mxu1 %v7728_v11  ;;  %v9277_v11 = vshrl.u32 %v8103_v61, 16 }
 0x2a8   :  { %v4256_v21 = vor.u32 %v4255_v56, %v4254_v15  ;;  %3512 = vmatprep.mubr.bf16.mxu1 %v3247_v54  ;;  %5911 = vmatpush3.bf16.msra.mxu1 %v6168_v31  ;;  %v4266_v15 = vrot.slane %v9278_v25, 2  ;;  %v4263_v54 = vor.u32 %v4262_v43, %v4261_v9  ;;  %v9279_v56 = vshrl.u32 %v8116_v35, 16 }
 0x2a9   :  { %v4259_v30 = vor.u32 %v4258_v60, %v4257_v34  ;;  %v4265_v14 = vrot.slane %v9277_v11, 1  ;;  %5912 = vmatprep.subr.bf16.mxu1 %v9260_v2  ;;  %v9280_v31 = vshll.u32 %v8116_v35, 16  ;;  %v9281_v43 = vshrl.u32 %v8124_v53, 16 }
 0x2aa   :  { %v4269_v29 = vrot.slane %v9279_v56, 1  ;;  %v9285_v35 = vshll.u32 %v8168_v27, 16  ;;  %v4233_v27 = vld [vmem:[#allocation3 + $0x70] sm:$0x3] }
 0x2ab   :  { %v4270_v23 = vrot.slane %v9280_v31, 2  ;;  %v8284_v60 = vsel %vm4253_vm2, %v4256_v21, %v4259_v30  ;;  %v4267_v61 = vor.u32 %v4266_v15, %v4265_v14  ;;  %v8288_v25 = vsel %vm4253_vm2, %v4259_v30, %v4263_v54 }
 0x2ac   :  { %v4273_v56 = vrot.slane %v9281_v43, 1  ;;  %4129 = vmatmul.mubr.bf16.gmra.mxu0 %v8153_v47  ;;  %5913 = vmatpush3.bf16.msra.mxu1 %v6171_v59  ;;  %v9282_v21 = vshll.u32 %v8124_v53, 16  ;;  %v9283_v15 = vshrl.u32 %v8143_v28, 16  ;;  %v3796_v30 = vshrl.u32 %v8266_v8, 16  ;;  %v8307_v59 = vld [vmem:[#allocation3 + $0x6c] sm:$0xf] }
 0x2ad   :  { %v4271_v9 = vor.u32 %v4270_v23, %v4269_v29  ;;  %v8295_v31 = vsel %vm4253_vm2, %v4263_v54, %v4267_v61  ;;  %4136 = vmatprep.mubr.bf16.mxu0 %v3890_v40  ;;  %v9284_v47 = vshll.u32 %v8143_v28, 16  ;;  %v4281_v43 = vrot.slane %v3764_v26, 1 }
 0x2ae   :  { %v4274_v14 = vrot.slane %v9282_v21, 2  ;;  %v4277_v34 = vrot.slane %v9283_v15, 1  ;;  %v4282_v53 = vrot.slane %v9285_v35, 2  ;;  %v9286_v21 = vshrl.u32 %v8199_v1, 16 }
 0x2af   :  { %v8303_v29 = vsel %vm4253_vm2, %v4267_v61, %v4271_v9  ;;  %v4278_v23 = vrot.slane %v9284_v47, 2  ;;  %v9287_v40 = vshll.u32 %v8199_v1, 16  ;;  %3513 = vmatmul.mubr.bf16.gmra.mxu1 %v7771_v24  ;;  %v4289_v28 = vrot.slane %v9226_v62, 1 }
 0x2b0   :  { %v4275_v54 = vor.u32 %v4274_v14, %v4273_v56  ;;  %v4285_v11 = vrot.slane %v9286_v21, 1  ;;  %v4290_v26 = vrot.slane %v9227_v50, 2  ;;  %v9288_v56 = vshrl.u32 %v8254_v33, 16  ;;  %3520 = vmatprep.mubr.bf16.mxu1 %v8230_v3 }
 0x2b1   :  { %v4286_v15 = vrot.slane %v9287_v40, 2  ;;  %v4279_v61 = vor.u32 %v4278_v23, %v4277_v34  ;;  %v4283_v47 = vor.u32 %v4282_v53, %v4281_v43  ;;  %v9289_v24 = vshll.u32 %v8254_v33, 16 }
 0x2b2   :  { %v4293_v14 = vrot.slane %v9288_v56, 1  ;;  %v8324_v35 = vsel %vm4253_vm2, %v4271_v9, %v4275_v54  ;;  %v4291_v40 = vor.u32 %v4290_v26, %v4289_v28  ;;  %v4297_v62 = vrot.slane %v3796_v30, 1 }
 0x2b3   :  { %v4287_v21 = vor.u32 %v4286_v15, %v4285_v11  ;;  %v4294_v34 = vrot.slane %v9289_v24, 2  ;;  %v8329_v23 = vsel %vm4253_vm2, %v4275_v54, %v4279_v61  ;;  %v9290_v56 = vshll.u32 %v8266_v8, 16 }
 0x2b4   :  { %v8336_v3 = vsel %vm4253_vm2, %v4279_v61, %v4283_v47  ;;  %v5276_v43 = vcombine.low %v8307_v59, %v4233_v27  ;;  %v9291_v54 = vshrl.u32 %v8184_v63, 16  ;;  %v8348_v15 = vsel %vm2046_vm0, %v8238_v20, %v8242_v55  ;;  %4137 = vmatmul.mubr.bf16.gmra.mxu0 %v8173_v41 }
 0x2b5   :  { %v4298_v50 = vrot.slane %v9290_v56, 2  ;;  %v8339_v9 = vsel %vm4253_vm2, %v4283_v47, %v4287_v21  ;;  %v4295_v11 = vor.u32 %v4294_v34, %v4293_v14  ;;  %v8351_v28 = vsel %vm4253_vm2, %v4287_v21, %v4291_v40  ;;  %v6158_v47 = vld [vmem:[#allocation3 + $0x48] sm:$0xff]  }
 0x2b6   :  { %v3258_v53 = vor.u32 %v9291_v54, %v8220_v17  ;;  %v3898_v26 = vsel %vm2046_vm0, %v8252_v45, %v8261_v16  ;;  %v4302_v63 = vshrl.u32 %v5276_v43, 16  ;;  %v4305_v17 = vshll.u32 %v5276_v43, 16 }
 0x2b7   :  { %v4299_v61 = vor.u32 %v4298_v50, %v4297_v62  ;;  %v8358_v14 = vsel %vm4253_vm2, %v4291_v40, %v4295_v11  ;;  %4144 = vmatprep.mubr.bf16.mxu0 %v3898_v26  ;;  %v9292_v27 = vshll.u32 %v8208_v42, 16  ;;  %v3899_v62 = vshrl.u32 %v8212_v36, 16  ;;  %3521 = vmatmul.mubr.bf16.gmra.mxu1 %v7813_v37 }
 0x2b8   :  { %v3903_v41 = vshll.u32 %v8348_v15, 16  ;;  %v4304_v50 = vrot.slane %v4302_v63, 1  ;;  %v4307_v24 = vrot.slane %v4305_v17, 2  ;;  %v9293_v34 = vshrl.u32 %v8199_v1, 16 }
 0x2b9   :  { %v3262_v20 = vrot.slane %v9292_v27, 1  ;;  %v8363_v21 = vsel %vm4253_vm2, %v4295_v11, %v4299_v61  ;;  %v3901_v56 = vor.u32 %v3899_v62, %v8261_v16  ;;  %v3264_v11 = vshrl.u32 %v8208_v42, 16  ;;  %v6162_v27 = vld [vmem:[#allocation3 + $0x50] sm:$0xff]  }
 0x2ba   :  { %v3774_v40 = vor.u32 %v9293_v34, %v8242_v55  ;;  %v8373_v43 = vor.u32 %v4307_v24, %v4304_v50  ;;  %v3268_v54 = vshll.u32 %v6158_v47, 16  ;;  %v9294_v26 = vshll.u32 %v8244_v10, 16 }
 0x2bb   :  { %v3263_v45 = vsel %vm2046_vm0, %v3258_v53, %v3262_v20  ;;  %v3905_v17 = vrot.slane %v3903_v41, 1  ;;  %v3266_v53 = vor.u32 %v3264_v11, %v3262_v20  ;;  %v3907_v42 = vshrl.u32 %v8348_v15, 16 }
 0x2bc   :  { %3528 = vmatprep.mubr.bf16.mxu1 %v3263_v45  ;;  %v3778_v63 = vrot.slane %v9294_v26, 1  ;;  %v8380_v37 = vsel %vm4253_vm2, %v4299_v61, %v8373_v43  ;;  %4145 = vmatmul.mubr.bf16.gmra.mxu0 %v8189_v5  ;;  %v3270_v55 = vrot.slane %v3268_v54, 1  ;;  %v9295_v61 = vshrl.u32 %v8244_v10, 16  ;;  %v3634_v54 = vld [vmem:[#allocation3 + $0x70] sm:$0x1]  ;;  %v6164_v10 = vld [vmem:[#allocation3 + $0x58] sm:$0xff]  }
 0x2bd   :  { %v3906_v16 = vsel %vm2046_vm0, %v3901_v56, %v3905_v17  ;;  %v3909_v20 = vor.u32 %v3907_v42, %v3905_v17  ;;  %v3272_v24 = vshrl.u32 %v6158_v47, 16  ;;  %v3276_v45 = vshll.u32 %v6162_v27, 16 }
 0x2be   :  { %v3779_v1 = vsel %vm2046_vm0, %v3774_v40, %v3778_v63  ;;  %4152 = vmatprep.mubr.bf16.mxu0 %v3906_v16  ;;  %v3271_v41 = vsel %vm2046_vm0, %v3266_v53, %v3270_v55  ;;  %v3782_v50 = vor.u32 %v9295_v61, %v3778_v63  ;;  %v9296_v5 = vshll.u32 %v8254_v33, 16 }
 0x2bf   :  { %v3911_v62 = vshll.u32 %v3779_v1, 16  ;;  %3529 = vmatmul.mubr.bf16.gmra.mxu1 %v7856_v46  ;;  %v3274_v56 = vor.u32 %v3272_v24, %v3270_v55  ;;  %v3278_v26 = vrot.slane %v3276_v45, 1  ;;  %v3915_v63 = vshrl.u32 %v3779_v1, 16 }
 0x2c0   :  { %3536 = vmatprep.mubr.bf16.mxu1 %v3271_v41  ;;  %v3786_v34 = vrot.slane %v9296_v5, 1  ;;  %v9297_v17 = vshrl.u32 %v8254_v33, 16  ;;  %v5258_v55 = vcombine.low %v8307_v59, %v3634_v54  ;;  %v9298_v41 = vshll.u32 %v8266_v8, 16  ;;  %v6167_v5 = vld [vmem:[#allocation3 + $0x60] sm:$0xff]  }
 0x2c1   :  { %v3913_v40 = vrot.slane %v3911_v62, 1  ;;  %v3279_v47 = vsel %vm2046_vm0, %v3274_v56, %v3278_v26  ;;  %v3284_v62 = vshll.u32 %v6164_v10, 16  ;;  %v3288_v54 = vshrl.u32 %v6164_v10, 16 }
 0x2c2   :  { %v3787_v11 = vsel %vm2046_vm0, %v3782_v50, %v3786_v34  ;;  %v3790_v16 = vor.u32 %v9297_v17, %v3786_v34  ;;  %v3794_v61 = vrot.slane %v9298_v41, 1  ;;  %v3800_v45 = vshll.u32 %v5258_v55, 16 }
 0x2c3   :  { %v3914_v46 = vsel %vm2046_vm0, %v3909_v20, %v3913_v40  ;;  %v3919_v53 = vshll.u32 %v3787_v11, 16  ;;  %v3917_v42 = vor.u32 %v3915_v63, %v3913_v40  ;;  %v3286_v33 = vrot.slane %v3284_v62, 1 }
 0x2c4   :  { %4153 = vmatmul.mubr.bf16.gmra.mxu0 %v8212_v36  ;;  %v3280_v36 = vshrl.u32 %v6162_v27, 16  ;;  %v3795_v24 = vsel %vm2046_vm0, %v3790_v16, %v3794_v61  ;;  %v3923_v59 = vshrl.u32 %v3787_v11, 16  ;;  %v3798_v40 = vor.u32 %v3796_v30, %v3794_v61  ;;  %v6170_v16 = vld [vmem:[#allocation3 + $0x68] sm:$0x1f]  }
 0x2c5   :  { %4160 = vmatprep.mubr.bf16.mxu0 %v3914_v46  ;;  %v3921_v50 = vrot.slane %v3919_v53, 1  ;;  %v3927_v34 = vshll.u32 %v3795_v24, 16  ;;  %v3802_v56 = vrot.slane %v3800_v45, 1  ;;  %v3290_v63 = vor.u32 %v3288_v54, %v3286_v33 }
 0x2c6   :  { %v3282_v20 = vor.u32 %v3280_v36, %v3278_v26  ;;  %v3292_v26 = vshll.u32 %v6167_v5, 16  ;;  %v3804_v17 = vshrl.u32 %v5258_v55, 16  ;;  %v3296_v62 = vshrl.u32 %v6167_v5, 16 }
 0x2c7   :  { %3537 = vmatmul.mubr.bf16.gmra.mxu1 %v7960_v57  ;;  %v3922_v57 = vsel %vm2046_vm0, %v3917_v42, %v3921_v50  ;;  %v3925_v46 = vor.u32 %v3923_v59, %v3921_v50  ;;  %v3803_v53 = vsel %vm2046_vm0, %v3798_v40, %v3802_v56  ;;  %v3931_v42 = vshrl.u32 %v3795_v24, 16 }
 0x2c8   :  { %3544 = vmatprep.mubr.bf16.mxu1 %v3279_v47  ;;  %v3287_v27 = vsel %vm2046_vm0, %v3282_v20, %v3286_v33  ;;  %v3935_v36 = vshll.u32 %v3803_v53, 16  ;;  %v3806_v10 = vor.u32 %v3804_v17, %v3802_v56  ;;  %v3300_v41 = vshll.u32 %v6170_v16, 16 }
 0x2c9   :  { %v3939_v45 = vshrl.u32 %v3803_v53, 16 }
 0x2ca   :  { %v3937_v61 = vrot.slane %v3935_v36, 1  ;;  %v3943_v55 = vshll.u32 %v3806_v10, 16  ;;  %v3302_v20 = vrot.slane %v3300_v41, 1 }
 0x2cc   :  { %4161 = vmatmul.mubr.bf16.gmra.mxu0 %v8348_v15  ;;  %v3929_v15 = vrot.slane %v3927_v34, 1  ;;  %v3945_v33 = vrot.slane %v3943_v55, 1  ;;  %v3304_v34 = vshrl.u32 %v6170_v16, 16 }
 0x2cd   :  { %4168 = vmatprep.mubr.bf16.mxu0 %v3922_v57  ;;  %v3941_v57 = vor.u32 %v3939_v45, %v3937_v61 }
 0x2ce   :  { %v3930_v47 = vsel %vm2046_vm0, %v3925_v46, %v3929_v15  ;;  %v3933_v30 = vor.u32 %v3931_v42, %v3929_v15  ;;  %v3306_v40 = vor.u32 %v3304_v34, %v3302_v20 }
 0x2cf   :  { %3545 = vmatmul.mubr.bf16.gmra.mxu1 %v7978_v19  ;;  %v3294_v19 = vrot.slane %v3292_v26, 1  ;;  %v3946_v5 = vsel %vm2046_vm0, %v3941_v57, %v3945_v33 }
 0x2d0   :  { %3552 = vmatprep.mubr.bf16.mxu1 %v3287_v27  ;;  %v3947_v27 = vshrl.u32 %v3806_v10, 16 }
 0x2d1   :  { %v3295_v8 = vsel %vm2046_vm0, %v3290_v63, %v3294_v19  ;;  %v3298_v50 = vor.u32 %v3296_v62, %v3294_v19 }
 0x2d2   :  { %v3949_v54 = vor.u32 %v3947_v27, %v3945_v33 }
 0x2d4   :  { %4169 = vmatmul.mubr.bf16.gmra.mxu0 %v3779_v1  ;;  %v3938_v1 = vsel %vm2046_vm0, %v3933_v30, %v3937_v61 }
 0x2d5   :  { %4176 = vmatprep.mubr.bf16.mxu0 %v3930_v47 }
 0x2d7   :  { %3553 = vmatmul.mubr.bf16.gmra.mxu1 %v7996_v38  ;;  %v3303_v38 = vsel %vm2046_vm0, %v3298_v50, %v3302_v20 }
 0x2d8   :  { %3560 = vmatprep.mubr.bf16.mxu1 %v3295_v8 }
 0x2dc   :  { %4177 = vmatmul.mubr.bf16.gmra.mxu0 %v3787_v11 }
 0x2dd   :  { %4184 = vmatprep.mubr.bf16.mxu0 %v3938_v1 }
 0x2df   :  { %3561 = vmatmul.mubr.bf16.gmra.mxu1 %v8015_v7 }
 0x2e0   :  { %3568 = vmatprep.mubr.bf16.mxu1 %v3303_v38 }
 0x2e1   :  { %v5443_v59 = vpop.f32.mrf.mxu1 }
 0x2e3   :  { %v5444_v11 = vpop.f32.mrf.mxu1 }
 0x2e4   :  { %4185 = vmatmul.mubr.bf16.gmra.mxu0 %v3795_v24  ;;  %v5445_v56 = vadd.f32 %v5444_v11, %v5443_v59  ;;  %v5216_v24 = vcombine.low %v8043_v48, %v8043_v48 }
 0x2e5   :  { %4192 = vmatprep.mubr.bf16.mxu0 %v3946_v5  ;;  %v5446_v46 = vpop.f32.mrf.mxu1 }
 0x2e7   :  { %3569 = vmatmul.mubr.bf16.gmra.mxu1 %v8059_v39  ;;  %v5447_v7 = vpop.f32.mrf.mxu1 }
 0x2e8   :  { %3576 = vmatprep.mubr.bf16.mxu1 %v3306_v40  ;;  %v5448_v26 = vadd.f32 %v5447_v7, %v5446_v46 }
 0x2e9   :  { %v5449_v63 = vpop.f32.mrf.mxu1 }
 0x2ea   :  { %v5537_v15 = vpop.f32.mrf.mxu0 }
 0x2eb   :  { %v5450_v17 = vpop.f32.mrf.mxu1 }
 0x2ec   :  { %4193 = vmatmul.mubr.bf16.gmra.mxu0 %v3803_v53  ;;  %v5538_v47 = vpop.f32.mrf.mxu0  ;;  %v5451_v16 = vadd.f32 %v5450_v17, %v5449_v63  ;;  %v6174_v63 = vld [vmem:[%s9168_s0 + $0x10] sm:$0xff]  }
 0x2ed   :  { %4200 = vmatprep.mubr.bf16.mxu0 %v3949_v54  ;;  %v5539_v19 = vadd.f32 %v5538_v47, %v5537_v15  ;;  %v5452_v36 = vpop.f32.mrf.mxu1 }
 0x2ee   :  { %v5540_v42 = vpop.f32.mrf.mxu0 }
 0x2ef   :  { %3577 = vmatmul.mubr.bf16.gmra.mxu1 %v5216_v24  ;;  %v8420_v39 = vadd.f32 %v5539_v19, %v5445_v56  ;;  %v5453_v30 = vpop.f32.mrf.mxu1 }
 0x2f0   :  { %5914 = vmatprep.mubr.msk.bf16.mxu1 %vm6195_vm10, %v9260_v2  ;;  %v5541_v8 = vpop.f32.mrf.mxu0  ;;  %v5454_v53 = vadd.f32 %v5453_v30, %v5452_v36 }
 0x2f1   :  { %v5542_v62 = vadd.f32 %v5541_v8, %v5540_v42  ;;  %v5455_v61 = vpop.f32.mrf.mxu1 }
 0x2f2   :  { %v5543_v41 = vpop.f32.mrf.mxu0 }
 0x2f3   :  { %v8424_v48 = vadd.f32 %v5542_v62, %v5448_v26  ;;  %v5456_v1 = vpop.f32.mrf.mxu1 }
 0x2f4   :  { %4201 = vmatmul.mubr.bf16.gmra.mxu0 %v3806_v10  ;;  %v5544_v50 = vpop.f32.mrf.mxu0  ;;  %v5457_v20 = vadd.f32 %v5456_v1, %v5455_v61  ;;  %v6173_v10 = vld [vmem:[%s9168_s0 + $0x8] sm:$0xff]  }
 0x2f5   :  { %5968 = vmatprep.mubr.msk.bf16.mxu0 %vm6195_vm10, %v9260_v2  ;;  %v5545_v55 = vadd.f32 %v5544_v50, %v5543_v41  ;;  %v5458_v38 = vpop.f32.mrf.mxu1  ;;  %v6175_v50 = vld [vmem:[%s9168_s0 + $0x18] sm:$0xff]  }
 0x2f6   :  { %v5546_v45 = vpop.f32.mrf.mxu0 }
 0x2f7   :  { %5915 = vmatmul.mubr.bf16.vlgmr.msra.gmra.mxu1 %v8284_v60  ;;  %v8429_v57 = vadd.f32 %v5545_v55, %v5451_v16  ;;  %v5459_v59 = vpop.f32.mrf.mxu1 }
 0x2f8   :  { %5918 = vmatprep.mubr.msk.bf16.mxu1 %vm6195_vm10, %v9260_v2  ;;  %v5547_v33 = vpop.f32.mrf.mxu0  ;;  %v5460_v34 = vadd.f32 %v5459_v59, %v5458_v38 }
 0x2f9   :  { %v5548_v5 = vadd.f32 %v5547_v33, %v5546_v45  ;;  %v5461_v27 = vpop.f32.mrf.mxu1 }
 0x2fa   :  { %v5549_v11 = vpop.f32.mrf.mxu0 }
 0x2fb   :  { %v8436_v40 = vadd.f32 %v5548_v5, %v5454_v53  ;;  %v5462_v56 = vpop.f32.mrf.mxu1 }
 0x2fc   :  { %5969 = vmatmul.mubr.msk.bf16.vlgmr.msra.gmra.mxu0 %vm4782_vm3, %v6173_v10  ;;  %v5550_v60 = vpop.f32.mrf.mxu0  ;;  %v5463_v7 = vadd.f32 %v5462_v56, %v5461_v27  ;;  %v6176_v56 = vld [vmem:[%s9168_s0 + $0x20] sm:$0xff]  }
 0x2fd   :  { %5972 = vmatprep.mubr.msk.bf16.mxu0 %vm6195_vm10, %v9260_v2  ;;  %v5551_v46 = vadd.f32 %v5550_v60, %v5549_v11  ;;  %v5464_v26 = vpop.f32.mrf.mxu1 }
 0x2fe   :  { %v5552_v54 = vpop.f32.mrf.mxu0 }
 0x2ff   :  { %5919 = vmatmul.mubr.bf16.gmra.mxu1 %v8288_v25  ;;  %v8442_v15 = vadd.f32 %v5551_v46, %v5457_v20  ;;  %v5465_v47 = vpop.f32.mrf.mxu1 }
 0x300   :  { %5922 = vmatprep.mubr.msk.bf16.mxu1 %vm6195_vm10, %v9260_v2  ;;  %v5553_v24 = vpop.f32.mrf.mxu0  ;;  %v5466_v19 = vadd.f32 %v5465_v47, %v5464_v26 }
 0x301   :  { %v5554_v17 = vadd.f32 %v5553_v24, %v5552_v54  ;;  %v5467_v42 = vpop.f32.mrf.mxu1 }
 0x302   :  { %v5555_v16 = vpop.f32.mrf.mxu0 }
 0x303   :  { %v8449_v36 = vadd.f32 %v5554_v17, %v5460_v34  ;;  %v5468_v8 = vpop.f32.mrf.mxu1 }
 0x304   :  { %5973 = vmatmul.mubr.msk.bf16.gmra.mxu0 %vm4782_vm3, %v6174_v63  ;;  %v5556_v25 = vpop.f32.mrf.mxu0  ;;  %v5469_v62 = vadd.f32 %v5468_v8, %v5467_v42  ;;  %v6177_v42 = vld [vmem:[%s9168_s0 + $0x28] sm:$0xff]  }
 0x305   :  { %5976 = vmatprep.mubr.msk.bf16.mxu0 %vm6195_vm10, %v9260_v2  ;;  %v5557_v30 = vadd.f32 %v5556_v25, %v5555_v16  ;;  %v5470_v41 = vpop.f32.mrf.mxu1 }
 0x306   :  { %v5558_v53 = vpop.f32.mrf.mxu0 }
 0x307   :  { %5923 = vmatmul.mubr.bf16.gmra.mxu1 %v8295_v31  ;;  %v8455_v61 = vadd.f32 %v5557_v30, %v5463_v7  ;;  %v5471_v55 = vpop.f32.mrf.mxu1 }
 0x308   :  { %5926 = vmatprep.mubr.msk.bf16.mxu1 %vm6195_vm10, %v9260_v2  ;;  %v5559_v1 = vpop.f32.mrf.mxu0  ;;  %v5472_v45 = vadd.f32 %v5471_v55, %v5470_v41 }
 0x309   :  { %v5560_v20 = vadd.f32 %v5559_v1, %v5558_v53  ;;  %v5473_v10 = vpop.f32.mrf.mxu1 }
 0x30a   :  { %v5561_v38 = vpop.f32.mrf.mxu0 }
 0x30b   :  { %v8462_v33 = vadd.f32 %v5560_v20, %v5466_v19  ;;  %v5474_v59 = vpop.f32.mrf.mxu1 }
 0x30c   :  { %5977 = vmatmul.mubr.msk.bf16.gmra.mxu0 %vm4782_vm3, %v6175_v50  ;;  %v5562_v31 = vpop.f32.mrf.mxu0  ;;  %v5475_v34 = vadd.f32 %v5474_v59, %v5473_v10  ;;  %v6178_v10 = vld [vmem:[%s9168_s0 + $0x30] sm:$0xff]  }
 0x30d   :  { %5980 = vmatprep.mubr.msk.bf16.mxu0 %vm6195_vm10, %v9260_v2  ;;  %v5563_v5 = vadd.f32 %v5562_v31, %v5561_v38  ;;  %v5476_v27 = vpop.f32.mrf.mxu1 }
 0x30e   :  { %v5564_v11 = vpop.f32.mrf.mxu0 }
 0x30f   :  { %5927 = vmatmul.mubr.bf16.gmra.mxu1 %v8303_v29  ;;  %v8468_v60 = vadd.f32 %v5563_v5, %v5469_v62  ;;  %v5477_v7 = vpop.f32.mrf.mxu1 }
 0x310   :  { %5930 = vmatprep.mubr.msk.bf16.mxu1 %vm6195_vm10, %v9260_v2  ;;  %v5565_v46 = vpop.f32.mrf.mxu0  ;;  %v5478_v26 = vadd.f32 %v5477_v7, %v5476_v27 }
 0x311   :  { %v5566_v54 = vadd.f32 %v5565_v46, %v5564_v11 }
 0x312   :  { %v5567_v63 = vpop.f32.mrf.mxu0 }
 0x313   :  { %v8475_v24 = vadd.f32 %v5566_v54, %v5472_v45 }
 0x314   :  { %5981 = vmatmul.mubr.msk.bf16.gmra.mxu0 %vm4782_vm3, %v6176_v56  ;;  %v5568_v29 = vpop.f32.mrf.mxu0 }
 0x315   :  { %5984 = vmatprep.mubr.msk.bf16.mxu0 %vm6195_vm10, %v9260_v2  ;;  %v5569_v47 = vadd.f32 %v5568_v29, %v5567_v63 }
 0x316   :  { %v5570_v19 = vpop.f32.mrf.mxu0 }
 0x317   :  { %v5479_v17 = vpop.f32.mrf.mxu1  ;;  %5931 = vmatmul.mubr.bf16.gmra.mxu1 %v8324_v35  ;;  %v8481_v16 = vadd.f32 %v5569_v47, %v5475_v34  ;;  %v6180_v47 = vld [vmem:[%s9168_s0 + $0x38] sm:$0xff]  }
 0x318   :  { %5934 = vmatprep.mubr.msk.bf16.mxu1 %vm6195_vm10, %v9260_v2  ;;  %v5571_v8 = vpop.f32.mrf.mxu0 }
 0x319   :  { %v5480_v25 = vpop.f32.mrf.mxu1  ;;  %v5572_v62 = vadd.f32 %v5571_v8, %v5570_v19 }
 0x31a   :  { %v5481_v30 = vadd.f32 %v5480_v25, %v5479_v17 }
 0x31b   :  { %v5482_v53 = vpop.f32.mrf.mxu1  ;;  %v8488_v41 = vadd.f32 %v5572_v62, %v5478_v26 }
 0x31c   :  { %v5573_v50 = vpop.f32.mrf.mxu0  ;;  %5985 = vmatmul.mubr.msk.bf16.gmra.mxu0 %vm4782_vm3, %v6177_v42 }
 0x31d   :  { %v5483_v35 = vpop.f32.mrf.mxu1  ;;  %5988 = vmatprep.mubr.msk.bf16.mxu0 %vm6195_vm10, %v9260_v2 }
 0x31e   :  { %v5484_v1 = vadd.f32 %v5483_v35, %v5482_v53  ;;  %v5574_v55 = vpop.f32.mrf.mxu0 }
 0x31f   :  { %v5485_v20 = vpop.f32.mrf.mxu1  ;;  %5935 = vmatmul.mubr.bf16.gmra.mxu1 %v8329_v23  ;;  %v5575_v45 = vadd.f32 %v5574_v55, %v5573_v50 }
 0x320   :  { %v5576_v38 = vpop.f32.mrf.mxu0  ;;  %5938 = vmatprep.mubr.msk.bf16.mxu1 %vm6195_vm10, %v9260_v2 }
 0x321   :  { %v8499_v31 = vadd.f32 %v5575_v45, %v5481_v30  ;;  %v5486_v59 = vpop.f32.mrf.mxu1  ;;  %v6181_v45 = vld [vmem:[%s9168_s0 + $0x40] sm:$0xff]  }
 0x322   :  { %v5487_v5 = vadd.f32 %v5486_v59, %v5485_v20  ;;  %v5577_v34 = vpop.f32.mrf.mxu0 }
 0x323   :  { %v5488_v11 = vpop.f32.mrf.mxu1  ;;  %v5578_v27 = vadd.f32 %v5577_v34, %v5576_v38 }
 0x324   :  { %v5579_v56 = vpop.f32.mrf.mxu0  ;;  %5989 = vmatmul.mubr.msk.bf16.gmra.mxu0 %vm4782_vm3, %v6178_v10 }
 0x325   :  { %v8502_v23 = vadd.f32 %v5578_v27, %v5484_v1  ;;  %v5489_v46 = vpop.f32.mrf.mxu1  ;;  %5992 = vmatprep.mubr.msk.bf16.mxu0 %vm6195_vm10, %v9260_v2 }
 0x326   :  { %v5490_v7 = vadd.f32 %v5489_v46, %v5488_v11  ;;  %v5580_v54 = vpop.f32.mrf.mxu0 }
 0x327   :  { %v5491_v26 = vpop.f32.mrf.mxu1  ;;  %5939 = vmatmul.mubr.bf16.gmra.mxu1 %v8336_v3  ;;  %v5581_v63 = vadd.f32 %v5580_v54, %v5579_v56 }
 0x328   :  { %v5582_v29 = vpop.f32.mrf.mxu0  ;;  %5942 = vmatprep.mubr.msk.bf16.mxu1 %vm6195_vm10, %v9260_v2 }
 0x329   :  { %v8512_v17 = vadd.f32 %v5581_v63, %v5487_v5  ;;  %v5492_v19 = vpop.f32.mrf.mxu1 }
 0x32a   :  { %v5493_v42 = vadd.f32 %v5492_v19, %v5491_v26  ;;  %v5583_v25 = vpop.f32.mrf.mxu0 }
 0x32b   :  { %v5494_v8 = vpop.f32.mrf.mxu1  ;;  %v5584_v30 = vadd.f32 %v5583_v25, %v5582_v29  ;;  %v6182_v29 = vld [vmem:[%s9168_s0 + $0x48] sm:$0xff]  }
 0x32c   :  { %v5585_v62 = vpop.f32.mrf.mxu0  ;;  %5993 = vmatmul.mubr.msk.bf16.gmra.mxu0 %vm4782_vm3, %v6180_v47 }
 0x32d   :  { %v8515_v3 = vadd.f32 %v5584_v30, %v5490_v7  ;;  %v5495_v53 = vpop.f32.mrf.mxu1  ;;  %5996 = vmatprep.mubr.msk.bf16.mxu0 %vm6195_vm10, %v9260_v2 }
 0x32e   :  { %v5496_v50 = vadd.f32 %v5495_v53, %v5494_v8  ;;  %v5586_v35 = vpop.f32.mrf.mxu0 }
 0x32f   :  { %v5497_v1 = vpop.f32.mrf.mxu1  ;;  %5943 = vmatmul.mubr.bf16.gmra.mxu1 %v8339_v9  ;;  %v5587_v55 = vadd.f32 %v5586_v35, %v5585_v62 }
 0x330   :  { %v5588_v20 = vpop.f32.mrf.mxu0  ;;  %5946 = vmatprep.mubr.msk.bf16.mxu1 %vm6195_vm10, %v9260_v2 }
 0x331   :  { %v8525_v38 = vadd.f32 %v5587_v55, %v5493_v42  ;;  %v5498_v10 = vpop.f32.mrf.mxu1 }
 0x332   :  { %v5499_v59 = vadd.f32 %v5498_v10, %v5497_v1  ;;  %v5589_v5 = vpop.f32.mrf.mxu0 }
 0x333   :  { %v5500_v34 = vpop.f32.mrf.mxu1  ;;  %v5590_v11 = vadd.f32 %v5589_v5, %v5588_v20 }
 0x334   :  { %v5591_v27 = vpop.f32.mrf.mxu0  ;;  %5997 = vmatmul.mubr.msk.bf16.gmra.mxu0 %vm4782_vm3, %v6181_v45  ;;  %v6183_v45 = vld [vmem:[%s9168_s0 + $0x50] sm:$0xff]  }
 0x335   :  { %v8528_v9 = vadd.f32 %v5590_v11, %v5496_v50  ;;  %v5501_v56 = vpop.f32.mrf.mxu1  ;;  %6000 = vmatprep.mubr.msk.bf16.mxu0 %vm6195_vm10, %v9260_v2 }
 0x336   :  { %v5502_v46 = vadd.f32 %v5501_v56, %v5500_v34  ;;  %v5592_v7 = vpop.f32.mrf.mxu0 }
 0x337   :  { %v5503_v54 = vpop.f32.mrf.mxu1  ;;  %5947 = vmatmul.mubr.bf16.gmra.mxu1 %v8351_v28  ;;  %v5593_v26 = vadd.f32 %v5592_v7, %v5591_v27 }
 0x338   :  { %v5594_v63 = vpop.f32.mrf.mxu0  ;;  %5950 = vmatprep.mubr.msk.bf16.mxu1 %vm6195_vm10, %v9260_v2 }
 0x339   :  { %v8538_v47 = vadd.f32 %v5593_v26, %v5499_v59  ;;  %v5504_v19 = vpop.f32.mrf.mxu1 }
 0x33a   :  { %v5505_v42 = vadd.f32 %v5504_v19, %v5503_v54  ;;  %v5595_v25 = vpop.f32.mrf.mxu0  ;;  %v6184_v19 = vld [vmem:[%s9168_s0 + $0x58] sm:$0xff]  }
 0x33b   :  { %v5506_v8 = vpop.f32.mrf.mxu1  ;;  %v5596_v30 = vadd.f32 %v5595_v25, %v5594_v63 }
 0x33c   :  { %v5597_v62 = vpop.f32.mrf.mxu0  ;;  %6001 = vmatmul.mubr.msk.bf16.gmra.mxu0 %vm4782_vm3, %v6182_v29 }
 0x33d   :  { %v8541_v28 = vadd.f32 %v5596_v30, %v5502_v46  ;;  %v5507_v53 = vpop.f32.mrf.mxu1  ;;  %6004 = vmatprep.mubr.msk.bf16.mxu0 %vm6195_vm10, %v9260_v2 }
 0x33e   :  { %v5508_v50 = vadd.f32 %v5507_v53, %v5506_v8  ;;  %v5598_v35 = vpop.f32.mrf.mxu0 }
 0x33f   :  { %v5509_v1 = vpop.f32.mrf.mxu1  ;;  %5951 = vmatmul.mubr.bf16.gmra.mxu1 %v8358_v14  ;;  %v5599_v55 = vadd.f32 %v5598_v35, %v5597_v62 }
 0x340   :  { %v5600_v20 = vpop.f32.mrf.mxu0  ;;  %5954 = vmatprep.mubr.msk.bf16.mxu1 %vm6195_vm10, %v9260_v2 }
 0x341   :  { %v8551_v10 = vadd.f32 %v5599_v55, %v5505_v42  ;;  %v5510_v59 = vpop.f32.mrf.mxu1 }
 0x342   :  { %v5511_v5 = vadd.f32 %v5510_v59, %v5509_v1  ;;  %v5601_v34 = vpop.f32.mrf.mxu0  ;;  %v6185_v59 = vld [vmem:[%s9168_s0 + $0x60] sm:$0xff]  }
 0x343   :  { %v5512_v11 = vpop.f32.mrf.mxu1  ;;  %v5602_v27 = vadd.f32 %v5601_v34, %v5600_v20 }
 0x344   :  { %v5603_v56 = vpop.f32.mrf.mxu0  ;;  %6005 = vmatmul.mubr.msk.bf16.gmra.mxu0 %vm4782_vm3, %v6183_v45 }
 0x345   :  { %v8554_v14 = vadd.f32 %v5602_v27, %v5508_v50  ;;  %v5513_v46 = vpop.f32.mrf.mxu1  ;;  %6008 = vmatprep.mubr.msk.bf16.mxu0 %vm6195_vm10, %v9260_v2 }
 0x346   :  { %v5514_v7 = vadd.f32 %v5513_v46, %v5512_v11  ;;  %v5604_v54 = vpop.f32.mrf.mxu0 }
 0x347   :  { %v5515_v26 = vpop.f32.mrf.mxu1  ;;  %5955 = vmatmul.mubr.bf16.gmra.mxu1 %v8363_v21  ;;  %v5605_v63 = vadd.f32 %v5604_v54, %v5603_v56 }
 0x348   :  { %v5606_v29 = vpop.f32.mrf.mxu0  ;;  %5958 = vmatprep.mubr.msk.bf16.mxu1 %vm6195_vm10, %v9260_v2 }
 0x349   :  { %v8564_v42 = vadd.f32 %v5605_v63, %v5511_v5  ;;  %v5516_v25 = vpop.f32.mrf.mxu1 }
 0x34a   :  { %v5517_v8 = vadd.f32 %v5516_v25, %v5515_v26  ;;  %v5607_v30 = vpop.f32.mrf.mxu0 }
 0x34b   :  { %v5518_v62 = vpop.f32.mrf.mxu1  ;;  %v5608_v53 = vadd.f32 %v5607_v30, %v5606_v29 }
 0x34c   :  { %v5609_v50 = vpop.f32.mrf.mxu0  ;;  %6009 = vmatmul.mubr.msk.bf16.gmra.mxu0 %vm4782_vm3, %v6184_v19 }
 0x34d   :  { %v8567_v21 = vadd.f32 %v5608_v53, %v5514_v7  ;;  %v5519_v35 = vpop.f32.mrf.mxu1  ;;  %6012 = vmatprep.mubr.msk.bf16.mxu0 %vm6195_vm10, %v9260_v2 }
 0x34e   :  { %v5610_v1 = vpop.f32.mrf.mxu0 }
 0x34f   :  { %v5631_v55 = vpop.f32.mrf.mxu1  ;;  %5959 = vmatmul.mubr.bf16.gmra.mxu1 %v8380_v37  ;;  %v5611_v20 = vadd.f32 %v5610_v1, %v5609_v50 }
 0x350   :  { %v5612_v45 = vpop.f32.mrf.mxu0  ;;  %5962 = vmatprep.mubr.msk.bf16.mxu1 %vm6195_vm10, %v9260_v2 }
 0x351   :  { %v8577_v5 = vadd.f32 %v5611_v20, %v5517_v8  ;;  %v5632_v34 = vpop.f32.mrf.mxu1 }
 0x352   :  { %v5633_v11 = vadd.f32 %v5632_v34, %v5631_v55  ;;  %v5613_v27 = vpop.f32.mrf.mxu0 }
 0x353   :  { %v5634_v56 = vpop.f32.mrf.mxu1 }
 0x354   :  { %v3584_v46 = vadd.f32 %v5633_v11, %v8420_v39  ;;  %v5725_v7 = vpop.f32.mrf.mxu0  ;;  %6013 = vmatmul.mubr.msk.bf16.gmra.mxu0 %vm4782_vm3, %v6185_v59  ;;  %v6186_v39 = vld [vmem:[%s9168_s0 + $0x68] ss:$0 sps:$4 sm:$0xff]  }
 0x355   :  { %v5635_v37 = vpop.f32.mrf.mxu1  ;;  %6016 = vmatprep.mubr.msk.bf16.mxu0 %vm6195_vm10, %v9260_v2 }
 0x356   :  { %v5636_v54 = vadd.f32 %v5635_v37, %v5634_v56  ;;  %v5726_v26 = vpop.f32.mrf.mxu0 }
 0x357   :  { %v5637_v63 = vpop.f32.mrf.mxu1  ;;  %5963 = vmatmul.mubr.bf16.gmra.mxu1 %v8373_v43  ;;  %v5727_v29 = vadd.f32 %v5726_v26, %v5725_v7 }
 0x358   :  { %v3585_v19 = vadd.f32 %v5636_v54, %v8424_v48  ;;  %v5728_v25 = vpop.f32.mrf.mxu0 }
 0x359   :  { %v5638_v8 = vpop.f32.mrf.mxu1  ;;  %v8588_v30 = vadd.f32 %v5727_v29, %v3584_v46 }
 0x35a   :  { %v5639_v62 = vadd.f32 %v5638_v8, %v5637_v63  ;;  %v5729_v53 = vpop.f32.mrf.mxu0 }
 0x35b   :  { %v5640_v50 = vpop.f32.mrf.mxu1  ;;  %v5730_v2 = vadd.f32 %v5729_v53, %v5728_v25 }
 0x35c   :  { %v3586_v35 = vadd.f32 %v5639_v62, %v8429_v57  ;;  %v5731_v1 = vpop.f32.mrf.mxu0  ;;  %6017 = vmatmul.mubr.msk.bf16.gmra.mxu0 %vm4782_vm3, %v6186_v39 }
 0x35d   :  { %v5641_v43 = vpop.f32.mrf.mxu1  ;;  %v8592_v55 = vadd.f32 %v5730_v2, %v3585_v19 }
 0x35e   :  { %v5642_v48 = vadd.f32 %v5641_v43, %v5640_v50  ;;  %v5732_v20 = vpop.f32.mrf.mxu0 }
 0x35f   :  { %v5643_v45 = vpop.f32.mrf.mxu1  ;;  %v5733_v59 = vadd.f32 %v5732_v20, %v5731_v1 }
 0x360   :  { %v3587_v34 = vadd.f32 %v5642_v48, %v8436_v40  ;;  %v5734_v11 = vpop.f32.mrf.mxu0 }
 0x361   :  { %v5644_v27 = vpop.f32.mrf.mxu1  ;;  %v8595_v56 = vadd.f32 %v5733_v59, %v3586_v35 }
 0x362   :  { %v5645_v46 = vadd.f32 %v5644_v27, %v5643_v45  ;;  %v5735_v7 = vpop.f32.mrf.mxu0 }
 0x363   :  { %v5646_v37 = vpop.f32.mrf.mxu1  ;;  %v5736_v57 = vadd.f32 %v5735_v7, %v5734_v11 }
 0x364   :  { %v3588_v54 = vadd.f32 %v5645_v46, %v8442_v15  ;;  %v5737_v26 = vpop.f32.mrf.mxu0 }
 0x365   :  { %v5647_v63 = vpop.f32.mrf.mxu1  ;;  %v8598_v29 = vadd.f32 %v5736_v57, %v3587_v34 }
 0x366   :  { %v5648_v19 = vadd.f32 %v5647_v63, %v5646_v37  ;;  %v5738_v25 = vpop.f32.mrf.mxu0 }
 0x367   :  { %v5649_v39 = vpop.f32.mrf.mxu1  ;;  %v5739_v8 = vadd.f32 %v5738_v25, %v5737_v26 }
 0x368   :  { %v3589_v40 = vadd.f32 %v5648_v19, %v8449_v36  ;;  %v5740_v62 = vpop.f32.mrf.mxu0 }
 0x369   :  { %v5650_v53 = vpop.f32.mrf.mxu1  ;;  %v8601_v50 = vadd.f32 %v5739_v8, %v3588_v54 }
 0x36a   :  { %v5651_v2 = vadd.f32 %v5650_v53, %v5649_v39  ;;  %v5741_v35 = vpop.f32.mrf.mxu0 }
 0x36b   :  { %v5652_v1 = vpop.f32.mrf.mxu1  ;;  %v5742_v43 = vadd.f32 %v5741_v35, %v5740_v62 }
 0x36c   :  { %v3590_v15 = vadd.f32 %v5651_v2, %v8455_v61  ;;  %v5743_v48 = vpop.f32.mrf.mxu0 }
 0x36d   :  { %v5653_v20 = vpop.f32.mrf.mxu1  ;;  %v8604_v45 = vadd.f32 %v5742_v43, %v3589_v40 }
 0x36e   :  { %v5654_v59 = vadd.f32 %v5653_v20, %v5652_v1  ;;  %v5744_v34 = vpop.f32.mrf.mxu0 }
 0x36f   :  { %v5655_v11 = vpop.f32.mrf.mxu1  ;;  %v5745_v27 = vadd.f32 %v5744_v34, %v5743_v48 }
 0x370   :  { %v3591_v36 = vadd.f32 %v5654_v59, %v8462_v33  ;;  %v5746_v46 = vpop.f32.mrf.mxu0 }
 0x371   :  { %v5656_v7 = vpop.f32.mrf.mxu1  ;;  %v8607_v37 = vadd.f32 %v5745_v27, %v3590_v15 }
 0x372   :  { %v5657_v57 = vadd.f32 %v5656_v7, %v5655_v11  ;;  %v5747_v54 = vpop.f32.mrf.mxu0 }
 0x373   :  { %v5658_v26 = vpop.f32.mrf.mxu1  ;;  %v5748_v63 = vadd.f32 %v5747_v54, %v5746_v46 }
 0x374   :  { %v3592_v61 = vadd.f32 %v5657_v57, %v8468_v60  ;;  %v5749_v19 = vpop.f32.mrf.mxu0 }
 0x375   :  { %v5659_v25 = vpop.f32.mrf.mxu1  ;;  %v8610_v39 = vadd.f32 %v5748_v63, %v3591_v36 }
 0x376   :  { %v5660_v8 = vadd.f32 %v5659_v25, %v5658_v26  ;;  %v5750_v40 = vpop.f32.mrf.mxu0 }
 0x377   :  { %v5661_v62 = vpop.f32.mrf.mxu1  ;;  %v5751_v53 = vadd.f32 %v5750_v40, %v5749_v19 }
 0x378   :  { %v3593_v33 = vadd.f32 %v5660_v8, %v8475_v24  ;;  %v5752_v2 = vpop.f32.mrf.mxu0 }
 0x379   :  { %v5662_v35 = vpop.f32.mrf.mxu1  ;;  %v8613_v1 = vadd.f32 %v5751_v53, %v3592_v61 }
 0x37a   :  { %v5663_v43 = vadd.f32 %v5662_v35, %v5661_v62  ;;  %v5753_v15 = vpop.f32.mrf.mxu0 }
 0x37b   :  { %v5664_v48 = vpop.f32.mrf.mxu1  ;;  %v5754_v20 = vadd.f32 %v5753_v15, %v5752_v2 }
 0x37c   :  { %v3594_v60 = vadd.f32 %v5663_v43, %v8481_v16  ;;  %v5755_v59 = vpop.f32.mrf.mxu0 }
 0x37d   :  { %v5665_v34 = vpop.f32.mrf.mxu1  ;;  %v8616_v11 = vadd.f32 %v5754_v20, %v3593_v33 }
 0x37e   :  { %v5666_v27 = vadd.f32 %v5665_v34, %v5664_v48  ;;  %v5756_v36 = vpop.f32.mrf.mxu0 }
 0x37f   :  { %v5667_v46 = vpop.f32.mrf.mxu1  ;;  %v5757_v7 = vadd.f32 %v5756_v36, %v5755_v59 }
 0x380   :  { %v3595_v24 = vadd.f32 %v5666_v27, %v8488_v41  ;;  %v5758_v57 = vpop.f32.mrf.mxu0 }
 0x381   :  { %v5668_v54 = vpop.f32.mrf.mxu1  ;;  %v8619_v26 = vadd.f32 %v5757_v7, %v3594_v60 }
 0x382   :  { %v5669_v63 = vadd.f32 %v5668_v54, %v5667_v46  ;;  %v5759_v61 = vpop.f32.mrf.mxu0 }
 0x383   :  { %v5670_v19 = vpop.f32.mrf.mxu1  ;;  %v5760_v25 = vadd.f32 %v5759_v61, %v5758_v57 }
 0x384   :  { %v3596_v16 = vadd.f32 %v5669_v63, %v8499_v31  ;;  %v5761_v8 = vpop.f32.mrf.mxu0 }
 0x385   :  { %v5671_v40 = vpop.f32.mrf.mxu1  ;;  %v8622_v62 = vadd.f32 %v5760_v25, %v3595_v24 }
 0x386   :  { %v5672_v53 = vadd.f32 %v5671_v40, %v5670_v19  ;;  %v5762_v33 = vpop.f32.mrf.mxu0 }
 0x387   :  { %v5673_v2 = vpop.f32.mrf.mxu1  ;;  %v5763_v35 = vadd.f32 %v5762_v33, %v5761_v8 }
 0x388   :  { %v3597_v41 = vadd.f32 %v5672_v53, %v8502_v23  ;;  %v5764_v43 = vpop.f32.mrf.mxu0 }
 0x389   :  { %v5674_v15 = vpop.f32.mrf.mxu1  ;;  %v8625_v48 = vadd.f32 %v5763_v35, %v3596_v16 }
 0x38a   :  { %v5675_v20 = vadd.f32 %v5674_v15, %v5673_v2  ;;  %v5765_v60 = vpop.f32.mrf.mxu0 }
 0x38b   :  { %v5676_v59 = vpop.f32.mrf.mxu1  ;;  %v5766_v34 = vadd.f32 %v5765_v60, %v5764_v43 }
 0x38c   :  { %v3598_v31 = vadd.f32 %v5675_v20, %v8512_v17  ;;  %v5767_v27 = vpop.f32.mrf.mxu0 }
 0x38d   :  { %v5677_v36 = vpop.f32.mrf.mxu1  ;;  %v8628_v46 = vadd.f32 %v5766_v34, %v3597_v41 }
 0x38e   :  { %v5678_v7 = vadd.f32 %v5677_v36, %v5676_v59  ;;  %v5768_v24 = vpop.f32.mrf.mxu0 }
 0x38f   :  { %v5679_v57 = vpop.f32.mrf.mxu1  ;;  %v5769_v54 = vadd.f32 %v5768_v24, %v5767_v27 }
 0x390   :  { %v3599_v23 = vadd.f32 %v5678_v7, %v8515_v3  ;;  %v5770_v63 = vpop.f32.mrf.mxu0 }
 0x391   :  { %v5680_v61 = vpop.f32.mrf.mxu1  ;;  %v8631_v19 = vadd.f32 %v5769_v54, %v3598_v31 }
 0x392   :  { %v5681_v25 = vadd.f32 %v5680_v61, %v5679_v57  ;;  %v5771_v16 = vpop.f32.mrf.mxu0 }
 0x393   :  { %v5682_v8 = vpop.f32.mrf.mxu1  ;;  %v5772_v40 = vadd.f32 %v5771_v16, %v5770_v63 }
 0x394   :  { %v3600_v17 = vadd.f32 %v5681_v25, %v8525_v38  ;;  %v5773_v53 = vpop.f32.mrf.mxu0 }
 0x395   :  { %v5683_v33 = vpop.f32.mrf.mxu1  ;;  %v8634_v2 = vadd.f32 %v5772_v40, %v3599_v23 }
 0x396   :  { %v5684_v35 = vadd.f32 %v5683_v33, %v5682_v8  ;;  %v5774_v41 = vpop.f32.mrf.mxu0 }
 0x397   :  { %v5685_v43 = vpop.f32.mrf.mxu1  ;;  %v5775_v15 = vadd.f32 %v5774_v41, %v5773_v53 }
 0x398   :  { %v3601_v3 = vadd.f32 %v5684_v35, %v8528_v9  ;;  %v5776_v20 = vpop.f32.mrf.mxu0 }
 0x399   :  { %v5686_v60 = vpop.f32.mrf.mxu1  ;;  %v8637_v59 = vadd.f32 %v5775_v15, %v3600_v17 }
 0x39a   :  { %v5687_v34 = vadd.f32 %v5686_v60, %v5685_v43  ;;  %v5777_v31 = vpop.f32.mrf.mxu0 }
 0x39b   :  { %v5688_v27 = vpop.f32.mrf.mxu1  ;;  %v5778_v36 = vadd.f32 %v5777_v31, %v5776_v20 }
 0x39c   :  { %v3602_v38 = vadd.f32 %v5687_v34, %v8538_v47  ;;  %v5779_v7 = vpop.f32.mrf.mxu0 }
 0x39d   :  { %v5689_v24 = vpop.f32.mrf.mxu1  ;;  %v8640_v57 = vadd.f32 %v5778_v36, %v3601_v3 }
 0x39e   :  { %v5690_v54 = vadd.f32 %v5689_v24, %v5688_v27  ;;  %v5780_v23 = vpop.f32.mrf.mxu0 }
 0x39f   :  { %v5691_v63 = vpop.f32.mrf.mxu1  ;;  %v5781_v61 = vadd.f32 %v5780_v23, %v5779_v7 }
 0x3a0   :  { %v3603_v9 = vadd.f32 %v5690_v54, %v8541_v28  ;;  %v5782_v25 = vpop.f32.mrf.mxu0 }
 0x3a1   :  { %v5692_v16 = vpop.f32.mrf.mxu1  ;;  %v8643_v8 = vadd.f32 %v5781_v61, %v3602_v38 }
 0x3a2   :  { %v5693_v40 = vadd.f32 %v5692_v16, %v5691_v63  ;;  %v5783_v17 = vpop.f32.mrf.mxu0 }
 0x3a3   :  { %v5694_v53 = vpop.f32.mrf.mxu1  ;;  %v5784_v33 = vadd.f32 %v5783_v17, %v5782_v25 }
 0x3a4   :  { %v3604_v47 = vadd.f32 %v5693_v40, %v8551_v10  ;;  %v5785_v35 = vpop.f32.mrf.mxu0 }
 0x3a5   :  { %v5695_v41 = vpop.f32.mrf.mxu1  ;;  %v8646_v43 = vadd.f32 %v5784_v33, %v3603_v9 }
 0x3a6   :  { %v5696_v15 = vadd.f32 %v5695_v41, %v5694_v53  ;;  %v5786_v3 = vpop.f32.mrf.mxu0 }
 0x3a7   :  { %v5697_v20 = vpop.f32.mrf.mxu1  ;;  %v5787_v60 = vadd.f32 %v5786_v3, %v5785_v35 }
 0x3a8   :  { %v3605_v28 = vadd.f32 %v5696_v15, %v8554_v14  ;;  %v5788_v34 = vpop.f32.mrf.mxu0 }
 0x3a9   :  { %v5698_v31 = vpop.f32.mrf.mxu1  ;;  %v8649_v27 = vadd.f32 %v5787_v60, %v3604_v47 }
 0x3aa   :  { %v5699_v36 = vadd.f32 %v5698_v31, %v5697_v20  ;;  %v5789_v38 = vpop.f32.mrf.mxu0 }
 0x3ab   :  { %v5700_v7 = vpop.f32.mrf.mxu1  ;;  %v5790_v24 = vadd.f32 %v5789_v38, %v5788_v34 }
 0x3ac   :  { %v3606_v10 = vadd.f32 %v5699_v36, %v8564_v42  ;;  %v5791_v54 = vpop.f32.mrf.mxu0 }
 0x3ad   :  { %v5701_v23 = vpop.f32.mrf.mxu1  ;;  %v8652_v63 = vadd.f32 %v5790_v24, %v3605_v28 }
 0x3ae   :  { %v5702_v61 = vadd.f32 %v5701_v23, %v5700_v7  ;;  %v5792_v9 = vpop.f32.mrf.mxu0 }
 0x3af   :  { %v5703_v25 = vpop.f32.mrf.mxu1  ;;  %v5793_v16 = vadd.f32 %v5792_v9, %v5791_v54 }
 0x3b0   :  { %v3607_v14 = vadd.f32 %v5702_v61, %v8567_v21  ;;  %v5794_v40 = vpop.f32.mrf.mxu0 }
 0x3b1   :  { %v5704_v17 = vpop.f32.mrf.mxu1  ;;  %v8655_v53 = vadd.f32 %v5793_v16, %v3606_v10 }
 0x3b2   :  { %v5705_v33 = vadd.f32 %v5704_v17, %v5703_v25  ;;  %v5795_v47 = vpop.f32.mrf.mxu0 }
 0x3b3   :  { %v5706_v35 = vpop.f32.mrf.mxu1  ;;  %v5796_v41 = vadd.f32 %v5795_v47, %v5794_v40 }
 0x3b4   :  { %v3608_v42 = vadd.f32 %v5705_v33, %v8577_v5  ;;  %v5797_v15 = vpop.f32.mrf.mxu0 }
 0x3b5   :  { %v5707_v3 = vpop.f32.mrf.mxu1  ;;  %v8658_v20 = vadd.f32 %v5796_v41, %v3607_v14 }
 0x3b6   :  { %v5798_v60 = vpop.f32.mrf.mxu0 }
 0x3b7   :  { %v4405_v28 = vpop.f32.mrf.mxu1  ;;  %v5799_v34 = vadd.f32 %v5798_v60, %v5797_v15 }
 0x3b8   :  { %v5800_v31 = vpop.f32.mrf.mxu0 }
 0x3b9   :  { %v5916_v36 = vpop.f32.mrf.mxu1  ;;  %v8660_v21 = vadd.f32 %v5799_v34, %v3608_v42 }
 0x3ba   :  { %v5801_v38 = vpop.f32.mrf.mxu0 }
 0x3bb   :  { %v4408_v7 = vpop.f32.mrf.mxu1 }
 0x3bc   :  { %v8662_v24 = vpop.f32.mrf.mxu0 }
 0x3bd   :  { %v5917_v10 = vpop.f32.mrf.mxu1 }
 0x3be   :  { %v5970_v54 = vpop.f32.mrf.mxu0 }
 0x3bf   :  { %v4413_v23 = vpop.f32.mrf.mxu1 }
 0x3c0   :  { %v8664_v61 = vpop.f32.mrf.mxu0 }
 0x3c1   :  { %v5920_v5 = vpop.f32.mrf.mxu1 }
 0x3c2   :  { %v5971_v9 = vpop.f32.mrf.mxu0 }
 0x3c3   :  { %v4416_v25 = vpop.f32.mrf.mxu1 }
 0x3c4   :  { %v8666_v16 = vpop.f32.mrf.mxu0 }
 0x3c5   :  { %v5921_v14 = vpop.f32.mrf.mxu1 }
 0x3c6   :  { %v5974_v40 = vpop.f32.mrf.mxu0 }
 0x3c7   :  { %v4421_v17 = vpop.f32.mrf.mxu1 }
 0x3c8   :  { %v8668_v33 = vpop.f32.mrf.mxu0 }
 0x3c9   :  { %9299 = vst [vmem:[#allocation11_spill] sm:$0xff] %v8668_v33  ;;  %v5924_v47 = vpop.f32.mrf.mxu1 }
 0x3ca   :  { %v5975_v35 = vpop.f32.mrf.mxu0 }
 0x3cb   :  { %v4424_v41 = vpop.f32.mrf.mxu1 }
 0x3cc   :  { %v8670_v42 = vpop.f32.mrf.mxu0 }
 0x3cd   :  { %9300 = vst [vmem:[#allocation14_spill] sm:$0xff] %v8670_v42  ;;  %v5925_v15 = vpop.f32.mrf.mxu1 }
 0x3ce   :  { %v5978_v3 = vpop.f32.mrf.mxu0 }
 0x3cf   :  { %v4429_v60 = vpop.f32.mrf.mxu1 }
 0x3d0   :  { %v8672_v34 = vpop.f32.mrf.mxu0 }
 0x3d1   :  { %9301 = vst [vmem:[#allocation17_spill] sm:$0xff] %v8672_v34  ;;  %v5928_v31 = vpop.f32.mrf.mxu1 }
 0x3d2   :  { %v5979_v36 = vpop.f32.mrf.mxu0 }
 0x3d3   :  { %v4432_v38 = vpop.f32.mrf.mxu1 }
 0x3d4   :  { %v8674_v10 = vpop.f32.mrf.mxu0 }
 0x3d5   :  { %9302 = vst [vmem:[#allocation20_spill] sm:$0xff] %v8674_v10  ;;  %v5929_v54 = vpop.f32.mrf.mxu1  ;;  %v8685_v10 = vadd.f32 %v4408_v7, %v8592_v55 }
 0x3d6   :  { %v5982_v5 = vpop.f32.mrf.mxu0 }
 0x3d7   :  { %v4437_v9 = vpop.f32.mrf.mxu1  ;;  %9305 = vst [vmem:[#allocation23_spill] sm:$0xff] %v8685_v10 }
 0x3d8   :  { %v8676_v14 = vpop.f32.mrf.mxu0 }
 0x3d9   :  { %v5932_v40 = vpop.f32.mrf.mxu1 }
 0x3da   :  { %v5983_v47 = vpop.f32.mrf.mxu0  ;;  %v8692_v40 = vadd.f32 %v4405_v28, %v8588_v30 }
 0x3db   :  { %v4440_v35 = vpop.f32.mrf.mxu1  ;;  %v8695_v47 = vadd.f32 %v4413_v23, %v8595_v56  ;;  %v8711_v56 = vadd.f32 %v4421_v17, %v8601_v50  ;;  %v4533_v23 = vmul.f32 %v8685_v10, %v7333_v0 }
 0x3dc   :  { %v8678_v33 = vpop.f32.mrf.mxu0  ;;  %9307 = vst [vmem:[#allocation25_spill] sm:$0xff] %v8692_v40 }
 0x3dd   :  { %9303 = vst [vmem:[#allocation21_spill] sm:$0xff] %v8678_v33  ;;  %v5933_v15 = vpop.f32.mrf.mxu1  ;;  %9308 = vst [vmem:[#allocation26_spill] sm:$0xff] %v8695_v47  ;;  %v4589_v30 = vmul.f32 %v8695_v47, %v8695_v47  ;;  %v4534_v50 = vmul.f32 %v8695_v47, %v7314_v13 }
 0x3de   :  { %v5986_v3 = vpop.f32.mrf.mxu0 }
 0x3df   :  { %v8680_v42 = vpop.f32.mrf.mxu1 }
 0x3e0   :  { %v8682_v34 = vpop.f32.mrf.mxu0 }
 0x3e1   :  { %9304 = vst [vmem:[#allocation22_spill] sm:$0xff] %v8682_v34  ;;  %v5936_v31 = vpop.f32.mrf.mxu1  ;;  %v4588_v34 = vmul.f32 %v8685_v10, %v8685_v10 }
 0x3e2   :  { %v5987_v36 = vpop.f32.mrf.mxu0  ;;  %v8700_v31 = vadd.f32 %v4416_v25, %v8598_v29 }
 0x3e3   :  { %v8687_v54 = vpop.f32.mrf.mxu1  ;;  %v4587_v36 = vmul.f32 %v8692_v40, %v8692_v40  ;;  %v4613_v29 = vmul.f32 %v4588_v34, %v7333_v0  ;;  %v4614_v0 = vmul.f32 %v4589_v30, %v7314_v13  ;;  %v4591_v34 = vmul.f32 %v8711_v56, %v8711_v56 }
 0x3e4   :  { %v8689_v5 = vpop.f32.mrf.mxu0  ;;  %v4590_v25 = vmul.f32 %v8700_v31, %v8700_v31  ;;  %v4535_v10 = vmul.f32 %v8700_v31, %v7344_v22  ;;  %v8742_v13 = vadd.f32 %v4432_v38, %v8610_v39 }
 0x3e5   :  { %9306 = vst [vmem:[#allocation24_spill] sm:$0xff] %v8689_v5  ;;  %v5937_v15 = vpop.f32.mrf.mxu1  ;;  %v4532_v5 = vmul.f32 %v8692_v40, %v7300_v6 }
 0x3e6   :  { %v5990_v3 = vpop.f32.mrf.mxu0  ;;  %v4615_v47 = vmul.f32 %v4590_v25, %v7344_v22  ;;  %v8752_v22 = vadd.f32 %v4437_v9, %v8613_v1 }
 0x3e7   :  { %v8702_v55 = vpop.f32.mrf.mxu1  ;;  %v8719_v3 = vadd.f32 %v4424_v41, %v8604_v45  ;;  %v8734_v45 = vadd.f32 %v4429_v60, %v8607_v37  ;;  %v4536_v37 = vmul.f32 %v8711_v56, %v7362_v58 }
 0x3e8   :  { %v8704_v7 = vpop.f32.mrf.mxu0 }
 0x3e9   :  { %9309 = vst [vmem:[#allocation27_spill] sm:$0xff] %v8704_v7  ;;  %v5940_v28 = vpop.f32.mrf.mxu1  ;;  %v4537_v39 = vmul.f32 %v8719_v3, %v7372_v32  ;;  %v4538_v1 = vmul.f32 %v8734_v45, %v7384_v49 }
 0x3ea   :  { %v5991_v15 = vpop.f32.mrf.mxu0  ;;  %v4612_v28 = vmul.f32 %v4587_v36, %v7300_v6  ;;  %v4592_v6 = vmul.f32 %v8719_v3, %v8719_v3 }
 0x3eb   :  { %v8721_v7 = vpop.f32.mrf.mxu1  ;;  %v4557_v15 = vadd.f32 %v4533_v23, %v4532_v5  ;;  %v4616_v23 = vmul.f32 %v4591_v34, %v7362_v58  ;;  %v8760_v58 = vadd.f32 %v4440_v35, %v8616_v11  ;;  %v4539_v35 = vmul.f32 %v8742_v13, %v7397_v52 }
 0x3ec   :  { %v8727_v17 = vpop.f32.mrf.mxu0  ;;  %v4637_v33 = vadd.f32 %v4613_v29, %v4612_v28  ;;  %v4617_v28 = vmul.f32 %v4592_v6, %v7372_v32  ;;  %v8771_v32 = vadd.f32 %v8680_v42, %v8619_v26  ;;  %v4540_v26 = vmul.f32 %v8752_v22, %v7406_v4 }
 0x3ed   :  { %v5941_v41 = vpop.f32.mrf.mxu1  ;;  %v4558_v30 = vadd.f32 %v4557_v15, %v4534_v50 }
 0x3ee   :  { %v5994_v40 = vpop.f32.mrf.mxu0  ;;  %v4638_v5 = vadd.f32 %v4637_v33, %v4614_v0  ;;  %v4594_v33 = vmul.f32 %v8742_v13, %v8742_v13 }
 0x3ef   :  { %v4461_v36 = vpop.f32.mrf.mxu1  ;;  %v4593_v40 = vmul.f32 %v8734_v45, %v8734_v45  ;;  %v4559_v25 = vadd.f32 %v4558_v30, %v4535_v10 }
 0x3f0   :  { %v8746_v60 = vpop.f32.mrf.mxu0  ;;  %v4639_v50 = vadd.f32 %v4638_v5, %v4615_v47  ;;  %v4595_v47 = vmul.f32 %v8752_v22, %v8752_v22  ;;  %v4596_v5 = vmul.f32 %v8760_v58, %v8760_v58 }
 0x3f1   :  { %v5944_v29 = vpop.f32.mrf.mxu1  ;;  %v4560_v34 = vadd.f32 %v4559_v25, %v4536_v37  ;;  %v4618_v41 = vmul.f32 %v4593_v40, %v7384_v49  ;;  %v4619_v37 = vmul.f32 %v4594_v33, %v7397_v52  ;;  %v8780_v49 = vadd.f32 %v8687_v54, %v8622_v62 }
 0x3f2   :  { %v5995_v38 = vpop.f32.mrf.mxu0  ;;  %v4640_v10 = vadd.f32 %v4639_v50, %v4616_v23  ;;  %v4620_v25 = vmul.f32 %v4595_v47, %v7406_v4  ;;  %v4597_v52 = vmul.f32 %v8771_v32, %v8771_v32  ;;  %v4541_v54 = vmul.f32 %v8760_v58, %v7417_v44 }
 0x3f3   :  { %v4464_v0 = vpop.f32.mrf.mxu1  ;;  %v4561_v11 = vadd.f32 %v4560_v34, %v4537_v39  ;;  %v8791_v39 = vadd.f32 %v8702_v55, %v8625_v48  ;;  %v4621_v33 = vmul.f32 %v4596_v5, %v7417_v44  ;;  %v4598_v34 = vmul.f32 %v8780_v49, %v8780_v49  ;;  %v9310_v48 = vld [vmem:[#allocation4_spill] sm:$0xff] }
 0x3f4   :  { %v8764_v9 = vpop.f32.mrf.mxu0  ;;  %v4641_v30 = vadd.f32 %v4640_v10, %v4617_v28  ;;  %v8800_v4 = vadd.f32 %v8721_v7, %v8628_v46  ;;  %v4542_v55 = vmul.f32 %v8771_v32, %v9310_v48  ;;  %v9311_v46 = vld [vmem:[#allocation5_spill] sm:$0xff] }
 0x3f5   :  { %v5945_v15 = vpop.f32.mrf.mxu1  ;;  %v4562_v40 = vadd.f32 %v4561_v11, %v4538_v1  ;;  %v4599_v44 = vmul.f32 %v8791_v39, %v8791_v39  ;;  %v8810_v11 = vadd.f32 %v4461_v36, %v8631_v19  ;;  %v4543_v7 = vmul.f32 %v8780_v49, %v9311_v46 }
 0x3f6   :  { %v5998_v6 = vpop.f32.mrf.mxu0  ;;  %v4642_v29 = vadd.f32 %v4641_v30, %v4618_v41  ;;  %v4622_v15 = vmul.f32 %v4597_v52, %v9310_v48  ;;  %v4623_v5 = vmul.f32 %v4598_v34, %v9311_v46  ;;  %v9312_v52 = vld [vmem:[#allocation6_spill] sm:$0xff] }
 0x3f7   :  { %v4469_v23 = vpop.f32.mrf.mxu1  ;;  %v4563_v62 = vadd.f32 %v4562_v40, %v4539_v35  ;;  %v4600_v40 = vmul.f32 %v8800_v4, %v8800_v4  ;;  %v4544_v19 = vmul.f32 %v8791_v39, %v9312_v52 }
 0x3f8   :  { %v8784_v42 = vpop.f32.mrf.mxu0  ;;  %v4643_v28 = vadd.f32 %v4642_v29, %v4619_v37 }
 0x3f9   :  { %v5948_v38 = vpop.f32.mrf.mxu1  ;;  %v4564_v10 = vadd.f32 %v4563_v62, %v4540_v26  ;;  %v8818_v26 = vadd.f32 %v4464_v0, %v8634_v2  ;;  %v4624_v62 = vmul.f32 %v4599_v44, %v9312_v52  ;;  %v9313_v2 = vld [vmem:[#allocation7_spill] sm:$0xff] }
 0x3fa   :  { %v5999_v50 = vpop.f32.mrf.mxu0  ;;  %v4644_v47 = vadd.f32 %v4643_v28, %v4620_v25  ;;  %v4545_v0 = vmul.f32 %v8800_v4, %v9313_v2  ;;  %v4625_v48 = vmul.f32 %v4600_v40, %v9313_v2 }
 0x3fb   :  { %v4472_v1 = vpop.f32.mrf.mxu1  ;;  %v4565_v6 = vadd.f32 %v4564_v10, %v4541_v54  ;;  %v4601_v54 = vmul.f32 %v8810_v11, %v8810_v11  ;;  %v8828_v50 = vadd.f32 %v4469_v23, %v8637_v59 }
 0x3fc   :  { %v8804_v41 = vpop.f32.mrf.mxu0  ;;  %v4645_v37 = vadd.f32 %v4644_v47, %v4621_v33  ;;  %v8836_v47 = vadd.f32 %v4472_v1, %v8640_v57  ;;  %v4547_v57 = vmul.f32 %v8818_v26, %v7473_v51 }
 0x3fd   :  { %v5949_v35 = vpop.f32.mrf.mxu1  ;;  %v4566_v25 = vadd.f32 %v4565_v6, %v4542_v55  ;;  %v4602_v55 = vmul.f32 %v8818_v26, %v8818_v26 }
 0x3fe   :  { %v6002_v30 = vpop.f32.mrf.mxu0  ;;  %v4646_v38 = vadd.f32 %v4645_v37, %v4622_v15  ;;  %v9314_v35 = vld [vmem:[#allocation8_spill] sm:$0xff]  ;;  %v4604_v52 = vmul.f32 %v8836_v47, %v8836_v47 }
 0x3ff   :  { %v4477_v29 = vpop.f32.mrf.mxu1  ;;  %v4567_v33 = vadd.f32 %v4566_v25, %v4543_v7  ;;  %v4546_v59 = vmul.f32 %v8810_v11, %v9314_v35  ;;  %v4626_v46 = vmul.f32 %v4601_v54, %v9314_v35  ;;  %v4603_v7 = vmul.f32 %v8828_v50, %v8828_v50 }
 0x400   :  { %v8822_v36 = vpop.f32.mrf.mxu0  ;;  %v4647_v10 = vadd.f32 %v4646_v38, %v4623_v5  ;;  %v8846_v30 = vadd.f32 %v4477_v29, %v8643_v8  ;;  %v4627_v25 = vmul.f32 %v4602_v55, %v7473_v51  ;;  %v4548_v8 = vmul.f32 %v8828_v50, %v7482_v12 }
 0x401   :  { %v5952_v28 = vpop.f32.mrf.mxu1  ;;  %v4568_v44 = vadd.f32 %v4567_v33, %v4544_v19 }
 0x402   :  { %v6003_v34 = vpop.f32.mrf.mxu0  ;;  %v4648_v6 = vadd.f32 %v4647_v10, %v4624_v62  ;;  %v4628_v28 = vmul.f32 %v4603_v7, %v7482_v12  ;;  %v4605_v33 = vmul.f32 %v8846_v30, %v8846_v30 }
 0x403   :  { %v4480_v15 = vpop.f32.mrf.mxu1  ;;  %v4569_v5 = vadd.f32 %v4568_v44, %v4545_v0  ;;  %v9315_v44 = vld [vmem:[#allocation9_spill] sm:$0xff] }
 0x404   :  { %v8840_v23 = vpop.f32.mrf.mxu0  ;;  %v4649_v40 = vadd.f32 %v4648_v6, %v4625_v48  ;;  %v8854_v19 = vadd.f32 %v4480_v15, %v8646_v43  ;;  %v4549_v43 = vmul.f32 %v8836_v47, %v7486_v18  ;;  %v4629_v48 = vmul.f32 %v4604_v52, %v7486_v18 }
 0x405   :  { %v5953_v37 = vpop.f32.mrf.mxu1  ;;  %v4570_v62 = vadd.f32 %v4569_v5, %v4546_v59  ;;  %v4550_v35 = vmul.f32 %v8846_v30, %v9315_v44  ;;  %v9316_v5 = vld [vmem:[#allocation10_spill] sm:$0xff] }
 0x406   :  { %v6006_v1 = vpop.f32.mrf.mxu0  ;;  %v4650_v54 = vadd.f32 %v4649_v40, %v4626_v46  ;;  %v4606_v55 = vmul.f32 %v8854_v19, %v8854_v19  ;;  %v4630_v46 = vmul.f32 %v4605_v33, %v9315_v44 }
 0x407   :  { %v4485_v38 = vpop.f32.mrf.mxu1  ;;  %v4571_v0 = vadd.f32 %v4570_v62, %v4547_v57  ;;  %v4551_v57 = vmul.f32 %v8854_v19, %v9316_v5 }
 0x408   :  { %v8858_v29 = vpop.f32.mrf.mxu0  ;;  %v8864_v51 = vadd.f32 %v4485_v38, %v8649_v27  ;;  %v4651_v10 = vadd.f32 %v4650_v54, %v4627_v25  ;;  %v4631_v25 = vmul.f32 %v4606_v55, %v9316_v5  ;;  %v9317_v38 = vld [vmem:[#allocation12_spill] sm:$0xff] }
 0x409   :  { %v5956_v2 = vpop.f32.mrf.mxu1  ;;  %v4572_v12 = vadd.f32 %v4571_v0, %v4548_v8 }
 0x40a   :  { %v6007_v34 = vpop.f32.mrf.mxu0  ;;  %v4652_v6 = vadd.f32 %v4651_v10, %v4628_v28  ;;  %v4607_v7 = vmul.f32 %v8864_v51, %v8864_v51  ;;  %v4552_v62 = vmul.f32 %v8864_v51, %v9317_v38 }
 0x40b   :  { %v4488_v15 = vpop.f32.mrf.mxu1  ;;  %v4573_v37 = vadd.f32 %v4572_v12, %v4549_v43  ;;  %v9319_v34 = vld [vmem:[#allocation13_spill] sm:$0xff] }
 0x40c   :  { %v8874_v27 = vadd.f32 %v4488_v15, %v8652_v63  ;;  %v8876_v59 = vpop.f32.mrf.mxu0  ;;  %v4653_v40 = vadd.f32 %v4652_v6, %v4629_v48  ;;  %v4632_v2 = vmul.f32 %v4607_v7, %v9317_v38 }
 0x40d   :  { %v5957_v18 = vpop.f32.mrf.mxu1  ;;  %v4574_v63 = vadd.f32 %v4573_v37, %v4550_v35  ;;  %v9320_v35 = vld [vmem:[#allocation15_spill] sm:$0xff] }
 0x40e   :  { %v6010_v1 = vpop.f32.mrf.mxu0  ;;  %v4608_v8 = vmul.f32 %v8874_v27, %v8874_v27  ;;  %v4654_v33 = vadd.f32 %v4653_v40, %v4630_v46  ;;  %v4553_v10 = vmul.f32 %v8874_v27, %v9319_v34 }
 0x40f   :  { %v4493_v52 = vpop.f32.mrf.mxu1  ;;  %v4575_v43 = vadd.f32 %v4574_v63, %v4551_v57  ;;  %v9323_v1 = vld [vmem:[#allocation16_spill] sm:$0xff] }
 0x410   :  { %v8889_v54 = vadd.f32 %v4493_v52, %v8655_v53  ;;  %v8891_v28 = vpop.f32.mrf.mxu0  ;;  %v4655_v15 = vadd.f32 %v4654_v33, %v4631_v25  ;;  %v4633_v53 = vmul.f32 %v4608_v8, %v9319_v34  ;;  %v9325_v34 = vld [vmem:[#allocation18_spill] sm:$0xff] }
 0x411   :  { %v5960_v0 = vpop.f32.mrf.mxu1  ;;  %v4576_v44 = vadd.f32 %v4575_v43, %v4552_v62 }
 0x412   :  { %9318 = vst [vmem:[#allocation4_spill] sm:$0xff] %v8889_v54  ;;  %v4609_v48 = vmul.f32 %v8889_v54, %v8889_v54  ;;  %v6011_v55 = vpop.f32.mrf.mxu0  ;;  %v4554_v6 = vmul.f32 %v8889_v54, %v9320_v35  ;;  %v4656_v18 = vadd.f32 %v4655_v15, %v4632_v2 }
 0x413   :  { %v4496_v12 = vpop.f32.mrf.mxu1  ;;  %v4577_v5 = vadd.f32 %v4576_v44, %v4553_v10 }
 0x414   :  { %v8902_v46 = vadd.f32 %v4496_v12, %v8658_v20  ;;  %v8904_v7 = vpop.f32.mrf.mxu0  ;;  %v4634_v57 = vmul.f32 %v4609_v48, %v9320_v35  ;;  %v4657_v38 = vadd.f32 %v4656_v18, %v4633_v53 }
 0x415   :  { %9322 = vst [vmem:[#allocation6_spill] sm:$0xff] %v8904_v7  ;;  %v5961_v37 = vpop.f32.mrf.mxu1  ;;  %v4578_v62 = vadd.f32 %v4577_v5, %v4554_v6 }
 0x416   :  { %9321 = vst [vmem:[#allocation5_spill] sm:$0xff] %v8902_v46  ;;  %v4555_v40 = vmul.f32 %v8902_v46, %v9323_v1  ;;  %v4610_v25 = vmul.f32 %v8902_v46, %v8902_v46  ;;  %v6014_v52 = vpop.f32.mrf.mxu0  ;;  %v4658_v0 = vadd.f32 %v4657_v38, %v4634_v57 }
 0x417   :  { %v4501_v63 = vpop.f32.mrf.mxu1 }
 0x418   :  { %v4635_v20 = vmul.f32 %v4610_v25, %v9323_v1  ;;  %v8913_v8 = vadd.f32 %v4501_v63, %v8660_v21  ;;  %v8915_v33 = vpop.f32.mrf.mxu0  ;;  %v4579_v43 = vadd.f32 %v4578_v62, %v4555_v40 }
 0x419   :  { %9324 = vst [vmem:[#allocation7_spill] sm:$0xff] %v8915_v33  ;;  %v5964_v2 = vpop.f32.mrf.mxu1 }
 0x41a   :  { %v4556_v10 = vmul.f32 %v8913_v8, %v9325_v34  ;;  %v4611_v48 = vmul.f32 %v8913_v8, %v8913_v8  ;;  %v6015_v55 = vpop.f32.mrf.mxu0  ;;  %v4659_v12 = vadd.f32 %v4658_v0, %v4635_v20 }
 0x41b   :  { %v4504_v15 = vpop.f32.mrf.mxu1 }
 0x41c   :  { %v4580_v44 = vadd.f32 %v4579_v43, %v4556_v10  ;;  %v4636_v53 = vmul.f32 %v4611_v48, %v9325_v34  ;;  %v4952_v35 = vpop.f32.mrf.mxu0 }
 0x41d   :  { %v5965_v21 = vpop.f32.mrf.mxu1 }
 0x41e   :  { %v4581_v6 = vrot.slane %v4580_v44, 4  ;;  %v4660_v18 = vadd.f32 %v4659_v12, %v4636_v53  ;;  %v6018_v37 = vpop.f32.mrf.mxu0 }
 0x41f   :  { %v9327_v37 = vld [vmem:[#allocation11_spill] sm:$0xff] }
 0x420   :  { %v4582_v5 = vadd.f32 %v4581_v6, %v4580_v44  ;;  %v4661_v57 = vrot.slane %v4660_v18, 4  ;;  %v4955_v1 = vpop.f32.mrf.mxu0  ;;  %v8925_v44 = vld [vmem:[%s9175_s4] ss:$0 sm:$0xff] }
 0x421   :  { %9326 = vst [vmem:[#allocation8_spill] sm:$0xff] %v8925_v44  ;;  %v4857_v53 = vadd.f32 %v8925_v44, %v8662_v24  ;;  %v4860_v21 = vadd.f32 %v8925_v44, %v8664_v61  ;;  %v4672_v6 = vld [vmem:[%s9176_s7] sm:$0x1] }
 0x422   :  { %v4583_v40 = vrot.slane %v4582_v5, 2  ;;  %v4662_v25 = vadd.f32 %v4661_v57, %v4660_v18  ;;  %v6019_v52 = vpop.f32.mrf.mxu0  ;;  %v4865_v18 = vadd.f32 %v8925_v44, %v8666_v16  ;;  %v9328_v57 = vld [vmem:[#allocation14_spill] sm:$0xff] }
 0x423   :  { %v4873_v1 = vadd.f32 %v8925_v44, %v9328_v57  ;;  %v9330_v52 = vld [vmem:[#allocation20_spill] sm:$0xff]  ;;  %v9332_v16 = vld [vmem:[#allocation22_spill] sm:$0xff]  ;;  %v8971_v57 = vadd.f32 %v8925_v44, %v8804_v41  ;;  %v8994_v41 = vadd.f32 %v8925_v44, %v8891_v28 }
 0x424   :  { %v4584_v63 = vadd.f32 %v4583_v40, %v4582_v5  ;;  %v4663_v38 = vrot.slane %v4662_v25, 2  ;;  %v4868_v5 = vadd.f32 %v8925_v44, %v9327_v37  ;;  %v9329_v40 = vld [vmem:[#allocation17_spill] sm:$0xff]  ;;  %v4881_v61 = vadd.f32 %v8925_v44, %v9330_v52 }
 0x425   :  { %v8967_v37 = vadd.f32 %v8925_v44, %v8784_v42  ;;  %v8990_v42 = vadd.f32 %v8925_v44, %v8876_v59  ;;  %9337 = vst [vmem:[#allocation10_spill] sm:$0xff] %v8994_v41  ;;  %v9340_v52 = vld [vmem:[#allocation25_spill] sm:$0xff]  ;;  %v9342_v59 = vld [vmem:[#allocation26_spill] sm:$0xff] }
 0x426   :  { %v4585_v62 = vrot.slane %v4584_v63, 1  ;;  %v4664_v2 = vadd.f32 %v4663_v38, %v4662_v25  ;;  %v4876_v25 = vadd.f32 %v8925_v44, %v9329_v40  ;;  %v9331_v38 = vld [vmem:[#allocation21_spill] sm:$0xff] }
 0x427   :  { %9336 = vst [vmem:[#allocation9_spill] sm:$0xff] %v8990_v42 }
 0x428   :  { %v4586_v55 = vadd.f32 %v4585_v62, %v4584_v63  ;;  %v4665_v20 = vrot.slane %v4664_v2, 1  ;;  %v4884_v63 = vadd.f32 %v8925_v44, %v8676_v14  ;;  %v4889_v62 = vadd.f32 %v8925_v44, %v9331_v38  ;;  %v4676_v14 = vld [vmem:[%s9177_s8] sm:$0x1]  ;;  %v9341_v38 = vld [vmem:[#allocation23_spill] sm:$0xff] }
 0x42a   :  { %v4666_v0 = vadd.f32 %v4665_v20, %v4664_v2  ;;  %v4667_v43 = vmul.f32 0.0078125, %v4586_v55  ;;  %v4892_v2 = vadd.f32 %v8925_v44, %v9332_v16  ;;  %v9333_v55 = vld [vmem:[#allocation24_spill] sm:$0xff] }
 0x42b   :  { %v4897_v20 = vadd.f32 %v8925_v44, %v9333_v55 }
 0x42c   :  { %v4668_v34 = vmul.f32 0.0078125, %v4666_v0  ;;  %v4669_v10 = vmul.f32 %v4667_v43, %v4667_v43  ;;  %v9334_v0 = vld [vmem:[#allocation27_spill] sm:$0xff] }
 0x42e   :  { %v4670_v48 = vsub.f32 %v4668_v34, %v4669_v10  ;;  %v4900_v34 = vadd.f32 %v8925_v44, %v9334_v0  ;;  %v4905_v10 = vadd.f32 %v8925_v44, %v8727_v17 }
 0x430   :  { %v4671_v15 = vmax.f32 %v4670_v48, 0.0 }
 0x432   :  { %v4673_v12 = vadd.f32 1e-05, %v4671_v15  ;;  %v4908_v15 = vadd.f32 %v8925_v44, %v8746_v60  ;;  %v8982_v60 = vadd.f32 %v8925_v44, %v8840_v23 }
 0x434   :  { %6189 = vrsqrt.f32 %v4673_v12  ;;  %v8963_v12 = vadd.f32 %v8925_v44, %v8764_v9  ;;  %v8986_v9 = vadd.f32 %v8925_v44, %v8858_v29 }
 0x441   :  { %v6190_v24 = vpop.eup %6189 }
 0x442   :  { %v4675_v48 = vmul.f32 %v6190_v24, %v4672_v6  ;;  %v9335_v6 = vld [vmem:[#allocation19_spill] sm:$0xff]  ;;  %v8978_v24 = vadd.f32 %v8925_v44, %v8822_v36 }
 0x444   :  { %v4677_v17 = vmul.f32 %v4675_v48, %v4667_v43  ;;  %v8974_v40 = vrot.slane %v4675_v48, %v9335_v6  ;;  %v8997_v43 = vadd.f32 %v8925_v44, %v4952_v35 }
 0x446   :  { %9338 = vst [vmem:[#allocation12_spill] sm:$0xff] %v8997_v43  ;;  %v4678_v36 = vsub.f32 %v4676_v14, %v4677_v17  ;;  %v9001_v23 = vmul.f32 %v8974_v40, %v8913_v8  ;;  %v4964_v29 = vmul.f32 %v8974_v40, %v9340_v52  ;;  %v4965_v16 = vmul.f32 %v8974_v40, %v9341_v38 }
 0x447   :  { %v4966_v55 = vmul.f32 %v8974_v40, %v9342_v59  ;;  %v4967_v28 = vmul.f32 %v8974_v40, %v8700_v31  ;;  %v4968_v35 = vmul.f32 %v8974_v40, %v8711_v56  ;;  %v4969_v0 = vmul.f32 %v8974_v40, %v8719_v3 }
 0x448   :  { %9339 = vst [vmem:[#allocation13_spill] sm:$0xff] %v9001_v23  ;;  %v9016_v8 = vrot.slane %v4678_v36, %v9335_v6  ;;  %v4970_v48 = vmul.f32 %v8974_v40, %v8734_v45  ;;  %v4971_v14 = vmul.f32 %v8974_v40, %v8742_v13  ;;  %v4972_v17 = vmul.f32 %v8974_v40, %v8752_v22 }
 0x449   :  { %v4973_v31 = vmul.f32 %v8974_v40, %v8760_v58  ;;  %v4974_v56 = vmul.f32 %v8974_v40, %v8771_v32  ;;  %v4975_v3 = vmul.f32 %v8974_v40, %v8780_v49  ;;  %v4976_v6 = vmul.f32 %v8974_v40, %v8791_v39 }
 0x44a   :  { %v4977_v45 = vmul.f32 %v8974_v40, %v8800_v4  ;;  %v4995_v13 = vadd.f32 %v9016_v8, %v4964_v29  ;;  %v4996_v36 = vadd.f32 %v9016_v8, %v4965_v16  ;;  %v4997_v22 = vadd.f32 %v9016_v8, %v4966_v55 }
 0x44b   :  { %v4998_v58 = vadd.f32 %v9016_v8, %v4967_v28  ;;  %v4999_v52 = vadd.f32 %v9016_v8, %v4968_v35  ;;  %v5000_v32 = vadd.f32 %v9016_v8, %v4969_v0  ;;  %v5001_v49 = vadd.f32 %v9016_v8, %v4970_v48 }
 0x44c   :  { %v5002_v38 = vadd.f32 %v9016_v8, %v4971_v14  ;;  %v5003_v39 = vadd.f32 %v9016_v8, %v4972_v17  ;;  %v5004_v4 = vadd.f32 %v9016_v8, %v4973_v31  ;;  %v5005_v29 = vadd.f32 %v9016_v8, %v4974_v56 }
 0x44d   :  { %v5006_v16 = vadd.f32 %v9016_v8, %v4975_v3  ;;  %v5007_v59 = vadd.f32 %v9016_v8, %v4976_v6  ;;  %v5008_v55 = vadd.f32 %v9016_v8, %v4977_v45  ;;  %v5020_v28 = vadd.f32 %v4995_v13, %v4857_v53  ;;  %v9343_v13 = vld [vmem:[#allocation9_spill] sm:$0xff] }
 0x44e   :  { %v5021_v35 = vadd.f32 %v4996_v36, %v4860_v21  ;;  %v5022_v43 = vadd.f32 %v4997_v22, %v4865_v18  ;;  %v5023_v0 = vadd.f32 %v4998_v58, %v4868_v5  ;;  %v5024_v33 = vadd.f32 %v4999_v52, %v4873_v1 }
 0x44f   :  { %v5025_v48 = vadd.f32 %v5000_v32, %v4876_v25  ;;  %v5026_v44 = vadd.f32 %v5001_v49, %v4881_v61  ;;  %v5027_v14 = vadd.f32 %v5002_v38, %v4884_v63  ;;  %v5028_v7 = vadd.f32 %v5003_v39, %v4889_v62  ;;  %v9345_v38 = vld [vmem:[#allocation4_spill] sm:$0xff] }
 0x450   :  { %v5029_v17 = vadd.f32 %v5004_v4, %v4892_v2  ;;  %v5030_v23 = vadd.f32 %v5005_v29, %v4897_v20  ;;  %v5031_v31 = vadd.f32 %v5006_v16, %v4900_v34  ;;  %v5032_v46 = vadd.f32 %v5007_v59, %v4905_v10  ;;  %v9347_v4 = vld [vmem:[#allocation13_spill] sm:$0xff]  ;;  %v9348_v16 = vld [vmem:[#allocation6_spill] sm:$0xff]  ;;  %v9349_v59 = vld [vmem:[#allocation8_spill] sm:$0xff] }
 0x451   :  { %v5033_v56 = vadd.f32 %v5008_v55, %v4908_v15  ;;  %v5045_v54 = vmax.f32 %v5020_v28, 0.0  ;;  %v5046_v3 = vmax.f32 %v5021_v35, 0.0  ;;  %v5047_v41 = vmax.f32 %v5022_v43, 0.0  ;;  %v9350_v28 = vld [vmem:[#allocation7_spill] sm:$0xff] }
 0x452   :  { %v5048_v6 = vmax.f32 %v5023_v0, 0.0  ;;  %v5049_v42 = vmax.f32 %v5024_v33, 0.0  ;;  %v5050_v45 = vmax.f32 %v5025_v48, 0.0  ;;  %v5051_v53 = vmax.f32 %v5026_v44, 0.0  ;;  %v9351_v48 = vld [vmem:[#allocation12_spill] sm:$0xff] }
 0x453   :  { %v5052_v21 = vmax.f32 %v5027_v14, 0.0  ;;  %v5053_v18 = vmax.f32 %v5028_v7, 0.0  ;;  %v5054_v5 = vmax.f32 %v5029_v17, 0.0  ;;  %v5055_v1 = vmax.f32 %v5030_v23, 0.0  ;;  %5070 = vst [vmem:[%s9178_s10] sm:$0xff] %v5045_v54  ;;  %5071 = vst [vmem:[%s9178_s10 + $0x8] sm:$0xff] %v5046_v3 }
 0x454   :  { %5072 = vst [vmem:[%s9178_s10 + $0x10] sm:$0xff] %v5047_v41  ;;  %v5056_v25 = vmax.f32 %v5031_v31, 0.0  ;;  %v5057_v33 = vmax.f32 %v5032_v46, 0.0  ;;  %v5058_v61 = vmax.f32 %v5033_v56, 0.0  ;;  %5073 = vst [vmem:[%s9178_s10 + $0x18] sm:$0xff] %v5048_v6  ;;  %v4978_v54 = vmul.f32 %v8974_v40, %v8810_v11 }
 0x455   :  { %5074 = vst [vmem:[%s9178_s10 + $0x20] sm:$0xff] %v5049_v42  ;;  %5075 = vst [vmem:[%s9178_s10 + $0x28] sm:$0xff] %v5050_v45  ;;  %v4979_v46 = vmul.f32 %v8974_v40, %v8818_v26  ;;  %v4980_v11 = vmul.f32 %v8974_v40, %v8828_v50  ;;  %v4981_v7 = vmul.f32 %v8974_v40, %v8836_v47 }
 0x456   :  { %5076 = vst [vmem:[%s9178_s10 + $0x30] sm:$0xff] %v5051_v53  ;;  %5077 = vst [vmem:[%s9178_s10 + $0x38] sm:$0xff] %v5052_v21  ;;  %v4982_v44 = vmul.f32 %v8974_v40, %v8846_v30  ;;  %v5009_v26 = vadd.f32 %v9016_v8, %v4978_v54  ;;  %v4983_v50 = vmul.f32 %v8974_v40, %v8854_v19 }
 0x457   :  { %5078 = vst [vmem:[%s9178_s10 + $0x40] sm:$0xff] %v5053_v18  ;;  %5079 = vst [vmem:[%s9178_s10 + $0x48] sm:$0xff] %v5054_v5  ;;  %v4984_v47 = vmul.f32 %v8974_v40, %v8864_v51  ;;  %v4985_v30 = vmul.f32 %v8974_v40, %v8874_v27  ;;  %v5010_v63 = vadd.f32 %v9016_v8, %v4979_v46 }
 0x458   :  { %5080 = vst [vmem:[%s9178_s10 + $0x50] sm:$0xff] %v5055_v1  ;;  %5081 = vst [vmem:[%s9178_s10 + $0x58] sm:$0xff] %v5056_v25  ;;  %v5011_v62 = vadd.f32 %v9016_v8, %v4980_v11  ;;  %v5012_v2 = vadd.f32 %v9016_v8, %v4981_v7  ;;  %v5013_v20 = vadd.f32 %v9016_v8, %v4982_v44 }
 0x459   :  { %5082 = vst [vmem:[%s9178_s10 + $0x60] sm:$0xff] %v5057_v33  ;;  %5083 = vst [vmem:[%s9178_s10 + $0x68] sm:$0xff] %v5058_v61  ;;  %v5034_v34 = vadd.f32 %v5009_v26, %v8963_v12  ;;  %v5014_v10 = vadd.f32 %v9016_v8, %v4983_v50  ;;  %v5015_v19 = vadd.f32 %v9016_v8, %v4984_v47  ;;  %v9344_v12 = vld [vmem:[#allocation10_spill] sm:$0xff] }
 0x45a   :  { %v5016_v15 = vadd.f32 %v9016_v8, %v4985_v30  ;;  %v5035_v51 = vadd.f32 %v5010_v63, %v8967_v37  ;;  %v5036_v27 = vadd.f32 %v5011_v62, %v8971_v57  ;;  %v5037_v42 = vadd.f32 %v5012_v2, %v8978_v24 }
 0x45b   :  { %v5038_v41 = vadd.f32 %v5013_v20, %v8982_v60  ;;  %v5059_v43 = vmax.f32 %v5034_v34, 0.0  ;;  %v5039_v23 = vadd.f32 %v5014_v10, %v8986_v9  ;;  %v5040_v36 = vadd.f32 %v5015_v19, %v9343_v13  ;;  %v9346_v9 = vld [vmem:[#allocation5_spill] sm:$0xff] }
 0x45c   :  { %v5041_v22 = vadd.f32 %v5016_v15, %v9344_v12  ;;  %v5060_v58 = vmax.f32 %v5035_v51, 0.0  ;;  %v5061_v52 = vmax.f32 %v5036_v27, 0.0  ;;  %v5062_v32 = vmax.f32 %v5037_v42, 0.0 }
 0x45d   :  { %v5063_v49 = vmax.f32 %v5038_v41, 0.0  ;;  %5084 = vst [vmem:[%s9178_s10 + $0x70] sm:$0xff] %v5059_v43  ;;  %v5064_v37 = vmax.f32 %v5039_v23, 0.0  ;;  %v5065_v57 = vmax.f32 %v5040_v36, 0.0  ;;  %v4986_v60 = vmul.f32 %v8974_v40, %v9345_v38 }
 0x45e   :  { %v5066_v24 = vmax.f32 %v5041_v22, 0.0  ;;  %5085 = vst [vmem:[%s9178_s10 + $0x78] sm:$0xff] %v5060_v58  ;;  %5086 = vst [vmem:[%s9178_s10 + $0x80] sm:$0xff] %v5061_v52  ;;  %v4987_v39 = vmul.f32 %v8974_v40, %v9346_v9  ;;  %v5019_v29 = vadd.f32 %v9016_v8, %v9347_v4  ;;  %v4945_v55 = vadd.f32 %v9349_v59, %v9348_v16 }
 0x45f   :  { %5087 = vst [vmem:[%s9178_s10 + $0x88] sm:$0xff] %v5062_v32  ;;  %5088 = vst [vmem:[%s9178_s10 + $0x90] sm:$0xff] %v5063_v49  ;;  %v5017_v40 = vadd.f32 %v9016_v8, %v4986_v60  ;;  %v4948_v35 = vadd.f32 %v9349_v59, %v9350_v28 }
 0x460   :  { %5089 = vst [vmem:[%s9178_s10 + $0x98] sm:$0xff] %v5064_v37  ;;  %5090 = vst [vmem:[%s9178_s10 + $0xa0] sm:$0xff] %v5065_v57  ;;  %v5018_v0 = vadd.f32 %v9016_v8, %v4987_v39  ;;  %v5044_v14 = vadd.f32 %v5019_v29, %v9351_v48 }
 0x461   :  { %5091 = vst [vmem:[%s9178_s10 + $0xa8] sm:$0xff] %v5066_v24  ;;  %v5042_v17 = vadd.f32 %v5017_v40, %v4945_v55 }
 0x462   :  { %v5043_v31 = vadd.f32 %v5018_v0, %v4948_v35  ;;  %v5069_v56 = vmax.f32 %v5044_v14, 0.0 }
 0x463   :  { %v5067_v3 = vmax.f32 %v5042_v17, 0.0 }
 0x464   :  { %v5068_v6 = vmax.f32 %v5043_v31, 0.0  ;;  %5094 = vst [vmem:[%s9178_s10 + $0xc0] sm:$0xff] %v5069_v56 }
 0x465   :  { %5092 = vst [vmem:[%s9178_s10 + $0xb0] sm:$0xff] %v5067_v3 }
 0x466   :  { %5093 = vst [vmem:[%s9178_s10 + $0xb8] sm:$0xff] %v5068_v6 }

</bundles_post_ra>
